<compile_context>
chip_gen: v7x
topology: tpu7x:2x2x1
jax: 0.10.0
libtpu: 0.0.40
codegen_flags: <defaults>
</compile_context>

<pallas_src>
from functools import partial

import jax
import jax.numpy as jnp
from jax.experimental import pallas as pl
from jax.experimental.pallas import tpu as pltpu


D_IN = 784        # 1*28*28
HID = 512


def _round_up(x, m):
    return ((x + m - 1) // m) * m


# ----------------------------------------------------------------------------
# Kernel: whole autoencoder forward for one batch tile.
# Weights are bf16 (halved HBM traffic, bf16 MXU); accumulation is f32.
# ----------------------------------------------------------------------------
def autoencoder_kernel(x_ref,
                       w1e_ref, b1e_ref,   # encoder linear1: 784 -> 512
                       w2e_ref, b2e_ref,   # encoder linear2: 512 -> lat_pad
                       w1d_ref, b1d_ref,   # decoder linear1: lat_pad -> 512
                       w2d_ref, b2d_ref,   # decoder linear2: 512 -> 784
                       out_ref):
    x = x_ref[...].astype(jnp.bfloat16)                              # (TB, 784)

    # ---- encoder ----
    h = jnp.dot(x, w1e_ref[...], preferred_element_type=jnp.float32) + b1e_ref[...]
    h = jnp.maximum(h, 0.0)                                          # ReLU (f32)
    z = jnp.dot(h.astype(jnp.bfloat16), w2e_ref[...],
                preferred_element_type=jnp.float32) + b2e_ref[...]

    # ---- decoder ----
    d = jnp.dot(z.astype(jnp.bfloat16), w1d_ref[...],
                preferred_element_type=jnp.float32) + b1d_ref[...]
    d = jnp.maximum(d, 0.0)                                          # ReLU (f32)
    y = jnp.dot(d.astype(jnp.bfloat16), w2d_ref[...],
                preferred_element_type=jnp.float32) + b2d_ref[...]

    # ---- sigmoid: 1 / (1 + exp(-y)) ----
    # One-sided guard (single VPU pass) keeps exp from overflowing for very
    # negative y; exact division keeps the result in [0, 1].
    e = jnp.exp(jnp.minimum(-y, 30.0))
    out_ref[...] = (1.0 / (1.0 + e)).astype(out_ref.dtype)           # (TB, 784)


# ----------------------------------------------------------------------------
# One-time parameter preparation (hoisted out of the forward): bf16 cast and
# latent-dim padding to 128 (zero pad -> numerically exact).
# ----------------------------------------------------------------------------
def prepare_params(params):
    w1e, b1e, w2e, b2e, w1d, b1d, w2d, b2d = params
    latent = w2e.shape[1]
    lat_pad = max(128, _round_up(latent, 128))

    w2e_p = jnp.zeros((HID, lat_pad), jnp.bfloat16).at[:, :latent].set(
        w2e.astype(jnp.bfloat16))
    b2e_p = jnp.zeros((1, lat_pad), jnp.float32).at[:, :latent].set(
        b2e.astype(jnp.float32))
    w1d_p = jnp.zeros((lat_pad, HID), jnp.bfloat16).at[:latent, :].set(
        w1d.astype(jnp.bfloat16))

    return (w1e.astype(jnp.bfloat16), b1e.astype(jnp.float32),
            w2e_p, b2e_p,
            w1d_p, b1d.astype(jnp.float32),
            w2d.astype(jnp.bfloat16), b2d.astype(jnp.float32))


def _choose_tile(B, block_b):
    """Batch-tile size + padded batch.  Limits zero-row waste and keeps >=2
    tiles when there is enough work so both v7x TensorCores get a share."""
    b8 = _round_up(max(B, 1), 8)
    n_tiles = max(1, -(-b8 // block_b))        # ceil(b8 / block_b)
    if n_tiles == 1 and b8 >= 16:
        n_tiles = 2                            # feed both TCs on v7x
    tb = _round_up(-(-B // n_tiles), 8)        # ceil(B / n_tiles), multiple of 8
    b_pad = n_tiles * tb
    return tb, b_pad


# ----------------------------------------------------------------------------
# Forward wrapper.
# ----------------------------------------------------------------------------
def autoencoder_forward(x_nchw, params, *, block_b=512, single_buffer_weights=True):
    """x_nchw: (B, 1, 28, 28) float32 -> (B, 1, 28, 28) float32.
    `params` must come from prepare_params()."""
    B = x_nchw.shape[0]
    w1e, b1e, w2e, b2e, w1d, b1d, w2d, b2d = params
    lat_pad = w2e.shape[1]

    tb, b_pad = _choose_tile(B, block_b)
    grid = (b_pad // tb,)

    # flatten (row-major == torch.flatten(start_dim=1)); pad only batch rows.
    x_flat = x_nchw.reshape(B, D_IN).astype(jnp.float32)
    if b_pad != B:
        x_flat = jnp.pad(x_flat, ((0, b_pad - B), (0, 0)))

    # Pinned (VMEM-resident) weights: constant block index.  Single-buffering
    # them saves the unused second VMEM copy (~1.9 MiB) on v7x.
    wkw = dict(pipeline_mode=pl.Buffered(1)) if single_buffer_weights else {}

    def const_spec(shape):
        nd = len(shape)
        return pl.BlockSpec(shape, lambda i: (0,) * nd, **wkw)

    flops = 2 * b_pad * (D_IN * HID + HID * lat_pad + lat_pad * HID + HID * D_IN)
    bytes_accessed = (
        2 * b_pad * D_IN * 4                                    # x read + out write (f32)
        + (w1e.size + w2e.size + w1d.size + w2d.size) * 2       # bf16 weights (fetched once)
        + (b1e.size + b2e.size + b1d.size + b2d.size) * 4       # f32 biases
    )

    out_p = pl.pallas_call(
        autoencoder_kernel,
        out_shape=jax.ShapeDtypeStruct((b_pad, D_IN), jnp.float32),
        grid_spec=pltpu.PrefetchScalarGridSpec(
            num_scalar_prefetch=0,
            grid=grid,
            in_specs=[
                pl.BlockSpec((tb, D_IN), lambda i: (i, 0)),     # x: batch-tiled, unpadded cols
                const_spec(w1e.shape), const_spec(b1e.shape),
                const_spec(w2e.shape), const_spec(b2e.shape),
                const_spec(w1d.shape), const_spec(b1d.shape),
                const_spec(w2d.shape), const_spec(b2d.shape),
            ],
            out_specs=pl.BlockSpec((tb, D_IN), lambda i: (i, 0)),
        ),
        compiler_params=pltpu.CompilerParams(
            dimension_semantics=("parallel",),   # batch tiles split across TCs (v7x)
            vmem_limit_bytes=48 << 20,           # room for TB up to ~1024; < v7x 64 MiB
        ),
        cost_estimate=pl.CostEstimate(
            flops=flops,
            transcendentals=b_pad * D_IN,        # one exp per output element
            bytes_accessed=bytes_accessed,
        ),
    )(x_flat, w1e, b1e, w2e, b2e, w1d, b1d, w2d, b2d)

    out = out_p[:B] if b_pad != B else out_p
    return out.reshape(B, 1, 28, 28)


# ----------------------------------------------------------------------------
# Parameter init matching nn.Linear shapes (stored transposed: (in, out)).
# ----------------------------------------------------------------------------
def init_params(key, latent_dims):
    def linear(key, fan_in, fan_out):
        kw, kb = jax.random.split(key)
        bound = 1.0 / jnp.sqrt(fan_in)
        w = jax.random.uniform(kw, (fan_in, fan_out), jnp.float32, -bound, bound)
        b = jax.random.uniform(kb, (1, fan_out), jnp.float32, -bound, bound)
        return w, b

    k1, k2, k3, k4 = jax.random.split(key, 4)
    w1e, b1e = linear(k1, 784, 512)           # encoder.linear1
    w2e, b2e = linear(k2, 512, latent_dims)   # encoder.linear2
    w1d, b1d = linear(k3, latent_dims, 512)   # decoder.linear1
    w2d, b2d = linear(k4, 512, 784)           # decoder.linear2
    return (w1e, b1e, w2e, b2e, w1d, b1d, w2d, b2d)


def reference_forward(x_nchw, params):
    """Pure-JAX f32 reference matching the PyTorch forward."""
    w1e, b1e, w2e, b2e, w1d, b1d, w2d, b2d = params
    x = x_nchw.reshape(x_nchw.shape[0], -1)
    h = jax.nn.relu(x @ w1e + b1e)
    z = h @ w2e + b2e
    d = jax.nn.relu(z @ w1d + b1d)
    y = jax.nn.sigmoid(d @ w2d + b2d)
    return y.reshape(-1, 1, 28, 28)


if __name__ == "__main__":
    latent_dims = 32
    B = 8

    key = jax.random.PRNGKey(0)
    k_x, k_p = jax.random.split(key)

    x = jax.random.normal(k_x, (B, 1, 28, 28), dtype=jnp.float32)
    params = init_params(k_p, latent_dims)
    prepared = prepare_params(params)          # one-time pad + bf16 cast

    fwd = jax.jit(autoencoder_forward,
                  static_argnames=("block_b", "single_buffer_weights"))

    # Prefer single-buffered pinned weights; fall back to default double
    # buffering if this Pallas/Mosaic version rejects pl.Buffered(1).
    out = None
    for single_buf in (True, False):
        try:
            out = jax.block_until_ready(
                fwd(x, prepared, single_buffer_weights=single_buf))
            break
        except Exception:
            if not single_buf:
                raise

    assert out.shape == (B, 1, 28, 28), out.shape
    assert out.dtype == jnp.float32
    assert bool(jnp.all(jnp.isfinite(out)))
    # sigmoid output must lie in [0, 1] (exact division in the kernel)
    assert bool(jnp.all(out >= 0.0)) and bool(jnp.all(out <= 1.0))

    # numerical check vs pure-JAX f32 reference (bf16 weights => loose tolerance)
    ref = reference_forward(x, params)
    assert bool(jnp.allclose(out, ref, atol=5e-2, rtol=5e-2)), (
        float(jnp.max(jnp.abs(out - ref))))

    print("KERNEL_OK")
</pallas_src>

<mosaic_0001>
module attributes {stable_mosaic.version = 11 : i64} {
  func.func @autoencoder_kernel(%arg0: i32, %arg1: memref<8x784xf32, #tpu.memory_space<vmem>>, %arg2: memref<784x512xbf16, #tpu.memory_space<vmem>>, %arg3: memref<1x512xf32, #tpu.memory_space<vmem>>, %arg4: memref<512x128xbf16, #tpu.memory_space<vmem>>, %arg5: memref<1x128xf32, #tpu.memory_space<vmem>>, %arg6: memref<128x512xbf16, #tpu.memory_space<vmem>>, %arg7: memref<1x512xf32, #tpu.memory_space<vmem>>, %arg8: memref<512x784xbf16, #tpu.memory_space<vmem>>, %arg9: memref<1x784xf32, #tpu.memory_space<vmem>>, %arg10: memref<8x784xf32, #tpu.memory_space<vmem>>) attributes {dimension_semantics = [#tpu.dimension_semantics<parallel>], iteration_bounds = array<i64: 1>, scalar_prefetch = 0 : i64, scratch_operands = 0 : i64, tpu.core_type = #tpu.core_type<tc>, window_params = [{transform_indices = @transform_0, window_bounds = array<i64: 8, 784>}, {pipeline_mode = #tpu.pipeline_mode<synchronous>, transform_indices = @transform_1, window_bounds = array<i64: 784, 512>}, {pipeline_mode = #tpu.pipeline_mode<synchronous>, transform_indices = @transform_2, window_bounds = array<i64: 1, 512>}, {pipeline_mode = #tpu.pipeline_mode<synchronous>, transform_indices = @transform_3, window_bounds = array<i64: 512, 128>}, {pipeline_mode = #tpu.pipeline_mode<synchronous>, transform_indices = @transform_4, window_bounds = array<i64: 1, 128>}, {pipeline_mode = #tpu.pipeline_mode<synchronous>, transform_indices = @transform_5, window_bounds = array<i64: 128, 512>}, {pipeline_mode = #tpu.pipeline_mode<synchronous>, transform_indices = @transform_6, window_bounds = array<i64: 1, 512>}, {pipeline_mode = #tpu.pipeline_mode<synchronous>, transform_indices = @transform_7, window_bounds = array<i64: 512, 784>}, {pipeline_mode = #tpu.pipeline_mode<synchronous>, transform_indices = @transform_8, window_bounds = array<i64: 1, 784>}, {transform_indices = @transform_9, window_bounds = array<i64: 8, 784>}]} {
    %c0 = arith.constant 0 : index
    %c0_0 = arith.constant 0 : index
    %0 = vector.load %arg1[%c0, %c0_0] : memref<8x784xf32, #tpu.memory_space<vmem>>, vector<8x784xf32>
    %1 = arith.truncf %0 : vector<8x784xf32> to vector<8x784xbf16>
    %c0_1 = arith.constant 0 : index
    %c0_2 = arith.constant 0 : index
    %2 = vector.load %arg2[%c0_1, %c0_2] : memref<784x512xbf16, #tpu.memory_space<vmem>>, vector<784x512xbf16>
    %cst = arith.constant dense<0.000000e+00> : vector<8x512xf32>
    %3 = tpu.matmul %1, %2, %cst {dimension_numbers = #tpu.dot_dimension_numbers<[1], [0], [0], [1], [0, 0, 1, 1], [], []>} : vector<8x784xbf16>, vector<784x512xbf16>, vector<8x512xf32> -> vector<8x512xf32>
    %c0_3 = arith.constant 0 : index
    %c0_4 = arith.constant 0 : index
    %4 = vector.load %arg3[%c0_3, %c0_4] : memref<1x512xf32, #tpu.memory_space<vmem>>, vector<1x512xf32>
    %5 = vector.broadcast %4 : vector<1x512xf32> to vector<8x512xf32>
    %6 = arith.addf %3, %5 : vector<8x512xf32>
    %cst_5 = arith.constant 0.000000e+00 : f32
    %7 = vector.broadcast %cst_5 : f32 to vector<8x512xf32>
    %8 = arith.maximumf %6, %7 : vector<8x512xf32>
    %9 = arith.truncf %8 : vector<8x512xf32> to vector<8x512xbf16>
    %c0_6 = arith.constant 0 : index
    %c0_7 = arith.constant 0 : index
    %10 = vector.load %arg4[%c0_6, %c0_7] : memref<512x128xbf16, #tpu.memory_space<vmem>>, vector<512x128xbf16>
    %cst_8 = arith.constant dense<0.000000e+00> : vector<8x128xf32>
    %11 = tpu.matmul %9, %10, %cst_8 {dimension_numbers = #tpu.dot_dimension_numbers<[1], [0], [0], [1], [0, 0, 1, 1], [], []>} : vector<8x512xbf16>, vector<512x128xbf16>, vector<8x128xf32> -> vector<8x128xf32>
    %c0_9 = arith.constant 0 : index
    %c0_10 = arith.constant 0 : index
    %12 = vector.load %arg5[%c0_9, %c0_10] : memref<1x128xf32, #tpu.memory_space<vmem>>, vector<1x128xf32>
    %13 = vector.broadcast %12 : vector<1x128xf32> to vector<8x128xf32>
    %14 = arith.addf %11, %13 : vector<8x128xf32>
    %15 = arith.truncf %14 : vector<8x128xf32> to vector<8x128xbf16>
    %c0_11 = arith.constant 0 : index
    %c0_12 = arith.constant 0 : index
    %16 = vector.load %arg6[%c0_11, %c0_12] : memref<128x512xbf16, #tpu.memory_space<vmem>>, vector<128x512xbf16>
    %cst_13 = arith.constant dense<0.000000e+00> : vector<8x512xf32>
    %17 = tpu.matmul %15, %16, %cst_13 {dimension_numbers = #tpu.dot_dimension_numbers<[1], [0], [0], [1], [0, 0, 1, 1], [], []>} : vector<8x128xbf16>, vector<128x512xbf16>, vector<8x512xf32> -> vector<8x512xf32>
    %c0_14 = arith.constant 0 : index
    %c0_15 = arith.constant 0 : index
    %18 = vector.load %arg7[%c0_14, %c0_15] : memref<1x512xf32, #tpu.memory_space<vmem>>, vector<1x512xf32>
    %19 = vector.broadcast %18 : vector<1x512xf32> to vector<8x512xf32>
    %20 = arith.addf %17, %19 : vector<8x512xf32>
    %cst_16 = arith.constant 0.000000e+00 : f32
    %21 = vector.broadcast %cst_16 : f32 to vector<8x512xf32>
    %22 = arith.maximumf %20, %21 : vector<8x512xf32>
    %23 = arith.truncf %22 : vector<8x512xf32> to vector<8x512xbf16>
    %c0_17 = arith.constant 0 : index
    %c0_18 = arith.constant 0 : index
    %24 = vector.load %arg8[%c0_17, %c0_18] : memref<512x784xbf16, #tpu.memory_space<vmem>>, vector<512x784xbf16>
    %cst_19 = arith.constant dense<0.000000e+00> : vector<8x784xf32>
    %25 = tpu.matmul %23, %24, %cst_19 {dimension_numbers = #tpu.dot_dimension_numbers<[1], [0], [0], [1], [0, 0, 1, 1], [], []>} : vector<8x512xbf16>, vector<512x784xbf16>, vector<8x784xf32> -> vector<8x784xf32>
    %c0_20 = arith.constant 0 : index
    %c0_21 = arith.constant 0 : index
    %26 = vector.load %arg9[%c0_20, %c0_21] : memref<1x784xf32, #tpu.memory_space<vmem>>, vector<1x784xf32>
    %27 = vector.broadcast %26 : vector<1x784xf32> to vector<8x784xf32>
    %28 = arith.addf %25, %27 : vector<8x784xf32>
    %cst_22 = arith.constant 0.000000e+00 : f32
    %29 = vector.broadcast %cst_22 : f32 to vector<8x784xf32>
    %30 = arith.subf %29, %28 : vector<8x784xf32>
    %cst_23 = arith.constant 3.000000e+01 : f32
    %31 = vector.broadcast %cst_23 : f32 to vector<8x784xf32>
    %32 = arith.minimumf %30, %31 : vector<8x784xf32>
    %33 = math.exp %32 : vector<8x784xf32>
    %cst_24 = arith.constant 1.000000e+00 : f32
    %34 = vector.broadcast %cst_24 : f32 to vector<8x784xf32>
    %35 = arith.addf %34, %33 : vector<8x784xf32>
    %cst_25 = arith.constant 1.000000e+00 : f32
    %36 = vector.broadcast %cst_25 : f32 to vector<8x784xf32>
    %37 = arith.divf %36, %35 : vector<8x784xf32>
    %c0_26 = arith.constant 0 : index
    %c0_27 = arith.constant 0 : index
    %38 = vector.load %arg10[%c0_26, %c0_27] : memref<8x784xf32, #tpu.memory_space<vmem>>, vector<8x784xf32>
    tpu.vector_store %arg10[%c0_26, %c0_27], %37 {strides = array<i32>} : memref<8x784xf32, #tpu.memory_space<vmem>>, vector<8x784xf32>,
    return
  }
  func.func @transform_0(%arg0: i32) -> (i32, i32) {
    %c0_i32 = arith.constant 0 : i32
    %c0_i32_0 = arith.constant 0 : i32
    return %arg0, %c0_i32 : i32, i32
  }
  func.func @transform_1(%arg0: i32) -> (i32, i32) {
    %c0_i32 = arith.constant 0 : i32
    %c0_i32_0 = arith.constant 0 : i32
    %c0_i32_1 = arith.constant 0 : i32
    return %c0_i32, %c0_i32_0 : i32, i32
  }
  func.func @transform_2(%arg0: i32) -> (i32, i32) {
    %c0_i32 = arith.constant 0 : i32
    %c0_i32_0 = arith.constant 0 : i32
    %c0_i32_1 = arith.constant 0 : i32
    return %c0_i32, %c0_i32_0 : i32, i32
  }
  func.func @transform_3(%arg0: i32) -> (i32, i32) {
    %c0_i32 = arith.constant 0 : i32
    %c0_i32_0 = arith.constant 0 : i32
    %c0_i32_1 = arith.constant 0 : i32
    return %c0_i32, %c0_i32_0 : i32, i32
  }
  func.func @transform_4(%arg0: i32) -> (i32, i32) {
    %c0_i32 = arith.constant 0 : i32
    %c0_i32_0 = arith.constant 0 : i32
    %c0_i32_1 = arith.constant 0 : i32
    return %c0_i32, %c0_i32_0 : i32, i32
  }
  func.func @transform_5(%arg0: i32) -> (i32, i32) {
    %c0_i32 = arith.constant 0 : i32
    %c0_i32_0 = arith.constant 0 : i32
    %c0_i32_1 = arith.constant 0 : i32
    return %c0_i32, %c0_i32_0 : i32, i32
  }
  func.func @transform_6(%arg0: i32) -> (i32, i32) {
    %c0_i32 = arith.constant 0 : i32
    %c0_i32_0 = arith.constant 0 : i32
    %c0_i32_1 = arith.constant 0 : i32
    return %c0_i32, %c0_i32_0 : i32, i32
  }
  func.func @transform_7(%arg0: i32) -> (i32, i32) {
    %c0_i32 = arith.constant 0 : i32
    %c0_i32_0 = arith.constant 0 : i32
    %c0_i32_1 = arith.constant 0 : i32
    return %c0_i32, %c0_i32_0 : i32, i32
  }
  func.func @transform_8(%arg0: i32) -> (i32, i32) {
    %c0_i32 = arith.constant 0 : i32
    %c0_i32_0 = arith.constant 0 : i32
    %c0_i32_1 = arith.constant 0 : i32
    return %c0_i32, %c0_i32_0 : i32, i32
  }
  func.func @transform_9(%arg0: i32) -> (i32, i32) {
    %c0_i32 = arith.constant 0 : i32
    %c0_i32_0 = arith.constant 0 : i32
    return %arg0, %c0_i32 : i32, i32
  }
}

module attributes {stable_mosaic.version = 11 : i64} {
  func.func @autoencoder_kernel(%arg0: i32, %arg1: memref<8x784xf32, #tpu.memory_space<vmem>>, %arg2: memref<784x512xbf16, #tpu.memory_space<vmem>>, %arg3: memref<1x512xf32, #tpu.memory_space<vmem>>, %arg4: memref<512x128xbf16, #tpu.memory_space<vmem>>, %arg5: memref<1x128xf32, #tpu.memory_space<vmem>>, %arg6: memref<128x512xbf16, #tpu.memory_space<vmem>>, %arg7: memref<1x512xf32, #tpu.memory_space<vmem>>, %arg8: memref<512x784xbf16, #tpu.memory_space<vmem>>, %arg9: memref<1x784xf32, #tpu.memory_space<vmem>>, %arg10: memref<8x784xf32, #tpu.memory_space<vmem>>) attributes {dimension_semantics = [#tpu.dimension_semantics<parallel>], iteration_bounds = array<i64: 1>, scalar_prefetch = 0 : i64, scratch_operands = 0 : i64, tpu.core_type = #tpu.core_type<tc>, window_params = [{transform_indices = @transform_0, window_bounds = array<i64: 8, 784>}, {pipeline_mode = #tpu.pipeline_mode<synchronous>, transform_indices = @transform_1, window_bounds = array<i64: 784, 512>}, {pipeline_mode = #tpu.pipeline_mode<synchronous>, transform_indices = @transform_2, window_bounds = array<i64: 1, 512>}, {pipeline_mode = #tpu.pipeline_mode<synchronous>, transform_indices = @transform_3, window_bounds = array<i64: 512, 128>}, {pipeline_mode = #tpu.pipeline_mode<synchronous>, transform_indices = @transform_4, window_bounds = array<i64: 1, 128>}, {pipeline_mode = #tpu.pipeline_mode<synchronous>, transform_indices = @transform_5, window_bounds = array<i64: 128, 512>}, {pipeline_mode = #tpu.pipeline_mode<synchronous>, transform_indices = @transform_6, window_bounds = array<i64: 1, 512>}, {pipeline_mode = #tpu.pipeline_mode<synchronous>, transform_indices = @transform_7, window_bounds = array<i64: 512, 784>}, {pipeline_mode = #tpu.pipeline_mode<synchronous>, transform_indices = @transform_8, window_bounds = array<i64: 1, 784>}, {transform_indices = @transform_9, window_bounds = array<i64: 8, 784>}]} {
    %c0 = arith.constant 0 : index
    %c0_0 = arith.constant 0 : index
    %0 = vector.load %arg1[%c0, %c0_0] : memref<8x784xf32, #tpu.memory_space<vmem>>, vector<8x784xf32>
    %1 = arith.truncf %0 : vector<8x784xf32> to vector<8x784xbf16>
    %c0_1 = arith.constant 0 : index
    %c0_2 = arith.constant 0 : index
    %2 = vector.load %arg2[%c0_1, %c0_2] : memref<784x512xbf16, #tpu.memory_space<vmem>>, vector<784x512xbf16>
    %cst = arith.constant dense<0.000000e+00> : vector<8x512xf32>
    %3 = tpu.matmul %1, %2, %cst {dimension_numbers = #tpu.dot_dimension_numbers<[1], [0], [0], [1], [0, 0, 1, 1], [], []>} : vector<8x784xbf16>, vector<784x512xbf16>, vector<8x512xf32> -> vector<8x512xf32>
    %c0_3 = arith.constant 0 : index
    %c0_4 = arith.constant 0 : index
    %4 = vector.load %arg3[%c0_3, %c0_4] : memref<1x512xf32, #tpu.memory_space<vmem>>, vector<1x512xf32>
    %5 = vector.broadcast %4 : vector<1x512xf32> to vector<8x512xf32>
    %6 = arith.addf %3, %5 : vector<8x512xf32>
    %cst_5 = arith.constant 0.000000e+00 : f32
    %7 = vector.broadcast %cst_5 : f32 to vector<8x512xf32>
    %8 = arith.maximumf %6, %7 : vector<8x512xf32>
    %9 = arith.truncf %8 : vector<8x512xf32> to vector<8x512xbf16>
    %c0_6 = arith.constant 0 : index
    %c0_7 = arith.constant 0 : index
    %10 = vector.load %arg4[%c0_6, %c0_7] : memref<512x128xbf16, #tpu.memory_space<vmem>>, vector<512x128xbf16>
    %cst_8 = arith.constant dense<0.000000e+00> : vector<8x128xf32>
    %11 = tpu.matmul %9, %10, %cst_8 {dimension_numbers = #tpu.dot_dimension_numbers<[1], [0], [0], [1], [0, 0, 1, 1], [], []>} : vector<8x512xbf16>, vector<512x128xbf16>, vector<8x128xf32> -> vector<8x128xf32>
    %c0_9 = arith.constant 0 : index
    %c0_10 = arith.constant 0 : index
    %12 = vector.load %arg5[%c0_9, %c0_10] : memref<1x128xf32, #tpu.memory_space<vmem>>, vector<1x128xf32>
    %13 = vector.broadcast %12 : vector<1x128xf32> to vector<8x128xf32>
    %14 = arith.addf %11, %13 : vector<8x128xf32>
    %15 = arith.truncf %14 : vector<8x128xf32> to vector<8x128xbf16>
    %c0_11 = arith.constant 0 : index
    %c0_12 = arith.constant 0 : index
    %16 = vector.load %arg6[%c0_11, %c0_12] : memref<128x512xbf16, #tpu.memory_space<vmem>>, vector<128x512xbf16>
    %cst_13 = arith.constant dense<0.000000e+00> : vector<8x512xf32>
    %17 = tpu.matmul %15, %16, %cst_13 {dimension_numbers = #tpu.dot_dimension_numbers<[1], [0], [0], [1], [0, 0, 1, 1], [], []>} : vector<8x128xbf16>, vector<128x512xbf16>, vector<8x512xf32> -> vector<8x512xf32>
    %c0_14 = arith.constant 0 : index
    %c0_15 = arith.constant 0 : index
    %18 = vector.load %arg7[%c0_14, %c0_15] : memref<1x512xf32, #tpu.memory_space<vmem>>, vector<1x512xf32>
    %19 = vector.broadcast %18 : vector<1x512xf32> to vector<8x512xf32>
    %20 = arith.addf %17, %19 : vector<8x512xf32>
    %cst_16 = arith.constant 0.000000e+00 : f32
    %21 = vector.broadcast %cst_16 : f32 to vector<8x512xf32>
    %22 = arith.maximumf %20, %21 : vector<8x512xf32>
    %23 = arith.truncf %22 : vector<8x512xf32> to vector<8x512xbf16>
    %c0_17 = arith.constant 0 : index
    %c0_18 = arith.constant 0 : index
    %24 = vector.load %arg8[%c0_17, %c0_18] : memref<512x784xbf16, #tpu.memory_space<vmem>>, vector<512x784xbf16>
    %cst_19 = arith.constant dense<0.000000e+00> : vector<8x784xf32>
    %25 = tpu.matmul %23, %24, %cst_19 {dimension_numbers = #tpu.dot_dimension_numbers<[1], [0], [0], [1], [0, 0, 1, 1], [], []>} : vector<8x512xbf16>, vector<512x784xbf16>, vector<8x784xf32> -> vector<8x784xf32>
    %c0_20 = arith.constant 0 : index
    %c0_21 = arith.constant 0 : index
    %26 = vector.load %arg9[%c0_20, %c0_21] : memref<1x784xf32, #tpu.memory_space<vmem>>, vector<1x784xf32>
    %27 = vector.broadcast %26 : vector<1x784xf32> to vector<8x784xf32>
    %28 = arith.addf %25, %27 : vector<8x784xf32>
    %cst_22 = arith.constant 0.000000e+00 : f32
    %29 = vector.broadcast %cst_22 : f32 to vector<8x784xf32>
    %30 = arith.subf %29, %28 : vector<8x784xf32>
    %cst_23 = arith.constant 3.000000e+01 : f32
    %31 = vector.broadcast %cst_23 : f32 to vector<8x784xf32>
    %32 = arith.minimumf %30, %31 : vector<8x784xf32>
    %33 = math.exp %32 : vector<8x784xf32>
    %cst_24 = arith.constant 1.000000e+00 : f32
    %34 = vector.broadcast %cst_24 : f32 to vector<8x784xf32>
    %35 = arith.addf %34, %33 : vector<8x784xf32>
    %cst_25 = arith.constant 1.000000e+00 : f32
    %36 = vector.broadcast %cst_25 : f32 to vector<8x784xf32>
    %37 = arith.divf %36, %35 : vector<8x784xf32>
    %c0_26 = arith.constant 0 : index
    %c0_27 = arith.constant 0 : index
    %38 = vector.load %arg10[%c0_26, %c0_27] : memref<8x784xf32, #tpu.memory_space<vmem>>, vector<8x784xf32>
    tpu.vector_store %arg10[%c0_26, %c0_27], %37 {strides = array<i32>} : memref<8x784xf32, #tpu.memory_space<vmem>>, vector<8x784xf32>,
    return
  }
  func.func @transform_0(%arg0: i32) -> (i32, i32) {
    %c0_i32 = arith.constant 0 : i32
    %c0_i32_0 = arith.constant 0 : i32
    return %arg0, %c0_i32 : i32, i32
  }
  func.func @transform_1(%arg0: i32) -> (i32, i32) {
    %c0_i32 = arith.constant 0 : i32
    %c0_i32_0 = arith.constant 0 : i32
    %c0_i32_1 = arith.constant 0 : i32
    return %c0_i32, %c0_i32_0 : i32, i32
  }
  func.func @transform_2(%arg0: i32) -> (i32, i32) {
    %c0_i32 = arith.constant 0 : i32
    %c0_i32_0 = arith.constant 0 : i32
    %c0_i32_1 = arith.constant 0 : i32
    return %c0_i32, %c0_i32_0 : i32, i32
  }
  func.func @transform_3(%arg0: i32) -> (i32, i32) {
    %c0_i32 = arith.constant 0 : i32
    %c0_i32_0 = arith.constant 0 : i32
    %c0_i32_1 = arith.constant 0 : i32
    return %c0_i32, %c0_i32_0 : i32, i32
  }
  func.func @transform_4(%arg0: i32) -> (i32, i32) {
    %c0_i32 = arith.constant 0 : i32
    %c0_i32_0 = arith.constant 0 : i32
    %c0_i32_1 = arith.constant 0 : i32
    return %c0_i32, %c0_i32_0 : i32, i32
  }
  func.func @transform_5(%arg0: i32) -> (i32, i32) {
    %c0_i32 = arith.constant 0 : i32
    %c0_i32_0 = arith.constant 0 : i32
    %c0_i32_1 = arith.constant 0 : i32
    return %c0_i32, %c0_i32_0 : i32, i32
  }
  func.func @transform_6(%arg0: i32) -> (i32, i32) {
    %c0_i32 = arith.constant 0 : i32
    %c0_i32_0 = arith.constant 0 : i32
    %c0_i32_1 = arith.constant 0 : i32
    return %c0_i32, %c0_i32_0 : i32, i32
  }
  func.func @transform_7(%arg0: i32) -> (i32, i32) {
    %c0_i32 = arith.constant 0 : i32
    %c0_i32_0 = arith.constant 0 : i32
    %c0_i32_1 = arith.constant 0 : i32
    return %c0_i32, %c0_i32_0 : i32, i32
  }
  func.func @transform_8(%arg0: i32) -> (i32, i32) {
    %c0_i32 = arith.constant 0 : i32
    %c0_i32_0 = arith.constant 0 : i32
    %c0_i32_1 = arith.constant 0 : i32
    return %c0_i32, %c0_i32_0 : i32, i32
  }
  func.func @transform_9(%arg0: i32) -> (i32, i32) {
    %c0_i32 = arith.constant 0 : i32
    %c0_i32_0 = arith.constant 0 : i32
    return %arg0, %c0_i32 : i32, i32
  }
}

</mosaic_0001>

<bundles_post_ra>
// kernel: autoencoder_forward.1
= control target key start
LH: loop header
LB: loop body
LE: loop exit
PB: predicated region body
PF: predicated region fallthrough
CT: control target
= control target key end

     0   :  { %vm1245_vm0 = vcmask 130048   ;;  %s7043_s1 = inlined_call_operand.vmem [shape: bf16[784,512], index: 1, kind: input, shape index: {}]   ;;  %s7044_s0 = inlined_call_operand.vmem [shape: f32[8,784], index: 0, kind: input, shape index: {}]   ;;  %s7045_s3 = inlined_call_operand.vmem [shape: bf16[512,128], index: 3, kind: input, shape index: {}]   ;;  %s7046_s2 = inlined_call_operand.vmem [shape: f32[1,512], index: 2, kind: input, shape index: {}]   ;;  %s7047_s5 = inlined_call_operand.vmem [shape: bf16[128,512], index: 5, kind: input, shape index: {}]   ;;  %s7048_s7 = inlined_call_operand.vmem [shape: bf16[512,784], index: 7, kind: input, shape index: {}]   ;;  %s7049_s4 = inlined_call_operand.vmem [shape: f32[1,128], index: 4, kind: input, shape index: {}]   ;;  %s7050_s6 = inlined_call_operand.vmem [shape: f32[1,512], index: 6, kind: input, shape index: {}]   ;;  %s7051_s8 = inlined_call_operand.vmem [shape: f32[1,784], index: 8, kind: input, shape index: {}]   ;;  %s7052_s9 = inlined_call_operand.vmem [shape: f32[8,784], index: 9, kind: output, shape index: {}]  }
   0x1   :  { %v4686_v0 = vld [vmem:[%s7043_s1 + $0x4] ss:$16 sps:$4 sm:$0xff]   ;;  %v4688_v1 = vld [vmem:[%s7043_s1 + $0xc] ss:$16 sps:$4 sm:$0xff]   ;;  %v4690_v2 = vld [vmem:[%s7043_s1] ss:$16 sps:$4 sm:$0xff]  }
   0x2   :  { %1249 = vmatprep.subr.bf16.mxu0 %v4686_v0  ;;  %v4691_v3 = vld [vmem:[%s7043_s1 + $0x8] ss:$16 sps:$4 sm:$0xff]   ;;  %1413 = vmatprep.subr.bf16.mxu1 %v4688_v1  ;;  %v4692_v4 = vld [vmem:[%s7043_s1 + $0x24] ss:$16 sps:$4 sm:$0xff]   ;;  %v4694_v5 = vld [vmem:[%s7043_s1 + $0x2c] ss:$16 sps:$4 sm:$0xff]  }
   0x3   :  { %1250 = vmatpush1.bf16.msra.mxu0 %v4690_v2  ;;  %1414 = vmatpush1.bf16.msra.mxu1 %v4691_v3  ;;  %v4696_v6 = vld [vmem:[%s7043_s1 + $0x20] ss:$16 sps:$4 sm:$0xff]   ;;  %v4697_v7 = vld [vmem:[%s7043_s1 + $0x28] ss:$16 sps:$4 sm:$0xff]   ;;  %v4698_v8 = vld [vmem:[%s7043_s1 + $0x44] ss:$16 sps:$4 sm:$0xff]  }
   0x4   :  { %1251 = vmatprep.subr.bf16.mxu0 %v4692_v4  ;;  %1415 = vmatprep.subr.bf16.mxu1 %v4694_v5  ;;  %v4700_v9 = vld [vmem:[%s7043_s1 + $0x4c] ss:$16 sps:$4 sm:$0xff]   ;;  %v4702_v10 = vld [vmem:[%s7043_s1 + $0x40] ss:$16 sps:$4 sm:$0xff]   ;;  %v4703_v11 = vld [vmem:[%s7043_s1 + $0x48] ss:$16 sps:$4 sm:$0xff]  }
   0x5   :  { %v4704_v12 = vld [vmem:[%s7043_s1 + $0x64] ss:$16 sps:$4 sm:$0xff]   ;;  %v4706_v13 = vld [vmem:[%s7043_s1 + $0x6c] ss:$16 sps:$4 sm:$0xff]   ;;  %v4708_v14 = vld [vmem:[%s7043_s1 + $0x60] ss:$16 sps:$4 sm:$0xff]  }
   0x6   :  { %v4709_v15 = vld [vmem:[%s7043_s1 + $0x68] ss:$16 sps:$4 sm:$0xff]   ;;  %v4710_v16 = vld [vmem:[%s7043_s1 + $0x84] ss:$16 sps:$4 sm:$0xff]   ;;  %v4712_v17 = vld [vmem:[%s7043_s1 + $0x8c] ss:$16 sps:$4 sm:$0xff]  }
   0x7   :  { %1252 = vmatpush1.bf16.msra.mxu0 %v4696_v6  ;;  %1416 = vmatpush1.bf16.msra.mxu1 %v4697_v7  ;;  %v4714_v18 = vld [vmem:[%s7043_s1 + $0x80] ss:$16 sps:$4 sm:$0xff]   ;;  %v4715_v19 = vld [vmem:[%s7043_s1 + $0x88] ss:$16 sps:$4 sm:$0xff]   ;;  %v4716_v20 = vld [vmem:[%s7043_s1 + $0xa4] ss:$16 sps:$4 sm:$0xff]  }
   0x8   :  { %1253 = vmatprep.subr.bf16.mxu0 %v4698_v8  ;;  %1417 = vmatprep.subr.bf16.mxu1 %v4700_v9  ;;  %v4718_v21 = vld [vmem:[%s7043_s1 + $0xac] ss:$16 sps:$4 sm:$0xff]   ;;  %v4720_v22 = vld [vmem:[%s7043_s1 + $0xa0] ss:$16 sps:$4 sm:$0xff]   ;;  %v4721_v23 = vld [vmem:[%s7043_s1 + $0xa8] ss:$16 sps:$4 sm:$0xff]  }
   0x9   :  { %v4722_v24 = vld [vmem:[%s7043_s1 + $0xc4] ss:$16 sps:$4 sm:$0xff]   ;;  %v4724_v25 = vld [vmem:[%s7043_s1 + $0xcc] ss:$16 sps:$4 sm:$0xff]   ;;  %v4726_v26 = vld [vmem:[%s7043_s1 + $0xc0] ss:$16 sps:$4 sm:$0xff]  }
   0xa   :  { %v4727_v27 = vld [vmem:[%s7043_s1 + $0xc8] ss:$16 sps:$4 sm:$0xff]   ;;  %v4728_v28 = vld [vmem:[%s7043_s1 + $0xe4] ss:$16 sps:$4 sm:$0xff]   ;;  %v4730_v29 = vld [vmem:[%s7043_s1 + $0xec] ss:$16 sps:$4 sm:$0xff]  }
   0xb   :  { %1254 = vmatpush1.bf16.msra.mxu0 %v4702_v10  ;;  %1418 = vmatpush1.bf16.msra.mxu1 %v4703_v11  ;;  %v4732_v30 = vld [vmem:[%s7043_s1 + $0xe0] ss:$16 sps:$4 sm:$0xff]   ;;  %v4733_v31 = vld [vmem:[%s7043_s1 + $0xe8] ss:$16 sps:$4 sm:$0xff]   ;;  %v4734_v32 = vld [vmem:[%s7043_s1 + $0x104] ss:$16 sps:$4 sm:$0xff]  }
   0xc   :  { %1255 = vmatprep.subr.bf16.mxu0 %v4704_v12  ;;  %1419 = vmatprep.subr.bf16.mxu1 %v4706_v13  ;;  %v4736_v33 = vld [vmem:[%s7043_s1 + $0x10c] ss:$16 sps:$4 sm:$0xff]   ;;  %v4738_v34 = vld [vmem:[%s7043_s1 + $0x100] ss:$16 sps:$4 sm:$0xff]   ;;  %v4739_v35 = vld [vmem:[%s7043_s1 + $0x108] ss:$16 sps:$4 sm:$0xff]  }
   0xd   :  { %v4740_v36 = vld [vmem:[%s7043_s1 + $0x124] ss:$16 sps:$4 sm:$0xff]   ;;  %v4742_v37 = vld [vmem:[%s7043_s1 + $0x12c] ss:$16 sps:$4 sm:$0xff]   ;;  %v4744_v38 = vld [vmem:[%s7043_s1 + $0x120] ss:$16 sps:$4 sm:$0xff]  }
   0xe   :  { %v4745_v39 = vld [vmem:[%s7043_s1 + $0x128] ss:$16 sps:$4 sm:$0xff]   ;;  %v4746_v40 = vld [vmem:[%s7043_s1 + $0x144] ss:$16 sps:$4 sm:$0xff]   ;;  %v4748_v41 = vld [vmem:[%s7043_s1 + $0x14c] ss:$16 sps:$4 sm:$0xff]  }
   0xf   :  { %1256 = vmatpush1.bf16.msra.mxu0 %v4708_v14  ;;  %1420 = vmatpush1.bf16.msra.mxu1 %v4709_v15  ;;  %v4750_v42 = vld [vmem:[%s7043_s1 + $0x140] ss:$16 sps:$4 sm:$0xff]   ;;  %v4751_v43 = vld [vmem:[%s7043_s1 + $0x148] ss:$16 sps:$4 sm:$0xff]   ;;  %v4752_v44 = vld [vmem:[%s7043_s1 + $0x164] ss:$16 sps:$4 sm:$0xff]  }
  0x10   :  { %1257 = vmatprep.subr.bf16.mxu0 %v4710_v16  ;;  %1421 = vmatprep.subr.bf16.mxu1 %v4712_v17  ;;  %v4754_v45 = vld [vmem:[%s7043_s1 + $0x16c] ss:$16 sps:$4 sm:$0xff]   ;;  %v4756_v47 = vld [vmem:[%s7043_s1 + $0x160] ss:$16 sps:$4 sm:$0xff]   ;;  %v4757_v49 = vld [vmem:[%s7043_s1 + $0x168] ss:$16 sps:$4 sm:$0xff]  }
  0x11   :  { %v34_v46 = vld [vmem:[%s7044_s0 + $0x8] sm:$0xff]  ;;  %v4758_v50 = vld [vmem:[%s7043_s1 + $0x184] ss:$16 sps:$4 sm:$0xff]   ;;  %v4762_v52 = vld [vmem:[%s7043_s1 + $0x180] ss:$16 sps:$4 sm:$0xff]  }
  0x12   :  { %v41_v48 = vpack.c.bf16 %v34_v46, %v34_v46  ;;  %v4760_v51 = vld [vmem:[%s7043_s1 + $0x18c] ss:$16 sps:$4 sm:$0xff]   ;;  %v4763_v53 = vld [vmem:[%s7043_s1 + $0x188] ss:$16 sps:$4 sm:$0xff]   ;;  %v4764_v54 = vld [vmem:[%s7043_s1 + $0x1a4] ss:$16 sps:$4 sm:$0xff]  }
  0x13   :  { %1258 = vmatpush1.bf16.msra.mxu0 %v4714_v18  ;;  %1422 = vmatpush1.bf16.msra.mxu1 %v4715_v19  ;;  %v4766_v55 = vld [vmem:[%s7043_s1 + $0x1ac] ss:$16 sps:$4 sm:$0xff]   ;;  %v4768_v56 = vld [vmem:[%s7043_s1 + $0x1a0] ss:$16 sps:$4 sm:$0xff]   ;;  %v4769_v57 = vld [vmem:[%s7043_s1 + $0x1a8] ss:$16 sps:$4 sm:$0xff]  }
  0x14   :  { %1259 = vmatprep.subr.bf16.mxu0 %v4716_v20  ;;  %1423 = vmatprep.subr.bf16.mxu1 %v4718_v21  ;;  %v4770_v58 = vld [vmem:[%s7043_s1 + $0x1c4] ss:$16 sps:$4 sm:$0xff]   ;;  %v4772_v59 = vld [vmem:[%s7043_s1 + $0x1cc] ss:$16 sps:$4 sm:$0xff]   ;;  %v4774_v60 = vld [vmem:[%s7043_s1 + $0x1c0] ss:$16 sps:$4 sm:$0xff]  }
  0x15   :  { %1281 = vmatprep.mubr.bf16.mxu0 %v41_v48  ;;  %1445 = vmatprep.mubr.bf16.mxu1 %v41_v48  ;;  %v4775_v61 = vld [vmem:[%s7043_s1 + $0x1c8] ss:$16 sps:$4 sm:$0xff]   ;;  %v4776_v62 = vld [vmem:[%s7043_s1 + $0x1e4] ss:$16 sps:$4 sm:$0xff]   ;;  %v4778_v63 = vld [vmem:[%s7043_s1 + $0x1ec] ss:$16 sps:$4 sm:$0xff]  }
  0x16   :  { %v4780_v0 = vld [vmem:[%s7043_s1 + $0x1e0] ss:$16 sps:$4 sm:$0xff]   ;;  %v4781_v1 = vld [vmem:[%s7043_s1 + $0x1e8] ss:$16 sps:$4 sm:$0xff]   ;;  %v4784_v3 = vld [vmem:[%s7043_s1 + $0x204] ss:$16 sps:$4 sm:$0xff]  }
  0x17   :  { %1260 = vmatpush1.bf16.msra.mxu0 %v4720_v22  ;;  %1424 = vmatpush1.bf16.msra.mxu1 %v4721_v23  ;;  %v33_v2 = vld [vmem:[%s7044_s0] sm:$0xff]  ;;  %v4787_v4 = vld [vmem:[%s7043_s1 + $0x20c] ss:$16 sps:$4 sm:$0xff]   ;;  %v4785_v7 = vld [vmem:[%s7043_s1 + $0x208] ss:$16 sps:$4 sm:$0xff]  }
  0x18   :  { %1261 = vmatprep.subr.bf16.mxu0 %v4722_v24  ;;  %1425 = vmatprep.subr.bf16.mxu1 %v4724_v25  ;;  %v40_v5 = vpack.c.bf16 %v33_v2, %v33_v2  ;;  %v4782_v6 = vld [vmem:[%s7043_s1 + $0x200] ss:$16 sps:$4 sm:$0xff]   ;;  %v4790_v8 = vld [vmem:[%s7043_s1 + $0x224] ss:$16 sps:$4 sm:$0xff]   ;;  %v4793_v9 = vld [vmem:[%s7043_s1 + $0x22c] ss:$16 sps:$4 sm:$0xff]  }
  0x19   :  { %v4788_v10 = vld [vmem:[%s7043_s1 + $0x220] ss:$16 sps:$4 sm:$0xff]   ;;  %v4791_v11 = vld [vmem:[%s7043_s1 + $0x228] ss:$16 sps:$4 sm:$0xff]   ;;  %v4796_v12 = vld [vmem:[%s7043_s1 + $0x244] ss:$16 sps:$4 sm:$0xff]  }
  0x1a   :  { %v4799_v13 = vld [vmem:[%s7043_s1 + $0x24c] ss:$16 sps:$4 sm:$0xff]   ;;  %v4794_v14 = vld [vmem:[%s7043_s1 + $0x240] ss:$16 sps:$4 sm:$0xff]   ;;  %v4797_v15 = vld [vmem:[%s7043_s1 + $0x248] ss:$16 sps:$4 sm:$0xff]  }
  0x1b   :  { %1262 = vmatpush1.bf16.msra.mxu0 %v4726_v26  ;;  %1426 = vmatpush1.bf16.msra.mxu1 %v4727_v27  ;;  %v4802_v16 = vld [vmem:[%s7043_s1 + $0x264] ss:$16 sps:$4 sm:$0xff]   ;;  %v4805_v17 = vld [vmem:[%s7043_s1 + $0x26c] ss:$16 sps:$4 sm:$0xff]   ;;  %v4800_v18 = vld [vmem:[%s7043_s1 + $0x260] ss:$16 sps:$4 sm:$0xff]  }
  0x1c   :  { %1263 = vmatprep.subr.bf16.mxu0 %v4728_v28  ;;  %1427 = vmatprep.subr.bf16.mxu1 %v4730_v29  ;;  %v4803_v19 = vld [vmem:[%s7043_s1 + $0x268] ss:$16 sps:$4 sm:$0xff]   ;;  %v4808_v20 = vld [vmem:[%s7043_s1 + $0x284] ss:$16 sps:$4 sm:$0xff]   ;;  %v4811_v21 = vld [vmem:[%s7043_s1 + $0x28c] ss:$16 sps:$4 sm:$0xff]  }
  0x1d   :  { %v4806_v22 = vld [vmem:[%s7043_s1 + $0x280] ss:$16 sps:$4 sm:$0xff]   ;;  %v4809_v23 = vld [vmem:[%s7043_s1 + $0x288] ss:$16 sps:$4 sm:$0xff]   ;;  %v4814_v24 = vld [vmem:[%s7043_s1 + $0x2a4] ss:$16 sps:$4 sm:$0xff]  }
  0x1e   :  { %v4817_v25 = vld [vmem:[%s7043_s1 + $0x2ac] ss:$16 sps:$4 sm:$0xff]   ;;  %v4812_v26 = vld [vmem:[%s7043_s1 + $0x2a0] ss:$16 sps:$4 sm:$0xff]   ;;  %v4815_v27 = vld [vmem:[%s7043_s1 + $0x2a8] ss:$16 sps:$4 sm:$0xff]  }
  0x1f   :  { %1264 = vmatpush1.bf16.msra.mxu0 %v4732_v30  ;;  %1428 = vmatpush1.bf16.msra.mxu1 %v4733_v31  ;;  %v4820_v28 = vld [vmem:[%s7043_s1 + $0x2c4] ss:$16 sps:$4 sm:$0xff]   ;;  %v4823_v29 = vld [vmem:[%s7043_s1 + $0x2cc] ss:$16 sps:$4 sm:$0xff]   ;;  %v4818_v31 = vld [vmem:[%s7043_s1 + $0x2c0] ss:$16 sps:$4 sm:$0xff]  }
  0x20   :  { %1265 = vmatprep.subr.bf16.mxu0 %v4734_v32  ;;  %1429 = vmatprep.subr.bf16.mxu1 %v4736_v33  ;;  %v36_v30 = vld [vmem:[%s7044_s0 + $0x18] sm:$0xff]  ;;  %v4844_v46 = vld [vmem:[%s7043_s1 + $0x344] ss:$16 sps:$4 sm:$0xff]   ;;  %v4842_v48 = vld [vmem:[%s7043_s1 + $0x340] ss:$16 sps:$4 sm:$0xff]  }
  0x21   :  { %v43_v32 = vpack.c.bf16 %v36_v30, %v36_v30  ;;  %v4821_v33 = vld [vmem:[%s7043_s1 + $0x2c8] ss:$16 sps:$4 sm:$0xff]   ;;  %v4874_v2 = vld [vmem:[%s7043_s1 + $0x3e4] ss:$16 sps:$4 sm:$0xff]  }
  0x22   :  { %v4910_v30 = vld [vmem:[%s7043_s1 + $0x4a4] ss:$16 sps:$4 sm:$0xff]  }
  0x23   :  { %1266 = vmatpush1.bf16.msra.mxu0 %v4738_v34  ;;  %1430 = vmatpush1.bf16.msra.mxu1 %v4739_v35  ;;  %v4826_v34 = vld [vmem:[%s7043_s1 + $0x2e4] ss:$16 sps:$4 sm:$0xff]   ;;  %v4829_v35 = vld [vmem:[%s7043_s1 + $0x2ec] ss:$16 sps:$4 sm:$0xff]  }
  0x24   :  { %1267 = vmatprep.subr.bf16.mxu0 %v4740_v36  ;;  %1431 = vmatprep.subr.bf16.mxu1 %v4742_v37  ;;  %v4824_v36 = vld [vmem:[%s7043_s1 + $0x2e0] ss:$16 sps:$4 sm:$0xff]   ;;  %v4827_v37 = vld [vmem:[%s7043_s1 + $0x2e8] ss:$16 sps:$4 sm:$0xff]  }
  0x27   :  { %1268 = vmatpush1.bf16.msra.mxu0 %v4744_v38  ;;  %1432 = vmatpush1.bf16.msra.mxu1 %v4745_v39  ;;  %v4832_v38 = vld [vmem:[%s7043_s1 + $0x304] ss:$16 sps:$4 sm:$0xff]   ;;  %v4835_v39 = vld [vmem:[%s7043_s1 + $0x30c] ss:$16 sps:$4 sm:$0xff]  }
  0x28   :  { %1269 = vmatprep.subr.bf16.mxu0 %v4746_v40  ;;  %1433 = vmatprep.subr.bf16.mxu1 %v4748_v41  ;;  %v4830_v40 = vld [vmem:[%s7043_s1 + $0x300] ss:$16 sps:$4 sm:$0xff]   ;;  %v4833_v41 = vld [vmem:[%s7043_s1 + $0x308] ss:$16 sps:$4 sm:$0xff]  }
  0x2b   :  { %1270 = vmatpush1.bf16.msra.mxu0 %v4750_v42  ;;  %1434 = vmatpush1.bf16.msra.mxu1 %v4751_v43  ;;  %v4838_v42 = vld [vmem:[%s7043_s1 + $0x324] ss:$16 sps:$4 sm:$0xff]   ;;  %v4841_v43 = vld [vmem:[%s7043_s1 + $0x32c] ss:$16 sps:$4 sm:$0xff]  }
  0x2c   :  { %1271 = vmatprep.subr.bf16.mxu0 %v4752_v44  ;;  %1435 = vmatprep.subr.bf16.mxu1 %v4754_v45  ;;  %v4836_v44 = vld [vmem:[%s7043_s1 + $0x320] ss:$16 sps:$4 sm:$0xff]   ;;  %v4839_v45 = vld [vmem:[%s7043_s1 + $0x328] ss:$16 sps:$4 sm:$0xff]  }
  0x2f   :  { %1272 = vmatpush1.bf16.msra.mxu0 %v4756_v47  ;;  %1436 = vmatpush1.bf16.msra.mxu1 %v4757_v49  ;;  %v4847_v47 = vld [vmem:[%s7043_s1 + $0x34c] ss:$16 sps:$4 sm:$0xff]   ;;  %v4845_v49 = vld [vmem:[%s7043_s1 + $0x348] ss:$16 sps:$4 sm:$0xff]  }
  0x30   :  { %1273 = vmatprep.subr.bf16.mxu0 %v4758_v50  ;;  %1437 = vmatprep.subr.bf16.mxu1 %v4760_v51  ;;  %v4850_v50 = vld [vmem:[%s7043_s1 + $0x364] ss:$16 sps:$4 sm:$0xff]   ;;  %v4853_v51 = vld [vmem:[%s7043_s1 + $0x36c] ss:$16 sps:$4 sm:$0xff]  }
  0x33   :  { %1274 = vmatpush1.bf16.msra.mxu0 %v4762_v52  ;;  %1438 = vmatpush1.bf16.msra.mxu1 %v4763_v53  ;;  %v4848_v52 = vld [vmem:[%s7043_s1 + $0x360] ss:$16 sps:$4 sm:$0xff]   ;;  %v4851_v53 = vld [vmem:[%s7043_s1 + $0x368] ss:$16 sps:$4 sm:$0xff]  }
  0x34   :  { %1275 = vmatprep.subr.bf16.mxu0 %v4764_v54  ;;  %1439 = vmatprep.subr.bf16.mxu1 %v4766_v55  ;;  %v4856_v54 = vld [vmem:[%s7043_s1 + $0x384] ss:$16 sps:$4 sm:$0xff]   ;;  %v4859_v55 = vld [vmem:[%s7043_s1 + $0x38c] ss:$16 sps:$4 sm:$0xff]  }
  0x37   :  { %1276 = vmatpush1.bf16.msra.mxu0 %v4768_v56  ;;  %1440 = vmatpush1.bf16.msra.mxu1 %v4769_v57  ;;  %v4854_v56 = vld [vmem:[%s7043_s1 + $0x380] ss:$16 sps:$4 sm:$0xff]   ;;  %v4857_v57 = vld [vmem:[%s7043_s1 + $0x388] ss:$16 sps:$4 sm:$0xff]  }
  0x38   :  { %1277 = vmatprep.subr.bf16.mxu0 %v4770_v58  ;;  %1441 = vmatprep.subr.bf16.mxu1 %v4772_v59  ;;  %v4862_v58 = vld [vmem:[%s7043_s1 + $0x3a4] ss:$16 sps:$4 sm:$0xff]   ;;  %v4865_v59 = vld [vmem:[%s7043_s1 + $0x3ac] ss:$16 sps:$4 sm:$0xff]  }
  0x3b   :  { %1278 = vmatpush1.bf16.msra.mxu0 %v4774_v60  ;;  %1442 = vmatpush1.bf16.msra.mxu1 %v4775_v61  ;;  %v4860_v60 = vld [vmem:[%s7043_s1 + $0x3a0] ss:$16 sps:$4 sm:$0xff]   ;;  %v4863_v61 = vld [vmem:[%s7043_s1 + $0x3a8] ss:$16 sps:$4 sm:$0xff]  }
  0x3c   :  { %1279 = vmatprep.subr.bf16.mxu0 %v4776_v62  ;;  %1443 = vmatprep.subr.bf16.mxu1 %v4778_v63  ;;  %v4868_v62 = vld [vmem:[%s7043_s1 + $0x3c4] ss:$16 sps:$4 sm:$0xff]   ;;  %v4871_v63 = vld [vmem:[%s7043_s1 + $0x3cc] ss:$16 sps:$4 sm:$0xff]  }
  0x3f   :  { %1280 = vmatpush1.bf16.msra.mxu0 %v4780_v0  ;;  %1444 = vmatpush1.bf16.msra.mxu1 %v4781_v1  ;;  %v4866_v0 = vld [vmem:[%s7043_s1 + $0x3c0] ss:$16 sps:$4 sm:$0xff]   ;;  %v4869_v1 = vld [vmem:[%s7043_s1 + $0x3c8] ss:$16 sps:$4 sm:$0xff]  }
  0x40   :  { %1290 = vmatprep.subr.bf16.mxu0 %v4784_v3  ;;  %1454 = vmatprep.subr.bf16.mxu1 %v4787_v4  ;;  %v4877_v3 = vld [vmem:[%s7043_s1 + $0x3ec] ss:$16 sps:$4 sm:$0xff]   ;;  %v4872_v4 = vld [vmem:[%s7043_s1 + $0x3e0] ss:$16 sps:$4 sm:$0xff]  }
  0x42   :  { %1282 = vmatmul.mubr.bf16.vlgmr.msra.gmra.mrb[0].mxu0 %v40_v5  ;;  %1446 = vmatmul.mubr.bf16.vlgmr.msra.gmra.mrb[0].mxu1 %v40_v5  ;;  %v4875_v5 = vld [vmem:[%s7043_s1 + $0x3e8] ss:$16 sps:$4 sm:$0xff]  }
  0x43   :  { %1291 = vmatpush1.bf16.msra.mxu0 %v4782_v6  ;;  %1455 = vmatpush1.bf16.msra.mxu1 %v4785_v7  ;;  %v4880_v6 = vld [vmem:[%s7043_s1 + $0x404] ss:$16 sps:$4 sm:$0xff]  }
  0x44   :  { %1292 = vmatprep.subr.bf16.mxu0 %v4790_v8  ;;  %1456 = vmatprep.subr.bf16.mxu1 %v4793_v9  ;;  %v35_v7 = vld [vmem:[%s7044_s0 + $0x10] sm:$0xff]  ;;  %v4883_v8 = vld [vmem:[%s7043_s1 + $0x40c] ss:$16 sps:$4 sm:$0xff]  }
  0x45   :  { %1322 = vmatprep.mubr.bf16.mxu0 %v43_v32  ;;  %1486 = vmatprep.mubr.bf16.mxu1 %v43_v32  ;;  %v4878_v9 = vld [vmem:[%s7043_s1 + $0x400] ss:$16 sps:$4 sm:$0xff]  }
  0x46   :  { %v4908_v32 = vld [vmem:[%s7043_s1 + $0x4a0] ss:$16 sps:$4 sm:$0xff]  }
  0x47   :  { %1293 = vmatpush1.bf16.msra.mxu0 %v4788_v10  ;;  %1457 = vmatpush1.bf16.msra.mxu1 %v4791_v11  ;;  %v42_v10 = vpack.c.bf16 %v35_v7, %v35_v7  ;;  %v4881_v11 = vld [vmem:[%s7043_s1 + $0x408] ss:$16 sps:$4 sm:$0xff]   ;;  %v4973_v7 = vld [vmem:[%s7043_s1 + $0x5ec] ss:$16 sps:$4 sm:$0xff]  }
  0x48   :  { %1294 = vmatprep.subr.bf16.mxu0 %v4796_v12  ;;  %1458 = vmatprep.subr.bf16.mxu1 %v4799_v13  ;;  %v4886_v12 = vld [vmem:[%s7043_s1 + $0x424] ss:$16 sps:$4 sm:$0xff]   ;;  %v4889_v13 = vld [vmem:[%s7043_s1 + $0x42c] ss:$16 sps:$4 sm:$0xff]  }
  0x4b   :  { %1295 = vmatpush1.bf16.msra.mxu0 %v4794_v14  ;;  %1459 = vmatpush1.bf16.msra.mxu1 %v4797_v15  ;;  %v38_v14 = vld [vmem:[%s7044_s0 + $0x28] sm:$0xff] }
  0x4c   :  { %1296 = vmatprep.subr.bf16.mxu0 %v4802_v16  ;;  %1460 = vmatprep.subr.bf16.mxu1 %v4805_v17  ;;  %v45_v15 = vpack.c.bf16 %v38_v14, %v38_v14  ;;  %v4884_v16 = vld [vmem:[%s7043_s1 + $0x420] ss:$16 sps:$4 sm:$0xff]   ;;  %v4887_v17 = vld [vmem:[%s7043_s1 + $0x428] ss:$16 sps:$4 sm:$0xff]  }
  0x4d   :  { %v4974_v14 = vld [vmem:[%s7043_s1 + $0x600] ss:$16 sps:$4 sm:$0xff]  }
  0x4f   :  { %1297 = vmatpush1.bf16.msra.mxu0 %v4800_v18  ;;  %1461 = vmatpush1.bf16.msra.mxu1 %v4803_v19  ;;  %v4892_v18 = vld [vmem:[%s7043_s1 + $0x444] ss:$16 sps:$4 sm:$0xff]   ;;  %v4895_v19 = vld [vmem:[%s7043_s1 + $0x44c] ss:$16 sps:$4 sm:$0xff]  }
  0x50   :  { %1298 = vmatprep.subr.bf16.mxu0 %v4808_v20  ;;  %1462 = vmatprep.subr.bf16.mxu1 %v4811_v21  ;;  %v4890_v20 = vld [vmem:[%s7043_s1 + $0x440] ss:$16 sps:$4 sm:$0xff]   ;;  %v4893_v21 = vld [vmem:[%s7043_s1 + $0x448] ss:$16 sps:$4 sm:$0xff]  }
  0x53   :  { %1299 = vmatpush1.bf16.msra.mxu0 %v4806_v22  ;;  %1463 = vmatpush1.bf16.msra.mxu1 %v4809_v23  ;;  %v4898_v22 = vld [vmem:[%s7043_s1 + $0x464] ss:$16 sps:$4 sm:$0xff]   ;;  %v4901_v23 = vld [vmem:[%s7043_s1 + $0x46c] ss:$16 sps:$4 sm:$0xff]  }
  0x54   :  { %1300 = vmatprep.subr.bf16.mxu0 %v4814_v24  ;;  %1464 = vmatprep.subr.bf16.mxu1 %v4817_v25  ;;  %v4896_v24 = vld [vmem:[%s7043_s1 + $0x460] ss:$16 sps:$4 sm:$0xff]   ;;  %v4899_v25 = vld [vmem:[%s7043_s1 + $0x468] ss:$16 sps:$4 sm:$0xff]  }
  0x57   :  { %1301 = vmatpush1.bf16.msra.mxu0 %v4812_v26  ;;  %1465 = vmatpush1.bf16.msra.mxu1 %v4815_v27  ;;  %v4904_v26 = vld [vmem:[%s7043_s1 + $0x484] ss:$16 sps:$4 sm:$0xff]   ;;  %v4907_v27 = vld [vmem:[%s7043_s1 + $0x48c] ss:$16 sps:$4 sm:$0xff]  }
  0x58   :  { %1302 = vmatprep.subr.bf16.mxu0 %v4820_v28  ;;  %1466 = vmatprep.subr.bf16.mxu1 %v4823_v29  ;;  %v4902_v28 = vld [vmem:[%s7043_s1 + $0x480] ss:$16 sps:$4 sm:$0xff]   ;;  %v4905_v29 = vld [vmem:[%s7043_s1 + $0x488] ss:$16 sps:$4 sm:$0xff]  }
  0x5b   :  { %1303 = vmatpush1.bf16.msra.mxu0 %v4818_v31  ;;  %1467 = vmatpush1.bf16.msra.mxu1 %v4821_v33  ;;  %v4913_v31 = vld [vmem:[%s7043_s1 + $0x4ac] ss:$16 sps:$4 sm:$0xff]   ;;  %v4911_v33 = vld [vmem:[%s7043_s1 + $0x4a8] ss:$16 sps:$4 sm:$0xff]  }
  0x5c   :  { %1304 = vmatprep.subr.bf16.mxu0 %v4826_v34  ;;  %1468 = vmatprep.subr.bf16.mxu1 %v4829_v35  ;;  %v4916_v34 = vld [vmem:[%s7043_s1 + $0x4c4] ss:$16 sps:$4 sm:$0xff]   ;;  %v4919_v35 = vld [vmem:[%s7043_s1 + $0x4cc] ss:$16 sps:$4 sm:$0xff]  }
  0x5f   :  { %1305 = vmatpush1.bf16.msra.mxu0 %v4824_v36  ;;  %1469 = vmatpush1.bf16.msra.mxu1 %v4827_v37  ;;  %v4914_v36 = vld [vmem:[%s7043_s1 + $0x4c0] ss:$16 sps:$4 sm:$0xff]   ;;  %v4917_v37 = vld [vmem:[%s7043_s1 + $0x4c8] ss:$16 sps:$4 sm:$0xff]  }
  0x60   :  { %1306 = vmatprep.subr.bf16.mxu0 %v4832_v38  ;;  %1470 = vmatprep.subr.bf16.mxu1 %v4835_v39  ;;  %v4922_v38 = vld [vmem:[%s7043_s1 + $0x4e4] ss:$16 sps:$4 sm:$0xff]   ;;  %v4925_v39 = vld [vmem:[%s7043_s1 + $0x4ec] ss:$16 sps:$4 sm:$0xff]  }
  0x63   :  { %1307 = vmatpush1.bf16.msra.mxu0 %v4830_v40  ;;  %1471 = vmatpush1.bf16.msra.mxu1 %v4833_v41  ;;  %v4920_v40 = vld [vmem:[%s7043_s1 + $0x4e0] ss:$16 sps:$4 sm:$0xff]   ;;  %v4923_v41 = vld [vmem:[%s7043_s1 + $0x4e8] ss:$16 sps:$4 sm:$0xff]  }
  0x64   :  { %1308 = vmatprep.subr.bf16.mxu0 %v4838_v42  ;;  %1472 = vmatprep.subr.bf16.mxu1 %v4841_v43  ;;  %v4928_v42 = vld [vmem:[%s7043_s1 + $0x504] ss:$16 sps:$4 sm:$0xff]   ;;  %v4931_v43 = vld [vmem:[%s7043_s1 + $0x50c] ss:$16 sps:$4 sm:$0xff]  }
  0x67   :  { %1309 = vmatpush1.bf16.msra.mxu0 %v4836_v44  ;;  %1473 = vmatpush1.bf16.msra.mxu1 %v4839_v45  ;;  %v4926_v44 = vld [vmem:[%s7043_s1 + $0x500] ss:$16 sps:$4 sm:$0xff]   ;;  %v4929_v45 = vld [vmem:[%s7043_s1 + $0x508] ss:$16 sps:$4 sm:$0xff]  }
  0x68   :  { %1310 = vmatprep.subr.bf16.mxu0 %v4844_v46  ;;  %1474 = vmatprep.subr.bf16.mxu1 %v4847_v47  ;;  %v4934_v46 = vld [vmem:[%s7043_s1 + $0x524] ss:$16 sps:$4 sm:$0xff]   ;;  %v4937_v47 = vld [vmem:[%s7043_s1 + $0x52c] ss:$16 sps:$4 sm:$0xff]  }
  0x6b   :  { %1311 = vmatpush1.bf16.msra.mxu0 %v4842_v48  ;;  %1475 = vmatpush1.bf16.msra.mxu1 %v4845_v49  ;;  %v4932_v48 = vld [vmem:[%s7043_s1 + $0x520] ss:$16 sps:$4 sm:$0xff]   ;;  %v4935_v49 = vld [vmem:[%s7043_s1 + $0x528] ss:$16 sps:$4 sm:$0xff]  }
  0x6c   :  { %1312 = vmatprep.subr.bf16.mxu0 %v4850_v50  ;;  %1476 = vmatprep.subr.bf16.mxu1 %v4853_v51  ;;  %v4940_v50 = vld [vmem:[%s7043_s1 + $0x544] ss:$16 sps:$4 sm:$0xff]   ;;  %v4943_v51 = vld [vmem:[%s7043_s1 + $0x54c] ss:$16 sps:$4 sm:$0xff]  }
  0x6f   :  { %1313 = vmatpush1.bf16.msra.mxu0 %v4848_v52  ;;  %1477 = vmatpush1.bf16.msra.mxu1 %v4851_v53  ;;  %v4938_v52 = vld [vmem:[%s7043_s1 + $0x540] ss:$16 sps:$4 sm:$0xff]   ;;  %v4941_v53 = vld [vmem:[%s7043_s1 + $0x548] ss:$16 sps:$4 sm:$0xff]  }
  0x70   :  { %1314 = vmatprep.subr.bf16.mxu0 %v4856_v54  ;;  %1478 = vmatprep.subr.bf16.mxu1 %v4859_v55  ;;  %v4946_v54 = vld [vmem:[%s7043_s1 + $0x564] ss:$16 sps:$4 sm:$0xff]   ;;  %v4949_v55 = vld [vmem:[%s7043_s1 + $0x56c] ss:$16 sps:$4 sm:$0xff]  }
  0x73   :  { %1315 = vmatpush1.bf16.msra.mxu0 %v4854_v56  ;;  %1479 = vmatpush1.bf16.msra.mxu1 %v4857_v57  ;;  %v4944_v56 = vld [vmem:[%s7043_s1 + $0x560] ss:$16 sps:$4 sm:$0xff]   ;;  %v4947_v57 = vld [vmem:[%s7043_s1 + $0x568] ss:$16 sps:$4 sm:$0xff]  }
  0x74   :  { %1316 = vmatprep.subr.bf16.mxu0 %v4862_v58  ;;  %1480 = vmatprep.subr.bf16.mxu1 %v4865_v59  ;;  %v4952_v58 = vld [vmem:[%s7043_s1 + $0x584] ss:$16 sps:$4 sm:$0xff]   ;;  %v4955_v59 = vld [vmem:[%s7043_s1 + $0x58c] ss:$16 sps:$4 sm:$0xff]  }
  0x77   :  { %1317 = vmatpush1.bf16.msra.mxu0 %v4860_v60  ;;  %1481 = vmatpush1.bf16.msra.mxu1 %v4863_v61  ;;  %v4950_v60 = vld [vmem:[%s7043_s1 + $0x580] ss:$16 sps:$4 sm:$0xff]   ;;  %v4953_v61 = vld [vmem:[%s7043_s1 + $0x588] ss:$16 sps:$4 sm:$0xff]  }
  0x78   :  { %1318 = vmatprep.subr.bf16.mxu0 %v4868_v62  ;;  %1482 = vmatprep.subr.bf16.mxu1 %v4871_v63  ;;  %v4958_v62 = vld [vmem:[%s7043_s1 + $0x5a4] ss:$16 sps:$4 sm:$0xff]   ;;  %v4961_v63 = vld [vmem:[%s7043_s1 + $0x5ac] ss:$16 sps:$4 sm:$0xff]  }
  0x7b   :  { %1319 = vmatpush1.bf16.msra.mxu0 %v4866_v0  ;;  %1483 = vmatpush1.bf16.msra.mxu1 %v4869_v1  ;;  %v4956_v0 = vld [vmem:[%s7043_s1 + $0x5a0] ss:$16 sps:$4 sm:$0xff]   ;;  %v4959_v1 = vld [vmem:[%s7043_s1 + $0x5a8] ss:$16 sps:$4 sm:$0xff]  }
  0x7c   :  { %1320 = vmatprep.subr.bf16.mxu0 %v4874_v2  ;;  %1484 = vmatprep.subr.bf16.mxu1 %v4877_v3  ;;  %v4964_v2 = vld [vmem:[%s7043_s1 + $0x5c4] ss:$16 sps:$4 sm:$0xff]   ;;  %v4967_v3 = vld [vmem:[%s7043_s1 + $0x5cc] ss:$16 sps:$4 sm:$0xff]  }
  0x7f   :  { %1321 = vmatpush1.bf16.msra.mxu0 %v4872_v4  ;;  %1485 = vmatpush1.bf16.msra.mxu1 %v4875_v5  ;;  %v4962_v4 = vld [vmem:[%s7043_s1 + $0x5c0] ss:$16 sps:$4 sm:$0xff]   ;;  %v4965_v5 = vld [vmem:[%s7043_s1 + $0x5c8] ss:$16 sps:$4 sm:$0xff]  }
  0x80   :  { %1331 = vmatprep.subr.bf16.mxu0 %v4880_v6  ;;  %1495 = vmatprep.subr.bf16.mxu1 %v4883_v8  ;;  %v4970_v6 = vld [vmem:[%s7043_s1 + $0x5e4] ss:$16 sps:$4 sm:$0xff]   ;;  %v4968_v8 = vld [vmem:[%s7043_s1 + $0x5e0] ss:$16 sps:$4 sm:$0xff]  }
  0x82   :  { %1323 = vmatmul.mubr.bf16.vlgmr.msra.gmra.mrb[0].mxu0 %v42_v10  ;;  %1487 = vmatmul.mubr.bf16.vlgmr.msra.gmra.mrb[0].mxu1 %v42_v10  ;;  %v37_v10 = vld [vmem:[%s7044_s0 + $0x20] sm:$0xff] }
  0x83   :  { %1332 = vmatpush1.bf16.msra.mxu0 %v4878_v9  ;;  %1496 = vmatpush1.bf16.msra.mxu1 %v4881_v11  ;;  %v4971_v9 = vld [vmem:[%s7043_s1 + $0x5e8] ss:$16 sps:$4 sm:$0xff]   ;;  %v4976_v11 = vld [vmem:[%s7043_s1 + $0x604] ss:$16 sps:$4 sm:$0xff]  }
  0x84   :  { %1333 = vmatprep.subr.bf16.mxu0 %v4886_v12  ;;  %1497 = vmatprep.subr.bf16.mxu1 %v4889_v13  ;;  %v4979_v12 = vld [vmem:[%s7043_s1 + $0x60c] ss:$16 sps:$4 sm:$0xff]   ;;  %v44_v13 = vpack.c.bf16 %v37_v10, %v37_v10 }
  0x85   :  { %1363 = vmatprep.mubr.bf16.mxu0 %v45_v15  ;;  %1527 = vmatprep.mubr.bf16.mxu1 %v45_v15  ;;  %v4977_v15 = vld [vmem:[%s7043_s1 + $0x608] ss:$16 sps:$4 sm:$0xff]  }
  0x87   :  { %1334 = vmatpush1.bf16.msra.mxu0 %v4884_v16  ;;  %1498 = vmatpush1.bf16.msra.mxu1 %v4887_v17  ;;  %v4980_v16 = vld [vmem:[%s7045_s3 + $0x40] sm:$0xff]   ;;  %v5408_v17 = vmov 0  }
  0x88   :  { %1335 = vmatprep.subr.bf16.mxu0 %v4892_v18  ;;  %1499 = vmatprep.subr.bf16.mxu1 %v4895_v19  ;;  %v39_v18 = vld [vmem:[%s7044_s0 + $0x30] sm:$0xff] }
  0x89   :  { %v46_v19 = vpack.c.bf16 %v39_v18, %v39_v18 }
  0x8b   :  { %1336 = vmatpush1.bf16.msra.mxu0 %v4890_v20  ;;  %1500 = vmatpush1.bf16.msra.mxu1 %v4893_v21  ;;  %v4981_v20 = vld [vmem:[%s7045_s3] sm:$0xff]   ;;  %v4982_v21 = vld [vmem:[%s7045_s3 + $0x48] sm:$0xff]  }
  0x8c   :  { %1337 = vmatprep.subr.bf16.mxu0 %v4898_v22  ;;  %1501 = vmatprep.subr.bf16.mxu1 %v4901_v23  ;;  %v4983_v22 = vld [vmem:[%s7045_s3 + $0x8] sm:$0xff]   ;;  %v4984_v23 = vld [vmem:[%s7045_s3 + $0x50] sm:$0xff]  }
  0x8f   :  { %1338 = vmatpush1.bf16.msra.mxu0 %v4896_v24  ;;  %1502 = vmatpush1.bf16.msra.mxu1 %v4899_v25  ;;  %v4985_v24 = vld [vmem:[%s7045_s3 + $0x10] sm:$0xff]   ;;  %v4986_v25 = vld [vmem:[%s7045_s3 + $0x58] sm:$0xff]  }
  0x90   :  { %1339 = vmatprep.subr.bf16.mxu0 %v4904_v26  ;;  %1503 = vmatprep.subr.bf16.mxu1 %v4907_v27  ;;  %v4987_v26 = vld [vmem:[%s7045_s3 + $0x18] sm:$0xff]   ;;  %v4988_v27 = vld [vmem:[%s7045_s3 + $0x60] sm:$0xff]  }
  0x93   :  { %1340 = vmatpush1.bf16.msra.mxu0 %v4902_v28  ;;  %1504 = vmatpush1.bf16.msra.mxu1 %v4905_v29  ;;  %v4989_v28 = vld [vmem:[%s7045_s3 + $0x20] sm:$0xff]   ;;  %v4990_v29 = vld [vmem:[%s7045_s3 + $0x68] sm:$0xff]  }
  0x94   :  { %1341 = vmatprep.subr.bf16.mxu0 %v4910_v30  ;;  %1505 = vmatprep.subr.bf16.mxu1 %v4913_v31  ;;  %v4991_v30 = vld [vmem:[%s7045_s3 + $0x28] sm:$0xff]   ;;  %v4992_v31 = vld [vmem:[%s7045_s3 + $0x70] sm:$0xff]  }
  0x97   :  { %1342 = vmatpush1.bf16.msra.mxu0 %v4908_v32  ;;  %1506 = vmatpush1.bf16.msra.mxu1 %v4911_v33  ;;  %v4993_v32 = vld [vmem:[%s7045_s3 + $0x30] sm:$0xff]   ;;  %v4994_v33 = vld [vmem:[%s7045_s3 + $0x78] sm:$0xff]  }
  0x98   :  { %1343 = vmatprep.subr.bf16.mxu0 %v4916_v34  ;;  %1507 = vmatprep.subr.bf16.mxu1 %v4919_v35  ;;  %v4995_v34 = vld [vmem:[%s7045_s3 + $0x38] sm:$0xff]   ;;  %v4996_v35 = vld [vmem:[%s7045_s3 + $0xc0] sm:$0xff]  }
  0x9b   :  { %1344 = vmatpush1.bf16.msra.mxu0 %v4914_v36  ;;  %1508 = vmatpush1.bf16.msra.mxu1 %v4917_v37  ;;  %v245_v36 = vlaneseq }
  0x9c   :  { %1345 = vmatprep.subr.bf16.mxu0 %v4922_v38  ;;  %1509 = vmatprep.subr.bf16.mxu1 %v4925_v39  ;;  %v243_v39 = vld [vmem:[%s7046_s2] sm:$0xf] }
  0x9d   :  { %v6124_v37 = vshrl.u32 %v245_v36, 7  ;;  %v5041_v36 = vld [vmem:[%s7047_s5 + $0x8c] ss:$16 sps:$4 sm:$0xff]  }
  0x9f   :  { %1346 = vmatpush1.bf16.msra.mxu0 %v4920_v40  ;;  %1510 = vmatpush1.bf16.msra.mxu1 %v4923_v41  ;;  %v6127_v38 = vsub.s32 0, %v6124_v37  ;;  %v6133_v40 = vsub.s32 1, %v6124_v37  ;;  %v6136_v41 = vsub.s32 3, %v6124_v37 }
  0xa0   :  { %1347 = vmatprep.subr.bf16.mxu0 %v4928_v42  ;;  %1511 = vmatprep.subr.bf16.mxu1 %v4931_v43 }
  0xa1   :  { %v248_v42 = vrot.slane %v243_v39, %v6127_v38  ;;  %v252_v43 = vrot.slane %v243_v39, %v6133_v40 }
  0xa3   :  { %1348 = vmatpush1.bf16.msra.mxu0 %v4926_v44  ;;  %1512 = vmatpush1.bf16.msra.mxu1 %v4929_v45  ;;  %v260_v44 = vrot.slane %v243_v39, %v6136_v41 }
  0xa4   :  { %1349 = vmatprep.subr.bf16.mxu0 %v4934_v46  ;;  %1513 = vmatprep.subr.bf16.mxu1 %v4937_v47 }
  0xa7   :  { %1350 = vmatpush1.bf16.msra.mxu0 %v4932_v48  ;;  %1514 = vmatpush1.bf16.msra.mxu1 %v4935_v49 }
  0xa8   :  { %1351 = vmatprep.subr.bf16.mxu0 %v4940_v50  ;;  %1515 = vmatprep.subr.bf16.mxu1 %v4943_v51 }
  0xab   :  { %1352 = vmatpush1.bf16.msra.mxu0 %v4938_v52  ;;  %1516 = vmatpush1.bf16.msra.mxu1 %v4941_v53 }
  0xac   :  { %1353 = vmatprep.subr.bf16.mxu0 %v4946_v54  ;;  %1517 = vmatprep.subr.bf16.mxu1 %v4949_v55 }
  0xaf   :  { %1354 = vmatpush1.bf16.msra.mxu0 %v4944_v56  ;;  %1518 = vmatpush1.bf16.msra.mxu1 %v4947_v57 }
  0xb0   :  { %1355 = vmatprep.subr.bf16.mxu0 %v4952_v58  ;;  %1519 = vmatprep.subr.bf16.mxu1 %v4955_v59 }
  0xb3   :  { %1356 = vmatpush1.bf16.msra.mxu0 %v4950_v60  ;;  %1520 = vmatpush1.bf16.msra.mxu1 %v4953_v61  ;;  %v4997_v60 = vld [vmem:[%s7045_s3 + $0x80] sm:$0xff]  }
  0xb4   :  { %1357 = vmatprep.subr.bf16.mxu0 %v4958_v62  ;;  %1521 = vmatprep.subr.bf16.mxu1 %v4961_v63  ;;  %v4998_v62 = vld [vmem:[%s7045_s3 + $0xc8] sm:$0xff]  }
  0xb7   :  { %1358 = vmatpush1.bf16.msra.mxu0 %v4956_v0  ;;  %1522 = vmatpush1.bf16.msra.mxu1 %v4959_v1  ;;  %v4999_v0 = vld [vmem:[%s7045_s3 + $0x88] sm:$0xff]   ;;  %v5000_v1 = vld [vmem:[%s7045_s3 + $0xd0] sm:$0xff]  }
  0xb8   :  { %1359 = vmatprep.subr.bf16.mxu0 %v4964_v2  ;;  %1523 = vmatprep.subr.bf16.mxu1 %v4967_v3  ;;  %v5001_v2 = vld [vmem:[%s7045_s3 + $0x90] sm:$0xff]   ;;  %v5002_v3 = vld [vmem:[%s7045_s3 + $0xd8] sm:$0xff]  }
  0xbb   :  { %1360 = vmatpush1.bf16.msra.mxu0 %v4962_v4  ;;  %1524 = vmatpush1.bf16.msra.mxu1 %v4965_v5  ;;  %v5003_v4 = vld [vmem:[%s7045_s3 + $0x98] sm:$0xff]   ;;  %v5004_v5 = vld [vmem:[%s7045_s3 + $0xe0] sm:$0xff]  }
  0xbc   :  { %1361 = vmatprep.subr.bf16.mxu0 %v4970_v6  ;;  %1525 = vmatprep.subr.bf16.mxu1 %v4973_v7  ;;  %v5005_v6 = vld [vmem:[%s7045_s3 + $0xa0] sm:$0xff]   ;;  %v6169_v7 = vsub.s32 2, %v6124_v37 }
  0xbe   :  { %v256_v10 = vrot.slane %v243_v39, %v6169_v7  ;;  %v5039_v39 = vld [vmem:[%s7047_s5 + $0x88] ss:$16 sps:$4 sm:$0xff]  }
  0xbf   :  { %1362 = vmatpush1.bf16.msra.mxu0 %v4968_v8  ;;  %1526 = vmatpush1.bf16.msra.mxu1 %v4971_v9  ;;  %v5006_v8 = vld [vmem:[%s7045_s3 + $0xe8] sm:$0xff]  }
  0xc0   :  { %1372 = vmatprep.subr.bf16.mxu0 %v4976_v11  ;;  %1536 = vmatprep.subr.bf16.mxu1 %v4979_v12  ;;  %v5007_v9 = vld [vmem:[%s7045_s3 + $0xa8] sm:$0xff]   ;;  %v5008_v11 = vld [vmem:[%s7045_s3 + $0xf0] sm:$0xff]  }
  0xc1   :  { %v5009_v12 = vld [vmem:[%s7045_s3 + $0xb0] sm:$0xff]  }
  0xc2   :  { %1364 = vmatmul.mubr.bf16.vlgmr.msra.gmra.mrb[0].mxu0 %v44_v13  ;;  %1528 = vmatmul.mubr.bf16.vlgmr.msra.gmra.mrb[0].mxu1 %v44_v13 }
  0xc3   :  { %1373 = vmatpush1.bf16.msra.mxu0 %v4974_v14  ;;  %1537 = vmatpush1.bf16.msra.mxu1 %v4977_v15  ;;  %v5010_v14 = vld [vmem:[%s7045_s3 + $0xf8] sm:$0xff]  }
  0xc4   :  { %1404 = vmatprep.mubr.bf16.mxu0 %v5408_v17  ;;  %1568 = vmatprep.mubr.bf16.mxu1 %v5408_v17  ;;  %v5011_v15 = vld [vmem:[%s7045_s3 + $0xb8] sm:$0xff]  }
  0xc5   :  { %4551 = vmatprep.subr.bf16.mxu1 %v4980_v16 }
  0xce   :  { %4260 = vmatmul.mubr.msk.bf16.vlgmr.msra.gmra.mrb[0].mxu0 %vm1245_vm0, %v46_v19  ;;  %4261 = vmatmul.mubr.msk.bf16.vlgmr.msra.gmra.mrb[0].mxu1 %vm1245_vm0, %v46_v19  ;;  %v5012_v19 = vld [vmem:[%s7047_s5] ss:$16 sps:$4 sm:$0xff]  }
  0xcf   :  { %4552 = vmatpush3.bf16.msra.mxu1 %v4981_v20  ;;  %2175 = vmatprep.mubr.bf16.mxu0 %v5408_v17  ;;  %v5014_v20 = vld [vmem:[%s7047_s5 + $0x4] ss:$16 sps:$4 sm:$0xff]  }
  0xd0   :  { %4553 = vmatprep.subr.bf16.mxu1 %v4982_v21  ;;  %v5015_v21 = vld [vmem:[%s7047_s5 + $0x8] ss:$16 sps:$4 sm:$0xff]   ;;  %2143 = vmatprep.subr.bf16.mxu0 %v5014_v20 }
  0xd1   :  { %2144 = vmatpush1.bf16.msra.mxu0 %v5012_v19  ;;  %v5083_v19 = vld [vmem:[%s7048_s7 + $0xb4] ss:$28 sps:$4 sm:$0xff]   ;;  %v5078_v20 = vld [vmem:[%s7048_s7 + $0xa8] ss:$28 sps:$4 sm:$0xff]  }
  0xd3   :  { %4554 = vmatpush3.bf16.msra.mxu1 %v4983_v22  ;;  %v5017_v22 = vld [vmem:[%s7047_s5 + $0xc] ss:$16 sps:$4 sm:$0xff]  }
  0xd4   :  { %4555 = vmatprep.subr.bf16.mxu1 %v4984_v23  ;;  %v5020_v23 = vld [vmem:[%s7047_s5 + $0x24] ss:$16 sps:$4 sm:$0xff]  }
  0xd5   :  { %2145 = vmatprep.subr.bf16.mxu0 %v5020_v23  ;;  %v5084_v23 = vld [vmem:[%s7048_s7 + $0xe0] ss:$28 sps:$4 sm:$0xff]  }
  0xd7   :  { %4556 = vmatpush3.bf16.msra.mxu1 %v4985_v24  ;;  %v5021_v24 = vld [vmem:[%s7047_s5 + $0x28] ss:$16 sps:$4 sm:$0xff]  }
  0xd8   :  { %4557 = vmatprep.subr.bf16.mxu1 %v4986_v25  ;;  %v5023_v25 = vld [vmem:[%s7047_s5 + $0x2c] ss:$16 sps:$4 sm:$0xff]  }
  0xdb   :  { %4558 = vmatpush3.bf16.msra.mxu1 %v4987_v26  ;;  %v5026_v26 = vld [vmem:[%s7047_s5 + $0x44] ss:$16 sps:$4 sm:$0xff]  }
  0xdc   :  { %4559 = vmatprep.subr.bf16.mxu1 %v4988_v27  ;;  %v5024_v27 = vld [vmem:[%s7047_s5 + $0x40] ss:$16 sps:$4 sm:$0xff]  }
  0xdf   :  { %4560 = vmatpush3.bf16.msra.mxu1 %v4989_v28  ;;  %v5029_v28 = vld [vmem:[%s7047_s5 + $0x4c] ss:$16 sps:$4 sm:$0xff]  }
  0xe0   :  { %4561 = vmatprep.subr.bf16.mxu1 %v4990_v29  ;;  %v5027_v29 = vld [vmem:[%s7047_s5 + $0x48] ss:$16 sps:$4 sm:$0xff]  }
  0xe3   :  { %4562 = vmatpush3.bf16.msra.mxu1 %v4991_v30  ;;  %v5032_v30 = vld [vmem:[%s7047_s5 + $0x64] ss:$16 sps:$4 sm:$0xff]  }
  0xe4   :  { %4563 = vmatprep.subr.bf16.mxu1 %v4992_v31  ;;  %v5035_v31 = vld [vmem:[%s7047_s5 + $0x6c] ss:$16 sps:$4 sm:$0xff]  }
  0xe7   :  { %4564 = vmatpush3.bf16.msra.mxu1 %v4993_v32  ;;  %v5030_v32 = vld [vmem:[%s7047_s5 + $0x60] ss:$16 sps:$4 sm:$0xff]  }
  0xe8   :  { %4565 = vmatprep.subr.bf16.mxu1 %v4994_v33  ;;  %v5033_v33 = vld [vmem:[%s7047_s5 + $0x68] ss:$16 sps:$4 sm:$0xff]  }
  0xeb   :  { %4566 = vmatpush3.bf16.msra.mxu1 %v4995_v34  ;;  %v5038_v34 = vld [vmem:[%s7047_s5 + $0x84] ss:$16 sps:$4 sm:$0xff]  }
  0xec   :  { %4573 = vmatprep.subr.bf16.mxu1 %v4996_v35  ;;  %v5036_v35 = vld [vmem:[%s7047_s5 + $0x80] ss:$16 sps:$4 sm:$0xff]  }
 0x1a1   :  { %v1406_v45 = vpop.f32.mrb[0].mxu0  ;;  %v1570_v46 = vpop.f32.mrb[0].mxu1 }
 0x1a2   :  { %v4639_v47 = vadd.f32 %v1406_v45, %v248_v42  ;;  %v1408_v48 = vpop.f32.mrb[1].mxu0  ;;  %v1572_v49 = vpop.f32.mrb[1].mxu1  ;;  %v4641_v13 = vadd.f32 %v1570_v46, %v256_v10  ;;  %v5044_v42 = vld [vmem:[%s7047_s5 + $0xa4] ss:$16 sps:$4 sm:$0xff]   ;;  %v5045_v45 = vld [vmem:[%s7047_s5 + $0xa8] ss:$16 sps:$4 sm:$0xff]  }
 0x1a3   :  { %v4640_v50 = vadd.f32 %v1408_v48, %v252_v43  ;;  %v4642_v51 = vadd.f32 %v1572_v49, %v260_v44  ;;  %v1410_v52 = vpop.f32.mrb[2].mxu0  ;;  %v1574_v53 = vpop.f32.mrb[2].mxu1  ;;  %v5047_v43 = vld [vmem:[%s7047_s5 + $0xac] ss:$16 sps:$4 sm:$0xff]   ;;  %v5042_v44 = vld [vmem:[%s7047_s5 + $0xa0] ss:$16 sps:$4 sm:$0xff]  }
 0x1a4   :  { %v1577_v54 = vmax.f32 %v4639_v47, 0.0  ;;  %v1411_v55 = vpop.f32.mrb[3].mxu0  ;;  %v1575_v56 = vpop.f32.mrb[3].mxu1  ;;  %v1579_v16 = vmax.f32 %v4641_v13, 0.0  ;;  %v5050_v46 = vld [vmem:[%s7047_s5 + $0xc4] ss:$16 sps:$4 sm:$0xff]  }
 0x1a5   :  { %v1578_v57 = vmax.f32 %v4640_v50, 0.0  ;;  %v1580_v58 = vmax.f32 %v4642_v51, 0.0  ;;  %v5053_v47 = vld [vmem:[%s7047_s5 + $0xcc] ss:$16 sps:$4 sm:$0xff]   ;;  %v5048_v48 = vld [vmem:[%s7047_s5 + $0xc0] ss:$16 sps:$4 sm:$0xff]  }
 0x1a6   :  { %v1581_v61 = vpack.c.bf16 %v1577_v54, %v1577_v54  ;;  %v1583_v18 = vpack.c.bf16 %v1579_v16, %v1579_v16  ;;  %v5051_v49 = vld [vmem:[%s7047_s5 + $0xc8] ss:$16 sps:$4 sm:$0xff]   ;;  %v5056_v50 = vld [vmem:[%s7047_s5 + $0xe4] ss:$16 sps:$4 sm:$0xff]   ;;  %v5059_v51 = vld [vmem:[%s7047_s5 + $0xec] ss:$16 sps:$4 sm:$0xff]  }
 0x1a7   :  { %v1582_v59 = vpack.c.bf16 %v1578_v57, %v1578_v57  ;;  %v1584_v63 = vpack.c.bf16 %v1580_v58, %v1580_v58  ;;  %v5054_v52 = vld [vmem:[%s7047_s5 + $0xe0] ss:$16 sps:$4 sm:$0xff]   ;;  %v5057_v53 = vld [vmem:[%s7047_s5 + $0xe8] ss:$16 sps:$4 sm:$0xff]  }
 0x1a8   :  { %v5062_v54 = vld [vmem:[%s7048_s7 + $0x4] ss:$28 sps:$4 sm:$0xff]   ;;  %v5065_v55 = vld [vmem:[%s7048_s7 + $0xc] ss:$28 sps:$4 sm:$0xff]   ;;  %v5074_v13 = vld [vmem:[%s7048_s7 + $0x74] ss:$28 sps:$4 sm:$0xff]  }
 0x1a9   :  { %1880 = vmatprep.mubr.bf16.mxu1 %v1582_v59  ;;  %v5071_v10 = vld [vmem:[%s7048_s7 + $0x44] ss:$28 sps:$4 sm:$0xff]   ;;  %v5075_v16 = vld [vmem:[%s7048_s7 + $0x78] ss:$28 sps:$4 sm:$0xff]  }
 0x1aa   :  { %1881 = vmatmul.mubr.bf16.vlgmr.msra.gmra.mrb[4].mxu1 %v1581_v61  ;;  %v4262_v61 = vld [vmem:[%s7049_s4] ss:$0 sm:$0xff] }
 0x1ab   :  { %4574 = vmatpush3.bf16.msra.mxu1 %v4997_v60  ;;  %1920 = vmatprep.mubr.bf16.mxu1 %v1584_v63 }
 0x1ac   :  { %4575 = vmatprep.subr.bf16.mxu1 %v4998_v62 }
 0x1af   :  { %4576 = vmatpush3.bf16.msra.mxu1 %v4999_v0 }
 0x1b0   :  { %4577 = vmatprep.subr.bf16.mxu1 %v5000_v1 }
 0x1b3   :  { %4578 = vmatpush3.bf16.msra.mxu1 %v5001_v2 }
 0x1b4   :  { %4579 = vmatprep.subr.bf16.mxu1 %v5002_v3 }
 0x1b7   :  { %4580 = vmatpush3.bf16.msra.mxu1 %v5003_v4 }
 0x1b8   :  { %4581 = vmatprep.subr.bf16.mxu1 %v5004_v5  ;;  %v5060_v5 = vld [vmem:[%s7048_s7] ss:$28 sps:$4 sm:$0xff]  }
 0x1bb   :  { %4582 = vmatpush3.bf16.msra.mxu1 %v5005_v6  ;;  %v5063_v6 = vld [vmem:[%s7048_s7 + $0x8] ss:$28 sps:$4 sm:$0xff]  }
 0x1bc   :  { %4583 = vmatprep.subr.bf16.mxu1 %v5006_v8 }
 0x1bf   :  { %4584 = vmatpush3.bf16.msra.mxu1 %v5007_v9  ;;  %v5068_v9 = vld [vmem:[%s7048_s7 + $0x3c] ss:$28 sps:$4 sm:$0xff]  }
 0x1c0   :  { %4585 = vmatprep.subr.bf16.mxu1 %v5008_v11  ;;  %v5066_v11 = vld [vmem:[%s7048_s7 + $0x38] ss:$28 sps:$4 sm:$0xff]  }
 0x1c3   :  { %4586 = vmatpush3.bf16.msra.mxu1 %v5009_v12  ;;  %v5069_v12 = vld [vmem:[%s7048_s7 + $0x40] ss:$28 sps:$4 sm:$0xff]  }
 0x1c4   :  { %4587 = vmatprep.subr.bf16.mxu1 %v5010_v14  ;;  %v5077_v14 = vld [vmem:[%s7048_s7 + $0x7c] ss:$28 sps:$4 sm:$0xff]  }
 0x1c7   :  { %4588 = vmatpush3.bf16.msra.mxu1 %v5011_v15  ;;  %v5072_v15 = vld [vmem:[%s7048_s7 + $0x70] ss:$28 sps:$4 sm:$0xff]  }
 0x1c8   :  { %2184 = vmatprep.subr.bf16.mxu1 %v5017_v22  ;;  %v5086_v22 = vld [vmem:[%s7048_s7 + $0xe4] ss:$28 sps:$4 sm:$0xff]  }
 0x1ca   :  { %1921 = vmatmul.mubr.bf16.vlgmr.msra.gmra.mrb[8].mxu1 %v1583_v18  ;;  %v5080_v18 = vld [vmem:[%s7048_s7 + $0xac] ss:$28 sps:$4 sm:$0xff]  }
 0x1cb   :  { %2216 = vmatprep.mubr.bf16.mxu1 %v5408_v17  ;;  %v5018_v17 = vld [vmem:[%s7047_s5 + $0x20] ss:$16 sps:$4 sm:$0xff]   ;;  %2185 = vmatpush1.bf16.msra.mxu1 %v5015_v21 }
 0x1cc   :  { %2186 = vmatprep.subr.bf16.mxu1 %v5023_v25  ;;  %2146 = vmatpush1.bf16.msra.mxu0 %v5018_v17  ;;  %v5081_v21 = vld [vmem:[%s7048_s7 + $0xb0] ss:$28 sps:$4 sm:$0xff]   ;;  %v5092_v25 = vld [vmem:[%s7048_s7 + $0x11c] ss:$28 sps:$4 sm:$0xff]  }
 0x1cd   :  { %2147 = vmatprep.subr.bf16.mxu0 %v5026_v26  ;;  %v5089_v17 = vld [vmem:[%s7048_s7 + $0xec] ss:$28 sps:$4 sm:$0xff]   ;;  %v5095_v26 = vld [vmem:[%s7048_s7 + $0x124] ss:$28 sps:$4 sm:$0xff]  }
 0x1cf   :  { %2187 = vmatpush1.bf16.msra.mxu1 %v5021_v24  ;;  %v5087_v24 = vld [vmem:[%s7048_s7 + $0xe8] ss:$28 sps:$4 sm:$0xff]  }
 0x1d0   :  { %2188 = vmatprep.subr.bf16.mxu1 %v5029_v28  ;;  %2148 = vmatpush1.bf16.msra.mxu0 %v5024_v27  ;;  %v5090_v27 = vld [vmem:[%s7048_s7 + $0x118] ss:$28 sps:$4 sm:$0xff]   ;;  %v5093_v28 = vld [vmem:[%s7048_s7 + $0x120] ss:$28 sps:$4 sm:$0xff]  }
 0x1d1   :  { %2149 = vmatprep.subr.bf16.mxu0 %v5032_v30  ;;  %v5101_v30 = vld [vmem:[%s7048_s7 + $0x15c] ss:$28 sps:$4 sm:$0xff]  }
 0x1d3   :  { %2189 = vmatpush1.bf16.msra.mxu1 %v5027_v29  ;;  %v5098_v29 = vld [vmem:[%s7048_s7 + $0x154] ss:$28 sps:$4 sm:$0xff]  }
 0x1d4   :  { %2190 = vmatprep.subr.bf16.mxu1 %v5035_v31  ;;  %2150 = vmatpush1.bf16.msra.mxu0 %v5030_v32  ;;  %v5096_v31 = vld [vmem:[%s7048_s7 + $0x150] ss:$28 sps:$4 sm:$0xff]   ;;  %v5099_v32 = vld [vmem:[%s7048_s7 + $0x158] ss:$28 sps:$4 sm:$0xff]  }
 0x1d5   :  { %2151 = vmatprep.subr.bf16.mxu0 %v5038_v34  ;;  %v5107_v34 = vld [vmem:[%s7048_s7 + $0x194] ss:$28 sps:$4 sm:$0xff]  }
 0x1d7   :  { %2191 = vmatpush1.bf16.msra.mxu1 %v5033_v33  ;;  %v5104_v33 = vld [vmem:[%s7048_s7 + $0x18c] ss:$28 sps:$4 sm:$0xff]  }
 0x1d8   :  { %2192 = vmatprep.subr.bf16.mxu1 %v5041_v36  ;;  %2152 = vmatpush1.bf16.msra.mxu0 %v5036_v35  ;;  %v5102_v35 = vld [vmem:[%s7048_s7 + $0x188] ss:$28 sps:$4 sm:$0xff]   ;;  %v5105_v36 = vld [vmem:[%s7048_s7 + $0x190] ss:$28 sps:$4 sm:$0xff]  }
 0x1d9   :  { %2153 = vmatprep.subr.bf16.mxu0 %v5044_v42  ;;  %v5113_v42 = vld [vmem:[%s7048_s7 + $0x1cc] ss:$28 sps:$4 sm:$0xff]  }
 0x1db   :  { %2193 = vmatpush1.bf16.msra.mxu1 %v5039_v39  ;;  %v5110_v39 = vld [vmem:[%s7048_s7 + $0x1c4] ss:$28 sps:$4 sm:$0xff]  }
 0x1dc   :  { %2194 = vmatprep.subr.bf16.mxu1 %v5047_v43  ;;  %2154 = vmatpush1.bf16.msra.mxu0 %v5042_v44  ;;  %v5108_v43 = vld [vmem:[%s7048_s7 + $0x1c0] ss:$28 sps:$4 sm:$0xff]   ;;  %v5111_v44 = vld [vmem:[%s7048_s7 + $0x1c8] ss:$28 sps:$4 sm:$0xff]  }
 0x1dd   :  { %2155 = vmatprep.subr.bf16.mxu0 %v5050_v46  ;;  %v5119_v46 = vld [vmem:[%s7048_s7 + $0x204] ss:$28 sps:$4 sm:$0xff]  }
 0x1df   :  { %2195 = vmatpush1.bf16.msra.mxu1 %v5045_v45  ;;  %v5116_v45 = vld [vmem:[%s7048_s7 + $0x1fc] ss:$28 sps:$4 sm:$0xff]  }
 0x1e0   :  { %2196 = vmatprep.subr.bf16.mxu1 %v5053_v47  ;;  %2156 = vmatpush1.bf16.msra.mxu0 %v5048_v48  ;;  %v5114_v47 = vld [vmem:[%s7048_s7 + $0x1f8] ss:$28 sps:$4 sm:$0xff]   ;;  %v5117_v48 = vld [vmem:[%s7048_s7 + $0x200] ss:$28 sps:$4 sm:$0xff]  }
 0x1e1   :  { %2157 = vmatprep.subr.bf16.mxu0 %v5056_v50  ;;  %v5125_v50 = vld [vmem:[%s7048_s7 + $0x23c] ss:$28 sps:$4 sm:$0xff]  }
 0x1e3   :  { %2197 = vmatpush1.bf16.msra.mxu1 %v5051_v49  ;;  %v5122_v49 = vld [vmem:[%s7048_s7 + $0x234] ss:$28 sps:$4 sm:$0xff]  }
 0x1e4   :  { %2198 = vmatprep.subr.bf16.mxu1 %v5059_v51  ;;  %2158 = vmatpush1.bf16.msra.mxu0 %v5054_v52  ;;  %v5120_v51 = vld [vmem:[%s7048_s7 + $0x230] ss:$28 sps:$4 sm:$0xff]   ;;  %v5123_v52 = vld [vmem:[%s7048_s7 + $0x238] ss:$28 sps:$4 sm:$0xff]  }
 0x1e5   :  { %3678 = vmatprep.subr.bf16.mxu0 %v5062_v54  ;;  %v5131_v54 = vld [vmem:[%s7048_s7 + $0x274] ss:$28 sps:$4 sm:$0xff]  }
 0x1e7   :  { %2199 = vmatpush1.bf16.msra.mxu1 %v5057_v53  ;;  %v5128_v53 = vld [vmem:[%s7048_s7 + $0x26c] ss:$28 sps:$4 sm:$0xff]  }
 0x1e8   :  { %3760 = vmatprep.subr.bf16.mxu1 %v5065_v55  ;;  %v5126_v55 = vld [vmem:[%s7048_s7 + $0x268] ss:$28 sps:$4 sm:$0xff]  }
 0x27d   :  { %v4567_v56 = vpop.f32.mrb[4].mxu1 }
 0x27e   :  { %v4568_v57 = vpop.f32.mrb[5].mxu1 }
 0x27f   :  { %v4569_v58 = vadd.f32 %v4568_v57, %v4567_v56  ;;  %v4570_v59 = vpop.f32.mrb[6].mxu1  ;;  %v5129_v56 = vld [vmem:[%s7048_s7 + $0x270] ss:$28 sps:$4 sm:$0xff]   ;;  %v5134_v57 = vld [vmem:[%s7048_s7 + $0x2a4] ss:$28 sps:$4 sm:$0xff]  }
 0x280   :  { %v4571_v60 = vpop.f32.mrb[7].mxu1  ;;  %v5132_v59 = vld [vmem:[%s7048_s7 + $0x2a0] ss:$28 sps:$4 sm:$0xff]  }
 0x281   :  { %v1883_v0 = vadd.f32 %v4569_v58, %v4262_v61  ;;  %v5137_v58 = vld [vmem:[%s7048_s7 + $0x2ac] ss:$28 sps:$4 sm:$0xff]   ;;  %v5140_v61 = vld [vmem:[%s7048_s7 + $0x2dc] ss:$28 sps:$4 sm:$0xff]  }
 0x282   :  { %v5135_v60 = vld [vmem:[%s7048_s7 + $0x2a8] ss:$28 sps:$4 sm:$0xff]  }
 0x29d   :  { %v4589_v62 = vpop.f32.mrb[8].mxu1 }
 0x29e   :  { %v4590_v63 = vpop.f32.mrb[9].mxu1 }
 0x29f   :  { %v4591_v1 = vadd.f32 %v4590_v63, %v4589_v62  ;;  %v4592_v2 = vpop.f32.mrb[10].mxu1  ;;  %v5143_v62 = vld [vmem:[%s7048_s7 + $0x2e4] ss:$28 sps:$4 sm:$0xff]   ;;  %v5138_v63 = vld [vmem:[%s7048_s7 + $0x2d8] ss:$28 sps:$4 sm:$0xff]  }
 0x2a0   :  { %v4593_v3 = vpop.f32.mrb[11].mxu1  ;;  %v5149_v2 = vld [vmem:[%s7048_s7 + $0x31c] ss:$28 sps:$4 sm:$0xff]  }
 0x2a1   :  { %v1923_v4 = vadd.f32 %v4591_v1, %v1883_v0  ;;  %v5141_v0 = vld [vmem:[%s7048_s7 + $0x2e0] ss:$28 sps:$4 sm:$0xff]   ;;  %v5146_v1 = vld [vmem:[%s7048_s7 + $0x314] ss:$28 sps:$4 sm:$0xff]  }
 0x2a2   :  { %v5144_v3 = vld [vmem:[%s7048_s7 + $0x310] ss:$28 sps:$4 sm:$0xff]  }
 0x2a3   :  { %v1928_v8 = vpack.c.bf16 %v1923_v4, %v1923_v4  ;;  %v5147_v4 = vld [vmem:[%s7048_s7 + $0x318] ss:$28 sps:$4 sm:$0xff]  }
 0x2a5   :  { %2176 = vmatmul.mubr.bf16.vlgmr.msra.gmra.mrb[4].mxu0 %v1928_v8  ;;  %2217 = vmatmul.mubr.bf16.vlgmr.msra.gmra.mrb[12].mxu1 %v1928_v8  ;;  %v5150_v8 = vld [vmem:[%s7048_s7 + $0x348] ss:$28 sps:$4 sm:$0xff]  }
 0x2a6   :  { %3679 = vmatpush1.bf16.msra.mxu0 %v5060_v5  ;;  %3761 = vmatpush1.bf16.msra.mxu1 %v5063_v6  ;;  %v5152_v5 = vld [vmem:[%s7048_s7 + $0x34c] ss:$28 sps:$4 sm:$0xff]   ;;  %v5155_v6 = vld [vmem:[%s7048_s7 + $0x354] ss:$28 sps:$4 sm:$0xff]  }
 0x2a7   :  { %3680 = vmatprep.subr.bf16.mxu0 %v5068_v9  ;;  %3762 = vmatprep.subr.bf16.mxu1 %v5071_v10  ;;  %v5153_v9 = vld [vmem:[%s7048_s7 + $0x350] ss:$28 sps:$4 sm:$0xff]   ;;  %v5158_v10 = vld [vmem:[%s7048_s7 + $0x384] ss:$28 sps:$4 sm:$0xff]  }
 0x2aa   :  { %3681 = vmatpush1.bf16.msra.mxu0 %v5066_v11  ;;  %3763 = vmatpush1.bf16.msra.mxu1 %v5069_v12  ;;  %v5161_v11 = vld [vmem:[%s7048_s7 + $0x38c] ss:$28 sps:$4 sm:$0xff]   ;;  %v6491_v12 = vld [vmem:[%s7050_s6] sm:$0xf] }
 0x2ab   :  { %3682 = vmatprep.subr.bf16.mxu0 %v5074_v13  ;;  %3764 = vmatprep.subr.bf16.mxu1 %v5077_v14  ;;  %v1966_v13 = vrot.slane %v6491_v12, %v6127_v38  ;;  %v1970_v14 = vrot.slane %v6491_v12, %v6133_v40 }
 0x2ae   :  { %3683 = vmatpush1.bf16.msra.mxu0 %v5072_v15  ;;  %3765 = vmatpush1.bf16.msra.mxu1 %v5075_v16  ;;  %v1978_v15 = vrot.slane %v6491_v12, %v6136_v41 }
 0x2af   :  { %3684 = vmatprep.subr.bf16.mxu0 %v5080_v18  ;;  %3766 = vmatprep.subr.bf16.mxu1 %v5083_v19 }
 0x2b2   :  { %3685 = vmatpush1.bf16.msra.mxu0 %v5078_v20  ;;  %3767 = vmatpush1.bf16.msra.mxu1 %v5081_v21 }
 0x2b3   :  { %3686 = vmatprep.subr.bf16.mxu0 %v5086_v22  ;;  %3768 = vmatprep.subr.bf16.mxu1 %v5089_v17 }
 0x2b6   :  { %3687 = vmatpush1.bf16.msra.mxu0 %v5084_v23  ;;  %3769 = vmatpush1.bf16.msra.mxu1 %v5087_v24 }
 0x2b7   :  { %3688 = vmatprep.subr.bf16.mxu0 %v5092_v25  ;;  %3770 = vmatprep.subr.bf16.mxu1 %v5095_v26 }
 0x2ba   :  { %3689 = vmatpush1.bf16.msra.mxu0 %v5090_v27  ;;  %3771 = vmatpush1.bf16.msra.mxu1 %v5093_v28 }
 0x2bb   :  { %3690 = vmatprep.subr.bf16.mxu0 %v5098_v29  ;;  %3772 = vmatprep.subr.bf16.mxu1 %v5101_v30 }
 0x2be   :  { %3691 = vmatpush1.bf16.msra.mxu0 %v5096_v31  ;;  %3773 = vmatpush1.bf16.msra.mxu1 %v5099_v32  ;;  %v5156_v31 = vld [vmem:[%s7048_s7 + $0x380] ss:$28 sps:$4 sm:$0xff]   ;;  %v5159_v32 = vld [vmem:[%s7048_s7 + $0x388] ss:$28 sps:$4 sm:$0xff]  }
 0x2bf   :  { %3692 = vmatprep.subr.bf16.mxu0 %v5104_v33  ;;  %3774 = vmatprep.subr.bf16.mxu1 %v5107_v34  ;;  %v5164_v34 = vld [vmem:[%s7048_s7 + $0x3bc] ss:$28 sps:$4 sm:$0xff]  }
 0x2c2   :  { %3693 = vmatpush1.bf16.msra.mxu0 %v5102_v35  ;;  %3775 = vmatpush1.bf16.msra.mxu1 %v5105_v36  ;;  %v5167_v35 = vld [vmem:[%s7048_s7 + $0x3c4] ss:$28 sps:$4 sm:$0xff]  }
 0x2c3   :  { %3694 = vmatprep.subr.bf16.mxu0 %v5110_v39  ;;  %3776 = vmatprep.subr.bf16.mxu1 %v5113_v42  ;;  %v5162_v39 = vld [vmem:[%s7048_s7 + $0x3b8] ss:$28 sps:$4 sm:$0xff]   ;;  %v5165_v42 = vld [vmem:[%s7048_s7 + $0x3c0] ss:$28 sps:$4 sm:$0xff]  }
 0x2c6   :  { %3695 = vmatpush1.bf16.msra.mxu0 %v5108_v43  ;;  %3777 = vmatpush1.bf16.msra.mxu1 %v5111_v44  ;;  %v5170_v43 = vld [vmem:[%s7048_s7 + $0x3f4] ss:$28 sps:$4 sm:$0xff]   ;;  %v5173_v44 = vld [vmem:[%s7048_s7 + $0x3fc] ss:$28 sps:$4 sm:$0xff]  }
 0x2c7   :  { %3696 = vmatprep.subr.bf16.mxu0 %v5116_v45  ;;  %3778 = vmatprep.subr.bf16.mxu1 %v5119_v46  ;;  %v5168_v45 = vld [vmem:[%s7048_s7 + $0x3f0] ss:$28 sps:$4 sm:$0xff]   ;;  %v5171_v46 = vld [vmem:[%s7048_s7 + $0x3f8] ss:$28 sps:$4 sm:$0xff]  }
 0x2ca   :  { %3697 = vmatpush1.bf16.msra.mxu0 %v5114_v47  ;;  %3779 = vmatpush1.bf16.msra.mxu1 %v5117_v48  ;;  %v5176_v47 = vld [vmem:[%s7048_s7 + $0x42c] ss:$28 sps:$4 sm:$0xff]   ;;  %v5179_v48 = vld [vmem:[%s7048_s7 + $0x434] ss:$28 sps:$4 sm:$0xff]  }
 0x2cb   :  { %3698 = vmatprep.subr.bf16.mxu0 %v5122_v49  ;;  %3780 = vmatprep.subr.bf16.mxu1 %v5125_v50  ;;  %v5174_v49 = vld [vmem:[%s7048_s7 + $0x428] ss:$28 sps:$4 sm:$0xff]   ;;  %v5177_v50 = vld [vmem:[%s7048_s7 + $0x430] ss:$28 sps:$4 sm:$0xff]  }
 0x2ce   :  { %3699 = vmatpush1.bf16.msra.mxu0 %v5120_v51  ;;  %3781 = vmatpush1.bf16.msra.mxu1 %v5123_v52  ;;  %v5182_v51 = vld [vmem:[%s7048_s7 + $0x464] ss:$28 sps:$4 sm:$0xff]   ;;  %v5185_v52 = vld [vmem:[%s7048_s7 + $0x46c] ss:$28 sps:$4 sm:$0xff]  }
 0x2cf   :  { %3700 = vmatprep.subr.bf16.mxu0 %v5128_v53  ;;  %3782 = vmatprep.subr.bf16.mxu1 %v5131_v54  ;;  %v5180_v53 = vld [vmem:[%s7048_s7 + $0x460] ss:$28 sps:$4 sm:$0xff]   ;;  %v5183_v54 = vld [vmem:[%s7048_s7 + $0x468] ss:$28 sps:$4 sm:$0xff]  }
 0x2d2   :  { %3701 = vmatpush1.bf16.msra.mxu0 %v5126_v55  ;;  %3783 = vmatpush1.bf16.msra.mxu1 %v5129_v56  ;;  %v5188_v55 = vld [vmem:[%s7048_s7 + $0x49c] ss:$28 sps:$4 sm:$0xff]   ;;  %v5191_v56 = vld [vmem:[%s7048_s7 + $0x4a4] ss:$28 sps:$4 sm:$0xff]  }
 0x2d3   :  { %3702 = vmatprep.subr.bf16.mxu0 %v5134_v57  ;;  %3784 = vmatprep.subr.bf16.mxu1 %v5137_v58  ;;  %v5186_v57 = vld [vmem:[%s7048_s7 + $0x498] ss:$28 sps:$4 sm:$0xff]   ;;  %v5189_v58 = vld [vmem:[%s7048_s7 + $0x4a0] ss:$28 sps:$4 sm:$0xff]  }
 0x2d6   :  { %3703 = vmatpush1.bf16.msra.mxu0 %v5132_v59  ;;  %3785 = vmatpush1.bf16.msra.mxu1 %v5135_v60  ;;  %v5194_v59 = vld [vmem:[%s7048_s7 + $0x4d4] ss:$28 sps:$4 sm:$0xff]   ;;  %v5197_v60 = vld [vmem:[%s7048_s7 + $0x4dc] ss:$28 sps:$4 sm:$0xff]  }
 0x2d7   :  { %3704 = vmatprep.subr.bf16.mxu0 %v5140_v61  ;;  %3786 = vmatprep.subr.bf16.mxu1 %v5143_v62  ;;  %v5192_v61 = vld [vmem:[%s7048_s7 + $0x4d0] ss:$28 sps:$4 sm:$0xff]   ;;  %v5195_v62 = vld [vmem:[%s7048_s7 + $0x4d8] ss:$28 sps:$4 sm:$0xff]  }
 0x2da   :  { %3705 = vmatpush1.bf16.msra.mxu0 %v5138_v63  ;;  %3787 = vmatpush1.bf16.msra.mxu1 %v5141_v0  ;;  %v5200_v63 = vld [vmem:[%s7048_s7 + $0x50c] ss:$28 sps:$4 sm:$0xff]   ;;  %v5203_v0 = vld [vmem:[%s7048_s7 + $0x514] ss:$28 sps:$4 sm:$0xff]  }
 0x2db   :  { %3706 = vmatprep.subr.bf16.mxu0 %v5146_v1  ;;  %3788 = vmatprep.subr.bf16.mxu1 %v5149_v2  ;;  %v5198_v1 = vld [vmem:[%s7048_s7 + $0x508] ss:$28 sps:$4 sm:$0xff]   ;;  %v5201_v2 = vld [vmem:[%s7048_s7 + $0x510] ss:$28 sps:$4 sm:$0xff]  }
 0x2de   :  { %3707 = vmatpush1.bf16.msra.mxu0 %v5144_v3  ;;  %3789 = vmatpush1.bf16.msra.mxu1 %v5147_v4  ;;  %v5206_v3 = vld [vmem:[%s7048_s7 + $0x544] ss:$28 sps:$4 sm:$0xff]   ;;  %v5209_v4 = vld [vmem:[%s7048_s7 + $0x54c] ss:$28 sps:$4 sm:$0xff]  }
 0x2df   :  { %3708 = vmatprep.subr.bf16.mxu0 %v5152_v5  ;;  %3790 = vmatprep.subr.bf16.mxu1 %v5155_v6  ;;  %v5204_v5 = vld [vmem:[%s7048_s7 + $0x540] ss:$28 sps:$4 sm:$0xff]   ;;  %v5207_v6 = vld [vmem:[%s7048_s7 + $0x548] ss:$28 sps:$4 sm:$0xff]  }
 0x2e2   :  { %3709 = vmatpush1.bf16.msra.mxu0 %v5150_v8  ;;  %3791 = vmatpush1.bf16.msra.mxu1 %v5153_v9  ;;  %v5212_v8 = vld [vmem:[%s7048_s7 + $0x57c] ss:$28 sps:$4 sm:$0xff]   ;;  %v5215_v9 = vld [vmem:[%s7048_s7 + $0x584] ss:$28 sps:$4 sm:$0xff]  }
 0x2e3   :  { %3719 = vmatprep.subr.bf16.mxu0 %v5158_v10  ;;  %3801 = vmatprep.subr.bf16.mxu1 %v5161_v11  ;;  %v5210_v10 = vld [vmem:[%s7048_s7 + $0x578] ss:$28 sps:$4 sm:$0xff]   ;;  %v5213_v11 = vld [vmem:[%s7048_s7 + $0x580] ss:$28 sps:$4 sm:$0xff]  }
 0x378   :  { %v2177_v16 = vpop.f32.mrb[4].mxu0  ;;  %v6499_v18 = vpop.f32.mrb[12].mxu1 }
 0x379   :  { %v2178_v19 = vadd.f32 %v2177_v16, %v1966_v13  ;;  %v2179_v20 = vpop.f32.mrb[5].mxu0  ;;  %v2220_v21 = vpop.f32.mrb[13].mxu1  ;;  %v5218_v13 = vld [vmem:[%s7048_s7 + $0x5b4] ss:$28 sps:$4 sm:$0xff]  }
 0x37a   :  { %v2180_v22 = vadd.f32 %v2179_v20, %v1970_v14  ;;  %v2221_v17 = vadd.f32 %v2220_v21, %v1978_v15  ;;  %v2181_v23 = vpop.f32.mrb[6].mxu0  ;;  %v2222_v24 = vpop.f32.mrb[14].mxu1  ;;  %v5221_v14 = vld [vmem:[%s7048_s7 + $0x5bc] ss:$28 sps:$4 sm:$0xff]   ;;  %v5216_v15 = vld [vmem:[%s7048_s7 + $0x5b0] ss:$28 sps:$4 sm:$0xff]  }
 0x37b   :  { %v2225_v25 = vmax.f32 %v2178_v19, 0.0  ;;  %v2182_v26 = vpop.f32.mrb[7].mxu0  ;;  %v2223_v27 = vpop.f32.mrb[15].mxu1  ;;  %v5219_v16 = vld [vmem:[%s7048_s7 + $0x5b8] ss:$28 sps:$4 sm:$0xff]  }
 0x37c   :  { %v2226_v28 = vmax.f32 %v2180_v22, 0.0  ;;  %v2228_v29 = vmax.f32 %v2221_v17, 0.0  ;;  %v5224_v19 = vld [vmem:[%s7048_s7 + $0x5ec] ss:$28 sps:$4 sm:$0xff]   ;;  %v5227_v20 = vld [vmem:[%s7048_s7 + $0x5f4] ss:$28 sps:$4 sm:$0xff]  }
 0x37d   :  { %v6509_v33 = vpack.c.bf16 %v2225_v25, %v2225_v25  ;;  %v5222_v21 = vld [vmem:[%s7048_s7 + $0x5e8] ss:$28 sps:$4 sm:$0xff]   ;;  %v5225_v22 = vld [vmem:[%s7048_s7 + $0x5f0] ss:$28 sps:$4 sm:$0xff]   ;;  %v5228_v24 = vld [vmem:[%s7048_s7 + $0x620] ss:$28 sps:$4 sm:$0xff]  }
 0x37e   :  { %v6501_v30 = vpack.c.bf16 %v2226_v28, %v2226_v28  ;;  %v6519_v36 = vpack.c.bf16 %v2228_v29, %v2228_v29  ;;  %v5230_v17 = vld [vmem:[%s7048_s7 + $0x624] ss:$28 sps:$4 sm:$0xff]   ;;  %v5233_v23 = vld [vmem:[%s7048_s7 + $0x62c] ss:$28 sps:$4 sm:$0xff]   ;;  %v5236_v26 = vld [vmem:[%s7048_s7 + $0x65c] ss:$28 sps:$4 sm:$0xff]  }
 0x37f   :  { %v5231_v25 = vld [vmem:[%s7048_s7 + $0x628] ss:$28 sps:$4 sm:$0xff]   ;;  %v5234_v28 = vld [vmem:[%s7048_s7 + $0x658] ss:$28 sps:$4 sm:$0xff]   ;;  %v5237_v29 = vld [vmem:[%s7048_s7 + $0x660] ss:$28 sps:$4 sm:$0xff]  }
 0x380   :  { %3710 = vmatprep.mubr.bf16.mxu0 %v6501_v30  ;;  %3792 = vmatprep.mubr.bf16.mxu1 %v6501_v30  ;;  %v5239_v27 = vld [vmem:[%s7048_s7 + $0x664] ss:$28 sps:$4 sm:$0xff]  }
 0x381   :  { %3711 = vmatmul.mubr.bf16.vlgmr.msra.gmra.mrb[8].mxu0 %v6509_v33  ;;  %3793 = vmatmul.mubr.bf16.vlgmr.msra.gmra.mrb[16].mxu1 %v6509_v33 }
 0x382   :  { %3720 = vmatpush1.bf16.msra.mxu0 %v5156_v31  ;;  %3802 = vmatpush1.bf16.msra.mxu1 %v5159_v32  ;;  %v1974_v31 = vrot.slane %v6491_v12, %v6169_v7  ;;  %v5242_v32 = vld [vmem:[%s7048_s7 + $0x694] ss:$28 sps:$4 sm:$0xff]  }
 0x383   :  { %3751 = vmatprep.mubr.bf16.mxu0 %v6519_v36  ;;  %3833 = vmatprep.mubr.bf16.mxu1 %v6519_v36  ;;  %v5243_v12 = vld [vmem:[%s7048_s7 + $0x698] ss:$28 sps:$4 sm:$0xff]  }
 0x384   :  { %3721 = vmatprep.subr.bf16.mxu0 %v5164_v34  ;;  %3803 = vmatprep.subr.bf16.mxu1 %v5167_v35  ;;  %v5245_v34 = vld [vmem:[%s7048_s7 + $0x69c] ss:$28 sps:$4 sm:$0xff]   ;;  %v5240_v35 = vld [vmem:[%s7048_s7 + $0x690] ss:$28 sps:$4 sm:$0xff]  }
 0x386   :  { %3722 = vmatpush1.bf16.msra.mxu0 %v5162_v39  ;;  %3804 = vmatpush1.bf16.msra.mxu1 %v5165_v42  ;;  %v2219_v39 = vadd.f32 %v6499_v18, %v1974_v31  ;;  %v5248_v42 = vld [vmem:[%s7048_s7 + $0x6cc] ss:$28 sps:$4 sm:$0xff]   ;;  %v5310_v31 = vld [vmem:[%s7048_s7 + $0x600] ss:$28 sps:$4 sm:$0xff]  }
 0x387   :  { %3723 = vmatprep.subr.bf16.mxu0 %v5170_v43  ;;  %3805 = vmatprep.subr.bf16.mxu1 %v5173_v44  ;;  %v5251_v43 = vld [vmem:[%s7048_s7 + $0x6d4] ss:$28 sps:$4 sm:$0xff]   ;;  %v5246_v44 = vld [vmem:[%s7048_s7 + $0x6c8] ss:$28 sps:$4 sm:$0xff]  }
 0x388   :  { %v5249_v18 = vld [vmem:[%s7048_s7 + $0x6d0] ss:$28 sps:$4 sm:$0xff]  }
 0x38a   :  { %3724 = vmatpush1.bf16.msra.mxu0 %v5168_v45  ;;  %3806 = vmatpush1.bf16.msra.mxu1 %v5171_v46  ;;  %v2227_v45 = vmax.f32 %v2219_v39, 0.0  ;;  %v5254_v46 = vld [vmem:[%s7048_s7 + $0x14] ss:$28 sps:$4 sm:$0xff]  }
 0x38b   :  { %3725 = vmatprep.subr.bf16.mxu0 %v5176_v47  ;;  %3807 = vmatprep.subr.bf16.mxu1 %v5179_v48  ;;  %v5255_v47 = vld [vmem:[%s7048_s7 + $0x1d8] ss:$28 sps:$4 sm:$0xff]   ;;  %v5252_v48 = vld [vmem:[%s7048_s7 + $0x10] ss:$28 sps:$4 sm:$0xff]  }
 0x38c   :  { %v5312_v39 = vld [vmem:[%s7048_s7 + $0x2b0] ss:$28 sps:$4 sm:$0xff]  }
 0x38e   :  { %3726 = vmatpush1.bf16.msra.mxu0 %v5174_v49  ;;  %3808 = vmatpush1.bf16.msra.mxu1 %v5177_v50  ;;  %v6711_v49 = vpack.c.bf16 %v2227_v45, %v2227_v45  ;;  %v5256_v50 = vld [vmem:[%s7048_s7 + $0x18] ss:$28 sps:$4 sm:$0xff]   ;;  %v5321_v45 = vld [vmem:[%s7048_s7 + $0x4b0] ss:$28 sps:$4 sm:$0xff]  }
 0x38f   :  { %3727 = vmatprep.subr.bf16.mxu0 %v5182_v51  ;;  %3809 = vmatprep.subr.bf16.mxu1 %v5185_v52  ;;  %v5259_v51 = vld [vmem:[%s7048_s7 + $0x4c] ss:$28 sps:$4 sm:$0xff]  }
 0x390   :  { %v5260_v52 = vld [vmem:[%s7048_s7 + $0x210] ss:$28 sps:$4 sm:$0xff]  }
 0x392   :  { %3728 = vmatpush1.bf16.msra.mxu0 %v5180_v53  ;;  %3810 = vmatpush1.bf16.msra.mxu1 %v5183_v54  ;;  %v5257_v53 = vld [vmem:[%s7048_s7 + $0x48] ss:$28 sps:$4 sm:$0xff]   ;;  %v5261_v54 = vld [vmem:[%s7048_s7 + $0x50] ss:$28 sps:$4 sm:$0xff]  }
 0x393   :  { %3729 = vmatprep.subr.bf16.mxu0 %v5188_v55  ;;  %3811 = vmatprep.subr.bf16.mxu1 %v5191_v56  ;;  %v5264_v55 = vld [vmem:[%s7048_s7 + $0x84] ss:$28 sps:$4 sm:$0xff]  }
 0x394   :  { %v5265_v56 = vld [vmem:[%s7048_s7 + $0x248] ss:$28 sps:$4 sm:$0xff]  }
 0x396   :  { %3730 = vmatpush1.bf16.msra.mxu0 %v5186_v57  ;;  %3812 = vmatpush1.bf16.msra.mxu1 %v5189_v58  ;;  %v5262_v57 = vld [vmem:[%s7048_s7 + $0x80] ss:$28 sps:$4 sm:$0xff]  }
 0x397   :  { %3731 = vmatprep.subr.bf16.mxu0 %v5194_v59  ;;  %3813 = vmatprep.subr.bf16.mxu1 %v5197_v60  ;;  %v5269_v58 = vld [vmem:[%s7048_s7 + $0xbc] ss:$28 sps:$4 sm:$0xff]  }
 0x398   :  { %v5270_v59 = vld [vmem:[%s7048_s7 + $0x280] ss:$28 sps:$4 sm:$0xff]   ;;  %v5267_v60 = vld [vmem:[%s7048_s7 + $0xb8] ss:$28 sps:$4 sm:$0xff]  }
 0x39a   :  { %3732 = vmatpush1.bf16.msra.mxu0 %v5192_v61  ;;  %3814 = vmatpush1.bf16.msra.mxu1 %v5195_v62  ;;  %v5271_v61 = vld [vmem:[%s7048_s7 + $0xc0] ss:$28 sps:$4 sm:$0xff]   ;;  %v5274_v62 = vld [vmem:[%s7048_s7 + $0xf4] ss:$28 sps:$4 sm:$0xff]  }
 0x39b   :  { %3733 = vmatprep.subr.bf16.mxu0 %v5200_v63  ;;  %3815 = vmatprep.subr.bf16.mxu1 %v5203_v0  ;;  %v5275_v63 = vld [vmem:[%s7048_s7 + $0x2b8] ss:$28 sps:$4 sm:$0xff]   ;;  %v5272_v0 = vld [vmem:[%s7048_s7 + $0xf0] ss:$28 sps:$4 sm:$0xff]  }
 0x39e   :  { %3734 = vmatpush1.bf16.msra.mxu0 %v5198_v1  ;;  %3816 = vmatpush1.bf16.msra.mxu1 %v5201_v2  ;;  %v5276_v1 = vld [vmem:[%s7048_s7 + $0xf8] ss:$28 sps:$4 sm:$0xff]   ;;  %v5279_v2 = vld [vmem:[%s7048_s7 + $0x12c] ss:$28 sps:$4 sm:$0xff]  }
 0x39f   :  { %3735 = vmatprep.subr.bf16.mxu0 %v5206_v3  ;;  %3817 = vmatprep.subr.bf16.mxu1 %v5209_v4  ;;  %v5280_v3 = vld [vmem:[%s7048_s7 + $0x2f0] ss:$28 sps:$4 sm:$0xff]   ;;  %v5277_v4 = vld [vmem:[%s7048_s7 + $0x128] ss:$28 sps:$4 sm:$0xff]  }
 0x3a2   :  { %3736 = vmatpush1.bf16.msra.mxu0 %v5204_v5  ;;  %3818 = vmatpush1.bf16.msra.mxu1 %v5207_v6  ;;  %v5281_v5 = vld [vmem:[%s7048_s7 + $0x130] ss:$28 sps:$4 sm:$0xff]   ;;  %v5284_v6 = vld [vmem:[%s7048_s7 + $0x164] ss:$28 sps:$4 sm:$0xff]  }
 0x3a3   :  { %3737 = vmatprep.subr.bf16.mxu0 %v5212_v8  ;;  %3819 = vmatprep.subr.bf16.mxu1 %v5215_v9  ;;  %v5285_v8 = vld [vmem:[%s7048_s7 + $0x328] ss:$28 sps:$4 sm:$0xff]   ;;  %v5282_v9 = vld [vmem:[%s7048_s7 + $0x160] ss:$28 sps:$4 sm:$0xff]  }
 0x3a6   :  { %3738 = vmatpush1.bf16.msra.mxu0 %v5210_v10  ;;  %3820 = vmatpush1.bf16.msra.mxu1 %v5213_v11  ;;  %v5286_v10 = vld [vmem:[%s7048_s7 + $0x168] ss:$28 sps:$4 sm:$0xff]   ;;  %v5289_v11 = vld [vmem:[%s7048_s7 + $0x19c] ss:$28 sps:$4 sm:$0xff]  }
 0x3a7   :  { %3739 = vmatprep.subr.bf16.mxu0 %v5218_v13  ;;  %3821 = vmatprep.subr.bf16.mxu1 %v5221_v14  ;;  %v5290_v13 = vld [vmem:[%s7048_s7 + $0x360] ss:$28 sps:$4 sm:$0xff]   ;;  %v5287_v14 = vld [vmem:[%s7048_s7 + $0x198] ss:$28 sps:$4 sm:$0xff]  }
 0x3aa   :  { %3740 = vmatpush1.bf16.msra.mxu0 %v5216_v15  ;;  %3822 = vmatpush1.bf16.msra.mxu1 %v5219_v16  ;;  %v5291_v15 = vld [vmem:[%s7048_s7 + $0x1a0] ss:$28 sps:$4 sm:$0xff]   ;;  %v5294_v16 = vld [vmem:[%s7048_s7 + $0x1d4] ss:$28 sps:$4 sm:$0xff]  }
 0x3ab   :  { %3741 = vmatprep.subr.bf16.mxu0 %v5224_v19  ;;  %3823 = vmatprep.subr.bf16.mxu1 %v5227_v20  ;;  %v5295_v19 = vld [vmem:[%s7048_s7 + $0x558] ss:$28 sps:$4 sm:$0xff]   ;;  %v5292_v20 = vld [vmem:[%s7048_s7 + $0x1d0] ss:$28 sps:$4 sm:$0xff]  }
 0x3ae   :  { %3742 = vmatpush1.bf16.msra.mxu0 %v5222_v21  ;;  %3824 = vmatpush1.bf16.msra.mxu1 %v5225_v22  ;;  %v5296_v21 = vld [vmem:[%s7048_s7 + $0x398] ss:$28 sps:$4 sm:$0xff]   ;;  %v5299_v22 = vld [vmem:[%s7048_s7 + $0x20c] ss:$28 sps:$4 sm:$0xff]  }
 0x3af   :  { %3743 = vmatprep.subr.bf16.mxu0 %v5230_v17  ;;  %3825 = vmatprep.subr.bf16.mxu1 %v5233_v23  ;;  %v5300_v17 = vld [vmem:[%s7048_s7 + $0x590] ss:$28 sps:$4 sm:$0xff]   ;;  %v5297_v23 = vld [vmem:[%s7048_s7 + $0x208] ss:$28 sps:$4 sm:$0xff]  }
 0x3b2   :  { %3744 = vmatpush1.bf16.msra.mxu0 %v5228_v24  ;;  %3826 = vmatpush1.bf16.msra.mxu1 %v5231_v25  ;;  %v5301_v24 = vld [vmem:[%s7048_s7 + $0x3d0] ss:$28 sps:$4 sm:$0xff]   ;;  %v5304_v25 = vld [vmem:[%s7048_s7 + $0x244] ss:$28 sps:$4 sm:$0xff]  }
 0x3b3   :  { %3745 = vmatprep.subr.bf16.mxu0 %v5236_v26  ;;  %3827 = vmatprep.subr.bf16.mxu1 %v5239_v27  ;;  %v5305_v26 = vld [vmem:[%s7048_s7 + $0x5c8] ss:$28 sps:$4 sm:$0xff]   ;;  %v5302_v27 = vld [vmem:[%s7048_s7 + $0x240] ss:$28 sps:$4 sm:$0xff]  }
 0x3b6   :  { %3746 = vmatpush1.bf16.msra.mxu0 %v5234_v28  ;;  %3828 = vmatpush1.bf16.msra.mxu1 %v5237_v29  ;;  %v5306_v28 = vld [vmem:[%s7048_s7 + $0x408] ss:$28 sps:$4 sm:$0xff]   ;;  %v5309_v29 = vld [vmem:[%s7048_s7 + $0x27c] ss:$28 sps:$4 sm:$0xff]  }
 0x3b7   :  { %3747 = vmatprep.subr.bf16.mxu0 %v5242_v32  ;;  %3829 = vmatprep.subr.bf16.mxu1 %v5245_v34  ;;  %v5307_v32 = vld [vmem:[%s7048_s7 + $0x278] ss:$28 sps:$4 sm:$0xff]   ;;  %v5311_v34 = vld [vmem:[%s7048_s7 + $0x440] ss:$28 sps:$4 sm:$0xff]  }
 0x3ba   :  { %3748 = vmatpush1.bf16.msra.mxu0 %v5240_v35  ;;  %3830 = vmatpush1.bf16.msra.mxu1 %v5243_v12  ;;  %v5314_v35 = vld [vmem:[%s7048_s7 + $0x2b4] ss:$28 sps:$4 sm:$0xff]  }
 0x3bb   :  { %3749 = vmatprep.subr.bf16.mxu0 %v5248_v42  ;;  %3831 = vmatprep.subr.bf16.mxu1 %v5251_v43  ;;  %v5315_v12 = vld [vmem:[%s7048_s7 + $0x638] ss:$28 sps:$4 sm:$0xff]   ;;  %v5319_v43 = vld [vmem:[%s7048_s7 + $0x2ec] ss:$28 sps:$4 sm:$0xff]  }
 0x3bc   :  { %v5316_v42 = vld [vmem:[%s7048_s7 + $0x478] ss:$28 sps:$4 sm:$0xff]  }
 0x3be   :  { %3750 = vmatpush1.bf16.msra.mxu0 %v5246_v44  ;;  %3832 = vmatpush1.bf16.msra.mxu1 %v5249_v18  ;;  %v5320_v44 = vld [vmem:[%s7048_s7 + $0x670] ss:$28 sps:$4 sm:$0xff]   ;;  %v5317_v18 = vld [vmem:[%s7048_s7 + $0x2e8] ss:$28 sps:$4 sm:$0xff]  }
 0x3bf   :  { %3842 = vmatprep.subr.bf16.mxu0 %v5254_v46  ;;  %4595 = vmatprep.subr.bf16.mxu1 %v5255_v47  ;;  %v5324_v46 = vld [vmem:[%s7048_s7 + $0x324] ss:$28 sps:$4 sm:$0xff]  }
 0x3c0   :  { %v5325_v47 = vld [vmem:[%s7048_s7 + $0x6a8] ss:$28 sps:$4 sm:$0xff]  }
 0x3c1   :  { %3752 = vmatmul.mubr.bf16.vlgmr.msra.gmra.mrb[8].mxu0 %v6711_v49  ;;  %3834 = vmatmul.mubr.bf16.vlgmr.msra.gmra.mrb[16].mxu1 %v6711_v49 }
 0x3c2   :  { %3843 = vmatpush1.bf16.msra.mxu0 %v5252_v48  ;;  %3874 = vmatprep.mubr.bf16.mxu0 %v6501_v30  ;;  %v5322_v48 = vld [vmem:[%s7048_s7 + $0x320] ss:$28 sps:$4 sm:$0xff]  }
 0x3c3   :  { %4596 = vmatpush3.bf16.msra.mxu1 %v5256_v50  ;;  %3956 = vmatprep.mubr.bf16.mxu1 %v6501_v30  ;;  %v5266_v30 = vld [vmem:[%s7048_s7 + $0x88] ss:$28 sps:$4 sm:$0xff]  }
 0x3c4   :  { %3844 = vmatprep.subr.bf16.mxu0 %v5259_v51  ;;  %4597 = vmatprep.subr.bf16.mxu1 %v5260_v52  ;;  %v5326_v50 = vld [vmem:[%s7048_s7 + $0x4e8] ss:$28 sps:$4 sm:$0xff]   ;;  %v5329_v51 = vld [vmem:[%s7048_s7 + $0x35c] ss:$28 sps:$4 sm:$0xff]  }
 0x3c5   :  { %v5330_v52 = vld [vmem:[%s7048_s7 + $0x6e0] ss:$28 sps:$4 sm:$0xff]  }
 0x3c6   :  { %3845 = vmatpush1.bf16.msra.mxu0 %v5257_v53  ;;  %v5327_v53 = vld [vmem:[%s7048_s7 + $0x358] ss:$28 sps:$4 sm:$0xff]  }
 0x3c7   :  { %4598 = vmatpush3.bf16.msra.mxu1 %v5261_v54  ;;  %3846 = vmatprep.subr.bf16.mxu0 %v5264_v55  ;;  %v5331_v54 = vld [vmem:[%s7048_s7 + $0x520] ss:$28 sps:$4 sm:$0xff]   ;;  %v5334_v55 = vld [vmem:[%s7048_s7 + $0x394] ss:$28 sps:$4 sm:$0xff]  }
 0x3c8   :  { %4599 = vmatprep.subr.bf16.mxu1 %v5265_v56  ;;  %v5332_v56 = vld [vmem:[%s7048_s7 + $0x390] ss:$28 sps:$4 sm:$0xff]  }
 0x3ca   :  { %3847 = vmatpush1.bf16.msra.mxu0 %v5262_v57  ;;  %v5337_v57 = vld [vmem:[%s7048_s7 + $0x3cc] ss:$28 sps:$4 sm:$0xff]  }
 0x3cb   :  { %4600 = vmatpush3.bf16.msra.mxu1 %v5266_v30  ;;  %3848 = vmatprep.subr.bf16.mxu0 %v5269_v58  ;;  %v5335_v30 = vld [vmem:[%s7048_s7 + $0x3c8] ss:$28 sps:$4 sm:$0xff]  }
 0x3cc   :  { %4601 = vmatprep.subr.bf16.mxu1 %v5270_v59  ;;  %v5340_v58 = vld [vmem:[%s7048_s7 + $0x404] ss:$28 sps:$4 sm:$0xff]  }
 0x3cd   :  { %v5338_v59 = vld [vmem:[%s7048_s7 + $0x400] ss:$28 sps:$4 sm:$0xff]  }
 0x3ce   :  { %3849 = vmatpush1.bf16.msra.mxu0 %v5267_v60  ;;  %v5346_v60 = vld [vmem:[%s7048_s7 + $0x474] ss:$28 sps:$4 sm:$0xff]  }
 0x3cf   :  { %4602 = vmatpush3.bf16.msra.mxu1 %v5271_v61  ;;  %3850 = vmatprep.subr.bf16.mxu0 %v5274_v62  ;;  %v5344_v61 = vld [vmem:[%s7048_s7 + $0x470] ss:$28 sps:$4 sm:$0xff]  }
 0x3d0   :  { %4603 = vmatprep.subr.bf16.mxu1 %v5275_v63  ;;  %v5349_v62 = vld [vmem:[%s7048_s7 + $0x4ac] ss:$28 sps:$4 sm:$0xff]  }
 0x3d1   :  { %v5347_v63 = vld [vmem:[%s7048_s7 + $0x4a8] ss:$28 sps:$4 sm:$0xff]  }
 0x3d2   :  { %3851 = vmatpush1.bf16.msra.mxu0 %v5272_v0  ;;  %v5352_v0 = vld [vmem:[%s7048_s7 + $0x4e4] ss:$28 sps:$4 sm:$0xff]  }
 0x3d3   :  { %4604 = vmatpush3.bf16.msra.mxu1 %v5276_v1  ;;  %3852 = vmatprep.subr.bf16.mxu0 %v5279_v2  ;;  %v5350_v1 = vld [vmem:[%s7048_s7 + $0x4e0] ss:$28 sps:$4 sm:$0xff]  }
 0x3d4   :  { %4605 = vmatprep.subr.bf16.mxu1 %v5280_v3  ;;  %v5355_v2 = vld [vmem:[%s7048_s7 + $0x51c] ss:$28 sps:$4 sm:$0xff]  }
 0x3d5   :  { %v5353_v3 = vld [vmem:[%s7048_s7 + $0x518] ss:$28 sps:$4 sm:$0xff]  }
 0x3d6   :  { %3853 = vmatpush1.bf16.msra.mxu0 %v5277_v4  ;;  %v5358_v4 = vld [vmem:[%s7048_s7 + $0x554] ss:$28 sps:$4 sm:$0xff]  }
 0x3d7   :  { %4606 = vmatpush3.bf16.msra.mxu1 %v5281_v5  ;;  %3854 = vmatprep.subr.bf16.mxu0 %v5284_v6  ;;  %v5356_v5 = vld [vmem:[%s7048_s7 + $0x550] ss:$28 sps:$4 sm:$0xff]  }
 0x3d8   :  { %4607 = vmatprep.subr.bf16.mxu1 %v5285_v8  ;;  %v5361_v6 = vld [vmem:[%s7048_s7 + $0x58c] ss:$28 sps:$4 sm:$0xff]  }
 0x3d9   :  { %v5359_v8 = vld [vmem:[%s7048_s7 + $0x588] ss:$28 sps:$4 sm:$0xff]  }
 0x3da   :  { %3855 = vmatpush1.bf16.msra.mxu0 %v5282_v9  ;;  %v5364_v9 = vld [vmem:[%s7048_s7 + $0x5c4] ss:$28 sps:$4 sm:$0xff]  }
 0x3db   :  { %4608 = vmatpush3.bf16.msra.mxu1 %v5286_v10  ;;  %3856 = vmatprep.subr.bf16.mxu0 %v5289_v11  ;;  %v5362_v10 = vld [vmem:[%s7048_s7 + $0x5c0] ss:$28 sps:$4 sm:$0xff]  }
 0x3dc   :  { %4609 = vmatprep.subr.bf16.mxu1 %v5290_v13  ;;  %v5367_v11 = vld [vmem:[%s7048_s7 + $0x5fc] ss:$28 sps:$4 sm:$0xff]  }
 0x3dd   :  { %v5365_v13 = vld [vmem:[%s7048_s7 + $0x5f8] ss:$28 sps:$4 sm:$0xff]  }
 0x3de   :  { %3857 = vmatpush1.bf16.msra.mxu0 %v5287_v14  ;;  %v5370_v14 = vld [vmem:[%s7048_s7 + $0x634] ss:$28 sps:$4 sm:$0xff]  }
 0x3df   :  { %4610 = vmatpush3.bf16.msra.mxu1 %v5291_v15  ;;  %3858 = vmatprep.subr.bf16.mxu0 %v5294_v16  ;;  %v5368_v15 = vld [vmem:[%s7048_s7 + $0x630] ss:$28 sps:$4 sm:$0xff]  }
 0x3e0   :  { %4617 = vmatprep.subr.bf16.mxu1 %v5295_v19  ;;  %v5373_v16 = vld [vmem:[%s7048_s7 + $0x66c] ss:$28 sps:$4 sm:$0xff]  }
 0x3e1   :  { %v5371_v19 = vld [vmem:[%s7048_s7 + $0x668] ss:$28 sps:$4 sm:$0xff]  }
 0x3e2   :  { %3957 = vmatmul.mubr.bf16.vlgmr.msra.gmra.mrb[20].mxu1 %v6509_v33  ;;  %3859 = vmatpush1.bf16.msra.mxu0 %v5292_v20  ;;  %v5376_v20 = vld [vmem:[%s7048_s7 + $0x6a4] ss:$28 sps:$4 sm:$0xff]  }
 0x3e3   :  { %4618 = vmatpush3.bf16.msra.mxu1 %v5296_v21  ;;  %3996 = vmatprep.mubr.bf16.mxu1 %v6519_v36  ;;  %v5374_v21 = vld [vmem:[%s7048_s7 + $0x6a0] ss:$28 sps:$4 sm:$0xff]  }
 0x3e4   :  { %3860 = vmatprep.subr.bf16.mxu0 %v5299_v22  ;;  %4619 = vmatprep.subr.bf16.mxu1 %v5300_v17  ;;  %v5379_v22 = vld [vmem:[%s7048_s7 + $0x6dc] ss:$28 sps:$4 sm:$0xff]  }
 0x3e5   :  { %v5377_v17 = vld [vmem:[%s7048_s7 + $0x6d8] ss:$28 sps:$4 sm:$0xff]  }
 0x3e6   :  { %3861 = vmatpush1.bf16.msra.mxu0 %v5297_v23  ;;  %v7005_v23 = vld [vmem:[%s7051_s8] sm:$0x7f] }
 0x3e7   :  { %4620 = vmatpush3.bf16.msra.mxu1 %v5301_v24  ;;  %3862 = vmatprep.subr.bf16.mxu0 %v5304_v25  ;;  %v2494_v24 = vrot.slane %v7005_v23, %v6127_v38  ;;  %v2502_v25 = vrot.slane %v7005_v23, %v6169_v7 }
 0x3e8   :  { %4621 = vmatprep.subr.bf16.mxu1 %v5305_v26  ;;  %v2498_v26 = vrot.slane %v7005_v23, %v6133_v40 }
 0x3ea   :  { %3863 = vmatpush1.bf16.msra.mxu0 %v5302_v27  ;;  %v2506_v27 = vrot.slane %v7005_v23, %v6136_v41 }
 0x3eb   :  { %4622 = vmatpush3.bf16.msra.mxu1 %v5306_v28  ;;  %3864 = vmatprep.subr.bf16.mxu0 %v5309_v29 }
 0x3ec   :  { %4623 = vmatprep.subr.bf16.mxu1 %v5310_v31 }
 0x3ee   :  { %3865 = vmatpush1.bf16.msra.mxu0 %v5307_v32 }
 0x3ef   :  { %4624 = vmatpush3.bf16.msra.mxu1 %v5311_v34  ;;  %3866 = vmatprep.subr.bf16.mxu0 %v5314_v35 }
 0x3f0   :  { %4625 = vmatprep.subr.bf16.mxu1 %v5315_v12 }
 0x3f2   :  { %3867 = vmatpush1.bf16.msra.mxu0 %v5312_v39 }
 0x3f3   :  { %4626 = vmatpush3.bf16.msra.mxu1 %v5316_v42  ;;  %3868 = vmatprep.subr.bf16.mxu0 %v5319_v43 }
 0x3f4   :  { %4627 = vmatprep.subr.bf16.mxu1 %v5320_v44 }
 0x3f6   :  { %3869 = vmatpush1.bf16.msra.mxu0 %v5317_v18 }
 0x3f7   :  { %4628 = vmatpush3.bf16.msra.mxu1 %v5321_v45  ;;  %3870 = vmatprep.subr.bf16.mxu0 %v5324_v46 }
 0x3f8   :  { %4629 = vmatprep.subr.bf16.mxu1 %v5325_v47 }
 0x3fa   :  { %3871 = vmatpush1.bf16.msra.mxu0 %v5322_v48 }
 0x3fb   :  { %4630 = vmatpush3.bf16.msra.mxu1 %v5326_v50  ;;  %3872 = vmatprep.subr.bf16.mxu0 %v5329_v51 }
 0x3fc   :  { %4631 = vmatprep.subr.bf16.mxu1 %v5330_v52 }
 0x3fe   :  { %3873 = vmatpush1.bf16.msra.mxu0 %v5327_v53 }
 0x3ff   :  { %4632 = vmatpush3.bf16.msra.mxu1 %v5331_v54  ;;  %3883 = vmatprep.subr.bf16.mxu0 %v5334_v55 }
 0x401   :  { %3875 = vmatmul.mubr.bf16.vlgmr.msra.gmra.mrb[12].mxu0 %v6509_v33  ;;  %v5343_v33 = vld [vmem:[%s7048_s7 + $0x43c] ss:$28 sps:$4 sm:$0xff]  }
 0x402   :  { %3997 = vmatmul.mubr.bf16.vlgmr.msra.gmra.mrb[24].mxu1 %v6711_v49  ;;  %3884 = vmatpush1.bf16.msra.mxu0 %v5332_v56 }
 0x403   :  { %3915 = vmatprep.mubr.bf16.mxu0 %v6519_v36  ;;  %3885 = vmatprep.subr.bf16.mxu0 %v5337_v57  ;;  %v5341_v36 = vld [vmem:[%s7048_s7 + $0x438] ss:$28 sps:$4 sm:$0xff]  }
 0x406   :  { %3886 = vmatpush1.bf16.msra.mxu0 %v5335_v30 }
 0x407   :  { %3887 = vmatprep.subr.bf16.mxu0 %v5340_v58 }
 0x40a   :  { %3888 = vmatpush1.bf16.msra.mxu0 %v5338_v59 }
 0x40b   :  { %3889 = vmatprep.subr.bf16.mxu0 %v5343_v33 }
 0x40e   :  { %3890 = vmatpush1.bf16.msra.mxu0 %v5341_v36 }
 0x40f   :  { %3891 = vmatprep.subr.bf16.mxu0 %v5346_v60 }
 0x412   :  { %3892 = vmatpush1.bf16.msra.mxu0 %v5344_v61 }
 0x413   :  { %3893 = vmatprep.subr.bf16.mxu0 %v5349_v62 }
 0x416   :  { %3894 = vmatpush1.bf16.msra.mxu0 %v5347_v63 }
 0x417   :  { %3895 = vmatprep.subr.bf16.mxu0 %v5352_v0 }
 0x41a   :  { %3896 = vmatpush1.bf16.msra.mxu0 %v5350_v1 }
 0x41b   :  { %3897 = vmatprep.subr.bf16.mxu0 %v5355_v2 }
 0x41e   :  { %3898 = vmatpush1.bf16.msra.mxu0 %v5353_v3  ;;  %v2517_v3 = vsub.s32 6, %v6124_v37 }
 0x41f   :  { %3899 = vmatprep.subr.bf16.mxu0 %v5358_v4 }
 0x420   :  { %v2518_v4 = vrot.slane %v7005_v23, %v2517_v3 }
 0x422   :  { %3900 = vmatpush1.bf16.msra.mxu0 %v5356_v5 }
 0x423   :  { %3901 = vmatprep.subr.bf16.mxu0 %v5361_v6 }
 0x426   :  { %3902 = vmatpush1.bf16.msra.mxu0 %v5359_v8 }
 0x427   :  { %3903 = vmatprep.subr.bf16.mxu0 %v5364_v9 }
 0x42a   :  { %3904 = vmatpush1.bf16.msra.mxu0 %v5362_v10 }
 0x42b   :  { %3905 = vmatprep.subr.bf16.mxu0 %v5367_v11 }
 0x42e   :  { %3906 = vmatpush1.bf16.msra.mxu0 %v5365_v13 }
 0x42f   :  { %3907 = vmatprep.subr.bf16.mxu0 %v5370_v14 }
 0x432   :  { %3908 = vmatpush1.bf16.msra.mxu0 %v5368_v15 }
 0x433   :  { %3909 = vmatprep.subr.bf16.mxu0 %v5373_v16 }
 0x436   :  { %3910 = vmatpush1.bf16.msra.mxu0 %v5371_v19 }
 0x437   :  { %3911 = vmatprep.subr.bf16.mxu0 %v5376_v20 }
 0x43a   :  { %3912 = vmatpush1.bf16.msra.mxu0 %v5374_v21 }
 0x43b   :  { %3913 = vmatprep.subr.bf16.mxu0 %v5379_v22  ;;  %v2509_v22 = vsub.s32 4, %v6124_v37 }
 0x43e   :  { %3914 = vmatpush1.bf16.msra.mxu0 %v5377_v17  ;;  %v2513_v17 = vsub.s32 5, %v6124_v37 }
 0x441   :  { %3916 = vmatmul.mubr.bf16.vlgmr.msra.gmra.mrb[12].mxu0 %v6711_v49 }
 0x494   :  { %v3753_v28 = vpop.f32.mrb[8].mxu0  ;;  %v3835_v29 = vpop.f32.mrb[16].mxu1 }
 0x495   :  { %v4643_v49 = vadd.f32 %v3753_v28, %v2494_v24  ;;  %v4645_v31 = vadd.f32 %v3835_v29, %v2502_v25  ;;  %v3755_v32 = vpop.f32.mrb[9].mxu0  ;;  %v3837_v34 = vpop.f32.mrb[17].mxu1  ;;  %v2510_v24 = vrot.slane %v7005_v23, %v2509_v22  ;;  %v2514_v25 = vrot.slane %v7005_v23, %v2513_v17 }
 0x496   :  { %v4644_v35 = vadd.f32 %v3755_v32, %v2498_v26  ;;  %v4646_v12 = vadd.f32 %v3837_v34, %v2506_v27  ;;  %v3757_v39 = vpop.f32.mrb[10].mxu0  ;;  %v3839_v42 = vpop.f32.mrb[18].mxu1 }
 0x497   :  { %v4004_v38 = vsub.f32 0.0, %v4643_v49  ;;  %v4006_v43 = vsub.f32 0.0, %v4645_v31  ;;  %v3758_v44 = vpop.f32.mrb[11].mxu0  ;;  %v3840_v7 = vpop.f32.mrb[19].mxu1 }
 0x498   :  { %v4005_v18 = vsub.f32 0.0, %v4644_v35  ;;  %v4007_v45 = vsub.f32 0.0, %v4646_v12 }
 0x499   :  { %v4011_v40 = vmin.f32 %v4004_v38, 30.0  ;;  %v4013_v46 = vmin.f32 %v4006_v43, 30.0 }
 0x49a   :  { %v4012_v47 = vmin.f32 %v4005_v18, 30.0  ;;  %v4014_v41 = vmin.f32 %v4007_v45, 30.0 }
 0x49b   :  { %v4018_v48 = vmul.f32 1.442695, %v4011_v40  ;;  %v4022_v50 = vmul.f32 1.442695, %v4013_v46 }
 0x49c   :  { %v4020_v51 = vmul.f32 1.442695, %v4012_v47  ;;  %v4024_v52 = vmul.f32 1.442695, %v4014_v41 }
 0x49d   :  { %5380 = vpow2.f32 %v4018_v48 }
 0x49e   :  { %5382 = vpow2.f32 %v4022_v50 }
 0x49f   :  { %5384 = vpow2.f32 %v4020_v51 }
 0x4a0   :  { %5386 = vpow2.f32 %v4024_v52 }
 0x4a7   :  { %v5381_v53 = vpop.eup %5380 }
 0x4a8   :  { %v5383_v54 = vpop.eup %5382  ;;  %v4032_v55 = vadd.f32 1.0, %v5381_v53 }
 0x4a9   :  { %v5385_v56 = vpop.eup %5384  ;;  %v4034_v57 = vadd.f32 1.0, %v5383_v54 }
 0x4aa   :  { %v5387_v30 = vpop.eup %5386  ;;  %5388 = vrcp.f32 %v4032_v55  ;;  %v4033_v58 = vadd.f32 1.0, %v5385_v56 }
 0x4ab   :  { %5390 = vrcp.f32 %v4034_v57  ;;  %v4035_v59 = vadd.f32 1.0, %v5387_v30 }
 0x4ac   :  { %5392 = vrcp.f32 %v4033_v58 }
 0x4ad   :  { %5394 = vrcp.f32 %v4035_v59 }
 0x4b4   :  { %v5389_v33 = vpop.eup %5388 }
 0x4b5   :  { %v5391_v36 = vpop.eup %5390  ;;  %4053 = vst [vmem:[%s7052_s9] sm:$0xff] %v5389_v33  ;;  %v4611_v60 = vpop.f32.mrb[20].mxu1 }
 0x4b6   :  { %v5393_v61 = vpop.eup %5392  ;;  %4055 = vst [vmem:[%s7052_s9 + $0x10] sm:$0xff] %v5391_v36  ;;  %v4612_v62 = vpop.f32.mrb[21].mxu1 }
 0x4b7   :  { %v5395_v63 = vpop.eup %5394  ;;  %4054 = vst [vmem:[%s7052_s9 + $0x8] sm:$0xff] %v5393_v61  ;;  %v4613_v0 = vadd.f32 %v4612_v62, %v4611_v60  ;;  %v4614_v1 = vpop.f32.mrb[22].mxu1 }
 0x4b8   :  { %4056 = vst [vmem:[%s7052_s9 + $0x18] sm:$0xff] %v5395_v63  ;;  %v4615_v2 = vpop.f32.mrb[23].mxu1 }
 0x4b9   :  { %v3959_v8 = vadd.f32 %v4613_v0, %v2518_v4 }
 0x4d5   :  { %v4633_v5 = vpop.f32.mrb[24].mxu1 }
 0x4d6   :  { %v4634_v6 = vpop.f32.mrb[25].mxu1 }
 0x4d7   :  { %v4635_v9 = vadd.f32 %v4634_v6, %v4633_v5  ;;  %v4636_v10 = vpop.f32.mrb[26].mxu1 }
 0x4d8   :  { %v4637_v11 = vpop.f32.mrb[27].mxu1 }
 0x4d9   :  { %v3999_v13 = vadd.f32 %v4635_v9, %v3959_v8 }
 0x4db   :  { %v4010_v14 = vsub.f32 0.0, %v3999_v13 }
 0x4dd   :  { %v4017_v15 = vmin.f32 %v4010_v14, 30.0 }
 0x4df   :  { %v4030_v16 = vmul.f32 1.442695, %v4017_v15 }
 0x4e1   :  { %5396 = vpow2.f32 %v4030_v16 }
 0x4eb   :  { %v5397_v19 = vpop.eup %5396 }
 0x4ec   :  { %v4038_v20 = vadd.f32 1.0, %v5397_v19 }
 0x4ee   :  { %5398 = vrcp.f32 %v4038_v20 }
 0x4f8   :  { %v5399_v21 = vpop.eup %5398 }
 0x4f9   :  { %4059 = vst.msk [vmem:[%s7052_s9 + $0x30] sm:$0xff] %vm1245_vm0, %v5399_v21 }
 0x514   :  { %v3917_v26 = vpop.f32.mrb[12].mxu0 }
 0x515   :  { %v4647_v27 = vadd.f32 %v3917_v26, %v2510_v24  ;;  %v3919_v28 = vpop.f32.mrb[13].mxu0 }
 0x516   :  { %v4648_v29 = vadd.f32 %v3919_v28, %v2514_v25  ;;  %v3921_v49 = vpop.f32.mrb[14].mxu0 }
 0x517   :  { %v4008_v31 = vsub.f32 0.0, %v4647_v27  ;;  %v3922_v32 = vpop.f32.mrb[15].mxu0 }
 0x518   :  { %v4009_v34 = vsub.f32 0.0, %v4648_v29 }
 0x519   :  { %v4015_v35 = vmin.f32 %v4008_v31, 30.0 }
 0x51a   :  { %v4016_v12 = vmin.f32 %v4009_v34, 30.0 }
 0x51b   :  { %v4026_v39 = vmul.f32 1.442695, %v4015_v35 }
 0x51c   :  { %v4028_v42 = vmul.f32 1.442695, %v4016_v12 }
 0x51d   :  { %5400 = vpow2.f32 %v4026_v39 }
 0x51e   :  { %5402 = vpow2.f32 %v4028_v42 }
 0x527   :  { %v5401_v38 = vpop.eup %5400 }
 0x528   :  { %v5403_v37 = vpop.eup %5402  ;;  %v4036_v43 = vadd.f32 1.0, %v5401_v38 }
 0x529   :  { %v4037_v44 = vadd.f32 1.0, %v5403_v37 }
 0x52a   :  { %5404 = vrcp.f32 %v4036_v43 }
 0x52b   :  { %5406 = vrcp.f32 %v4037_v44 }
 0x534   :  { %v5405_v23 = vpop.eup %5404 }
 0x535   :  { %v5407_v7 = vpop.eup %5406  ;;  %4057 = vst [vmem:[%s7052_s9 + $0x20] sm:$0xff] %v5405_v23 }
 0x536   :  { %4058 = vst [vmem:[%s7052_s9 + $0x28] sm:$0xff] %v5407_v7 }

// kernel: autoencoder_forward.1
= control target key start
LH: loop header
LB: loop body
LE: loop exit
PB: predicated region body
PF: predicated region fallthrough
CT: control target
= control target key end

     0   :  { %vm1245_vm0 = vcmask 130048   ;;  %s7043_s1 = inlined_call_operand.vmem [shape: bf16[784,512], index: 1, kind: input, shape index: {}]   ;;  %s7044_s0 = inlined_call_operand.vmem [shape: f32[8,784], index: 0, kind: input, shape index: {}]   ;;  %s7045_s3 = inlined_call_operand.vmem [shape: bf16[512,128], index: 3, kind: input, shape index: {}]   ;;  %s7046_s2 = inlined_call_operand.vmem [shape: f32[1,512], index: 2, kind: input, shape index: {}]   ;;  %s7047_s5 = inlined_call_operand.vmem [shape: bf16[128,512], index: 5, kind: input, shape index: {}]   ;;  %s7048_s7 = inlined_call_operand.vmem [shape: bf16[512,784], index: 7, kind: input, shape index: {}]   ;;  %s7049_s4 = inlined_call_operand.vmem [shape: f32[1,128], index: 4, kind: input, shape index: {}]   ;;  %s7050_s6 = inlined_call_operand.vmem [shape: f32[1,512], index: 6, kind: input, shape index: {}]   ;;  %s7051_s8 = inlined_call_operand.vmem [shape: f32[1,784], index: 8, kind: input, shape index: {}]   ;;  %s7052_s9 = inlined_call_operand.vmem [shape: f32[8,784], index: 9, kind: output, shape index: {}]  }
   0x1   :  { %v4686_v0 = vld [vmem:[%s7043_s1 + $0x4] ss:$16 sps:$4 sm:$0xff]   ;;  %v4688_v1 = vld [vmem:[%s7043_s1 + $0xc] ss:$16 sps:$4 sm:$0xff]   ;;  %v4690_v2 = vld [vmem:[%s7043_s1] ss:$16 sps:$4 sm:$0xff]  }
   0x2   :  { %1249 = vmatprep.subr.bf16.mxu0 %v4686_v0  ;;  %v4691_v3 = vld [vmem:[%s7043_s1 + $0x8] ss:$16 sps:$4 sm:$0xff]   ;;  %1413 = vmatprep.subr.bf16.mxu1 %v4688_v1  ;;  %v4692_v4 = vld [vmem:[%s7043_s1 + $0x24] ss:$16 sps:$4 sm:$0xff]   ;;  %v4694_v5 = vld [vmem:[%s7043_s1 + $0x2c] ss:$16 sps:$4 sm:$0xff]  }
   0x3   :  { %1250 = vmatpush1.bf16.msra.mxu0 %v4690_v2  ;;  %1414 = vmatpush1.bf16.msra.mxu1 %v4691_v3  ;;  %v4696_v6 = vld [vmem:[%s7043_s1 + $0x20] ss:$16 sps:$4 sm:$0xff]   ;;  %v4697_v7 = vld [vmem:[%s7043_s1 + $0x28] ss:$16 sps:$4 sm:$0xff]   ;;  %v4698_v8 = vld [vmem:[%s7043_s1 + $0x44] ss:$16 sps:$4 sm:$0xff]  }
   0x4   :  { %1251 = vmatprep.subr.bf16.mxu0 %v4692_v4  ;;  %1415 = vmatprep.subr.bf16.mxu1 %v4694_v5  ;;  %v4700_v9 = vld [vmem:[%s7043_s1 + $0x4c] ss:$16 sps:$4 sm:$0xff]   ;;  %v4702_v10 = vld [vmem:[%s7043_s1 + $0x40] ss:$16 sps:$4 sm:$0xff]   ;;  %v4703_v11 = vld [vmem:[%s7043_s1 + $0x48] ss:$16 sps:$4 sm:$0xff]  }
   0x5   :  { %v4704_v12 = vld [vmem:[%s7043_s1 + $0x64] ss:$16 sps:$4 sm:$0xff]   ;;  %v4706_v13 = vld [vmem:[%s7043_s1 + $0x6c] ss:$16 sps:$4 sm:$0xff]   ;;  %v4708_v14 = vld [vmem:[%s7043_s1 + $0x60] ss:$16 sps:$4 sm:$0xff]  }
   0x6   :  { %v4709_v15 = vld [vmem:[%s7043_s1 + $0x68] ss:$16 sps:$4 sm:$0xff]   ;;  %v4710_v16 = vld [vmem:[%s7043_s1 + $0x84] ss:$16 sps:$4 sm:$0xff]   ;;  %v4712_v17 = vld [vmem:[%s7043_s1 + $0x8c] ss:$16 sps:$4 sm:$0xff]  }
   0x7   :  { %1252 = vmatpush1.bf16.msra.mxu0 %v4696_v6  ;;  %1416 = vmatpush1.bf16.msra.mxu1 %v4697_v7  ;;  %v4714_v18 = vld [vmem:[%s7043_s1 + $0x80] ss:$16 sps:$4 sm:$0xff]   ;;  %v4715_v19 = vld [vmem:[%s7043_s1 + $0x88] ss:$16 sps:$4 sm:$0xff]   ;;  %v4716_v20 = vld [vmem:[%s7043_s1 + $0xa4] ss:$16 sps:$4 sm:$0xff]  }
   0x8   :  { %1253 = vmatprep.subr.bf16.mxu0 %v4698_v8  ;;  %1417 = vmatprep.subr.bf16.mxu1 %v4700_v9  ;;  %v4718_v21 = vld [vmem:[%s7043_s1 + $0xac] ss:$16 sps:$4 sm:$0xff]   ;;  %v4720_v22 = vld [vmem:[%s7043_s1 + $0xa0] ss:$16 sps:$4 sm:$0xff]   ;;  %v4721_v23 = vld [vmem:[%s7043_s1 + $0xa8] ss:$16 sps:$4 sm:$0xff]  }
   0x9   :  { %v4722_v24 = vld [vmem:[%s7043_s1 + $0xc4] ss:$16 sps:$4 sm:$0xff]   ;;  %v4724_v25 = vld [vmem:[%s7043_s1 + $0xcc] ss:$16 sps:$4 sm:$0xff]   ;;  %v4726_v26 = vld [vmem:[%s7043_s1 + $0xc0] ss:$16 sps:$4 sm:$0xff]  }
   0xa   :  { %v4727_v27 = vld [vmem:[%s7043_s1 + $0xc8] ss:$16 sps:$4 sm:$0xff]   ;;  %v4728_v28 = vld [vmem:[%s7043_s1 + $0xe4] ss:$16 sps:$4 sm:$0xff]   ;;  %v4730_v29 = vld [vmem:[%s7043_s1 + $0xec] ss:$16 sps:$4 sm:$0xff]  }
   0xb   :  { %1254 = vmatpush1.bf16.msra.mxu0 %v4702_v10  ;;  %1418 = vmatpush1.bf16.msra.mxu1 %v4703_v11  ;;  %v4732_v30 = vld [vmem:[%s7043_s1 + $0xe0] ss:$16 sps:$4 sm:$0xff]   ;;  %v4733_v31 = vld [vmem:[%s7043_s1 + $0xe8] ss:$16 sps:$4 sm:$0xff]   ;;  %v4734_v32 = vld [vmem:[%s7043_s1 + $0x104] ss:$16 sps:$4 sm:$0xff]  }
   0xc   :  { %1255 = vmatprep.subr.bf16.mxu0 %v4704_v12  ;;  %1419 = vmatprep.subr.bf16.mxu1 %v4706_v13  ;;  %v4736_v33 = vld [vmem:[%s7043_s1 + $0x10c] ss:$16 sps:$4 sm:$0xff]   ;;  %v4738_v34 = vld [vmem:[%s7043_s1 + $0x100] ss:$16 sps:$4 sm:$0xff]   ;;  %v4739_v35 = vld [vmem:[%s7043_s1 + $0x108] ss:$16 sps:$4 sm:$0xff]  }
   0xd   :  { %v4740_v36 = vld [vmem:[%s7043_s1 + $0x124] ss:$16 sps:$4 sm:$0xff]   ;;  %v4742_v37 = vld [vmem:[%s7043_s1 + $0x12c] ss:$16 sps:$4 sm:$0xff]   ;;  %v4744_v38 = vld [vmem:[%s7043_s1 + $0x120] ss:$16 sps:$4 sm:$0xff]  }
   0xe   :  { %v4745_v39 = vld [vmem:[%s7043_s1 + $0x128] ss:$16 sps:$4 sm:$0xff]   ;;  %v4746_v40 = vld [vmem:[%s7043_s1 + $0x144] ss:$16 sps:$4 sm:$0xff]   ;;  %v4748_v41 = vld [vmem:[%s7043_s1 + $0x14c] ss:$16 sps:$4 sm:$0xff]  }
   0xf   :  { %1256 = vmatpush1.bf16.msra.mxu0 %v4708_v14  ;;  %1420 = vmatpush1.bf16.msra.mxu1 %v4709_v15  ;;  %v4750_v42 = vld [vmem:[%s7043_s1 + $0x140] ss:$16 sps:$4 sm:$0xff]   ;;  %v4751_v43 = vld [vmem:[%s7043_s1 + $0x148] ss:$16 sps:$4 sm:$0xff]   ;;  %v4752_v44 = vld [vmem:[%s7043_s1 + $0x164] ss:$16 sps:$4 sm:$0xff]  }
  0x10   :  { %1257 = vmatprep.subr.bf16.mxu0 %v4710_v16  ;;  %1421 = vmatprep.subr.bf16.mxu1 %v4712_v17  ;;  %v4754_v45 = vld [vmem:[%s7043_s1 + $0x16c] ss:$16 sps:$4 sm:$0xff]   ;;  %v4756_v47 = vld [vmem:[%s7043_s1 + $0x160] ss:$16 sps:$4 sm:$0xff]   ;;  %v4757_v49 = vld [vmem:[%s7043_s1 + $0x168] ss:$16 sps:$4 sm:$0xff]  }
  0x11   :  { %v34_v46 = vld [vmem:[%s7044_s0 + $0x8] sm:$0xff]  ;;  %v4758_v50 = vld [vmem:[%s7043_s1 + $0x184] ss:$16 sps:$4 sm:$0xff]   ;;  %v4762_v52 = vld [vmem:[%s7043_s1 + $0x180] ss:$16 sps:$4 sm:$0xff]  }
  0x12   :  { %v41_v48 = vpack.c.bf16 %v34_v46, %v34_v46  ;;  %v4760_v51 = vld [vmem:[%s7043_s1 + $0x18c] ss:$16 sps:$4 sm:$0xff]   ;;  %v4763_v53 = vld [vmem:[%s7043_s1 + $0x188] ss:$16 sps:$4 sm:$0xff]   ;;  %v4764_v54 = vld [vmem:[%s7043_s1 + $0x1a4] ss:$16 sps:$4 sm:$0xff]  }
  0x13   :  { %1258 = vmatpush1.bf16.msra.mxu0 %v4714_v18  ;;  %1422 = vmatpush1.bf16.msra.mxu1 %v4715_v19  ;;  %v4766_v55 = vld [vmem:[%s7043_s1 + $0x1ac] ss:$16 sps:$4 sm:$0xff]   ;;  %v4768_v56 = vld [vmem:[%s7043_s1 + $0x1a0] ss:$16 sps:$4 sm:$0xff]   ;;  %v4769_v57 = vld [vmem:[%s7043_s1 + $0x1a8] ss:$16 sps:$4 sm:$0xff]  }
  0x14   :  { %1259 = vmatprep.subr.bf16.mxu0 %v4716_v20  ;;  %1423 = vmatprep.subr.bf16.mxu1 %v4718_v21  ;;  %v4770_v58 = vld [vmem:[%s7043_s1 + $0x1c4] ss:$16 sps:$4 sm:$0xff]   ;;  %v4772_v59 = vld [vmem:[%s7043_s1 + $0x1cc] ss:$16 sps:$4 sm:$0xff]   ;;  %v4774_v60 = vld [vmem:[%s7043_s1 + $0x1c0] ss:$16 sps:$4 sm:$0xff]  }
  0x15   :  { %1281 = vmatprep.mubr.bf16.mxu0 %v41_v48  ;;  %1445 = vmatprep.mubr.bf16.mxu1 %v41_v48  ;;  %v4775_v61 = vld [vmem:[%s7043_s1 + $0x1c8] ss:$16 sps:$4 sm:$0xff]   ;;  %v4776_v62 = vld [vmem:[%s7043_s1 + $0x1e4] ss:$16 sps:$4 sm:$0xff]   ;;  %v4778_v63 = vld [vmem:[%s7043_s1 + $0x1ec] ss:$16 sps:$4 sm:$0xff]  }
  0x16   :  { %v4780_v0 = vld [vmem:[%s7043_s1 + $0x1e0] ss:$16 sps:$4 sm:$0xff]   ;;  %v4781_v1 = vld [vmem:[%s7043_s1 + $0x1e8] ss:$16 sps:$4 sm:$0xff]   ;;  %v4784_v3 = vld [vmem:[%s7043_s1 + $0x204] ss:$16 sps:$4 sm:$0xff]  }
  0x17   :  { %1260 = vmatpush1.bf16.msra.mxu0 %v4720_v22  ;;  %1424 = vmatpush1.bf16.msra.mxu1 %v4721_v23  ;;  %v33_v2 = vld [vmem:[%s7044_s0] sm:$0xff]  ;;  %v4787_v4 = vld [vmem:[%s7043_s1 + $0x20c] ss:$16 sps:$4 sm:$0xff]   ;;  %v4785_v7 = vld [vmem:[%s7043_s1 + $0x208] ss:$16 sps:$4 sm:$0xff]  }
  0x18   :  { %1261 = vmatprep.subr.bf16.mxu0 %v4722_v24  ;;  %1425 = vmatprep.subr.bf16.mxu1 %v4724_v25  ;;  %v40_v5 = vpack.c.bf16 %v33_v2, %v33_v2  ;;  %v4782_v6 = vld [vmem:[%s7043_s1 + $0x200] ss:$16 sps:$4 sm:$0xff]   ;;  %v4790_v8 = vld [vmem:[%s7043_s1 + $0x224] ss:$16 sps:$4 sm:$0xff]   ;;  %v4793_v9 = vld [vmem:[%s7043_s1 + $0x22c] ss:$16 sps:$4 sm:$0xff]  }
  0x19   :  { %v4788_v10 = vld [vmem:[%s7043_s1 + $0x220] ss:$16 sps:$4 sm:$0xff]   ;;  %v4791_v11 = vld [vmem:[%s7043_s1 + $0x228] ss:$16 sps:$4 sm:$0xff]   ;;  %v4796_v12 = vld [vmem:[%s7043_s1 + $0x244] ss:$16 sps:$4 sm:$0xff]  }
  0x1a   :  { %v4799_v13 = vld [vmem:[%s7043_s1 + $0x24c] ss:$16 sps:$4 sm:$0xff]   ;;  %v4794_v14 = vld [vmem:[%s7043_s1 + $0x240] ss:$16 sps:$4 sm:$0xff]   ;;  %v4797_v15 = vld [vmem:[%s7043_s1 + $0x248] ss:$16 sps:$4 sm:$0xff]  }
  0x1b   :  { %1262 = vmatpush1.bf16.msra.mxu0 %v4726_v26  ;;  %1426 = vmatpush1.bf16.msra.mxu1 %v4727_v27  ;;  %v4802_v16 = vld [vmem:[%s7043_s1 + $0x264] ss:$16 sps:$4 sm:$0xff]   ;;  %v4805_v17 = vld [vmem:[%s7043_s1 + $0x26c] ss:$16 sps:$4 sm:$0xff]   ;;  %v4800_v18 = vld [vmem:[%s7043_s1 + $0x260] ss:$16 sps:$4 sm:$0xff]  }
  0x1c   :  { %1263 = vmatprep.subr.bf16.mxu0 %v4728_v28  ;;  %1427 = vmatprep.subr.bf16.mxu1 %v4730_v29  ;;  %v4803_v19 = vld [vmem:[%s7043_s1 + $0x268] ss:$16 sps:$4 sm:$0xff]   ;;  %v4808_v20 = vld [vmem:[%s7043_s1 + $0x284] ss:$16 sps:$4 sm:$0xff]   ;;  %v4811_v21 = vld [vmem:[%s7043_s1 + $0x28c] ss:$16 sps:$4 sm:$0xff]  }
  0x1d   :  { %v4806_v22 = vld [vmem:[%s7043_s1 + $0x280] ss:$16 sps:$4 sm:$0xff]   ;;  %v4809_v23 = vld [vmem:[%s7043_s1 + $0x288] ss:$16 sps:$4 sm:$0xff]   ;;  %v4814_v24 = vld [vmem:[%s7043_s1 + $0x2a4] ss:$16 sps:$4 sm:$0xff]  }
  0x1e   :  { %v4817_v25 = vld [vmem:[%s7043_s1 + $0x2ac] ss:$16 sps:$4 sm:$0xff]   ;;  %v4812_v26 = vld [vmem:[%s7043_s1 + $0x2a0] ss:$16 sps:$4 sm:$0xff]   ;;  %v4815_v27 = vld [vmem:[%s7043_s1 + $0x2a8] ss:$16 sps:$4 sm:$0xff]  }
  0x1f   :  { %1264 = vmatpush1.bf16.msra.mxu0 %v4732_v30  ;;  %1428 = vmatpush1.bf16.msra.mxu1 %v4733_v31  ;;  %v4820_v28 = vld [vmem:[%s7043_s1 + $0x2c4] ss:$16 sps:$4 sm:$0xff]   ;;  %v4823_v29 = vld [vmem:[%s7043_s1 + $0x2cc] ss:$16 sps:$4 sm:$0xff]   ;;  %v4818_v31 = vld [vmem:[%s7043_s1 + $0x2c0] ss:$16 sps:$4 sm:$0xff]  }
  0x20   :  { %1265 = vmatprep.subr.bf16.mxu0 %v4734_v32  ;;  %1429 = vmatprep.subr.bf16.mxu1 %v4736_v33  ;;  %v36_v30 = vld [vmem:[%s7044_s0 + $0x18] sm:$0xff]  ;;  %v4844_v46 = vld [vmem:[%s7043_s1 + $0x344] ss:$16 sps:$4 sm:$0xff]   ;;  %v4842_v48 = vld [vmem:[%s7043_s1 + $0x340] ss:$16 sps:$4 sm:$0xff]  }
  0x21   :  { %v43_v32 = vpack.c.bf16 %v36_v30, %v36_v30  ;;  %v4821_v33 = vld [vmem:[%s7043_s1 + $0x2c8] ss:$16 sps:$4 sm:$0xff]   ;;  %v4874_v2 = vld [vmem:[%s7043_s1 + $0x3e4] ss:$16 sps:$4 sm:$0xff]  }
  0x22   :  { %v4910_v30 = vld [vmem:[%s7043_s1 + $0x4a4] ss:$16 sps:$4 sm:$0xff]  }
  0x23   :  { %1266 = vmatpush1.bf16.msra.mxu0 %v4738_v34  ;;  %1430 = vmatpush1.bf16.msra.mxu1 %v4739_v35  ;;  %v4826_v34 = vld [vmem:[%s7043_s1 + $0x2e4] ss:$16 sps:$4 sm:$0xff]   ;;  %v4829_v35 = vld [vmem:[%s7043_s1 + $0x2ec] ss:$16 sps:$4 sm:$0xff]  }
  0x24   :  { %1267 = vmatprep.subr.bf16.mxu0 %v4740_v36  ;;  %1431 = vmatprep.subr.bf16.mxu1 %v4742_v37  ;;  %v4824_v36 = vld [vmem:[%s7043_s1 + $0x2e0] ss:$16 sps:$4 sm:$0xff]   ;;  %v4827_v37 = vld [vmem:[%s7043_s1 + $0x2e8] ss:$16 sps:$4 sm:$0xff]  }
  0x27   :  { %1268 = vmatpush1.bf16.msra.mxu0 %v4744_v38  ;;  %1432 = vmatpush1.bf16.msra.mxu1 %v4745_v39  ;;  %v4832_v38 = vld [vmem:[%s7043_s1 + $0x304] ss:$16 sps:$4 sm:$0xff]   ;;  %v4835_v39 = vld [vmem:[%s7043_s1 + $0x30c] ss:$16 sps:$4 sm:$0xff]  }
  0x28   :  { %1269 = vmatprep.subr.bf16.mxu0 %v4746_v40  ;;  %1433 = vmatprep.subr.bf16.mxu1 %v4748_v41  ;;  %v4830_v40 = vld [vmem:[%s7043_s1 + $0x300] ss:$16 sps:$4 sm:$0xff]   ;;  %v4833_v41 = vld [vmem:[%s7043_s1 + $0x308] ss:$16 sps:$4 sm:$0xff]  }
  0x2b   :  { %1270 = vmatpush1.bf16.msra.mxu0 %v4750_v42  ;;  %1434 = vmatpush1.bf16.msra.mxu1 %v4751_v43  ;;  %v4838_v42 = vld [vmem:[%s7043_s1 + $0x324] ss:$16 sps:$4 sm:$0xff]   ;;  %v4841_v43 = vld [vmem:[%s7043_s1 + $0x32c] ss:$16 sps:$4 sm:$0xff]  }
  0x2c   :  { %1271 = vmatprep.subr.bf16.mxu0 %v4752_v44  ;;  %1435 = vmatprep.subr.bf16.mxu1 %v4754_v45  ;;  %v4836_v44 = vld [vmem:[%s7043_s1 + $0x320] ss:$16 sps:$4 sm:$0xff]   ;;  %v4839_v45 = vld [vmem:[%s7043_s1 + $0x328] ss:$16 sps:$4 sm:$0xff]  }
  0x2f   :  { %1272 = vmatpush1.bf16.msra.mxu0 %v4756_v47  ;;  %1436 = vmatpush1.bf16.msra.mxu1 %v4757_v49  ;;  %v4847_v47 = vld [vmem:[%s7043_s1 + $0x34c] ss:$16 sps:$4 sm:$0xff]   ;;  %v4845_v49 = vld [vmem:[%s7043_s1 + $0x348] ss:$16 sps:$4 sm:$0xff]  }
  0x30   :  { %1273 = vmatprep.subr.bf16.mxu0 %v4758_v50  ;;  %1437 = vmatprep.subr.bf16.mxu1 %v4760_v51  ;;  %v4850_v50 = vld [vmem:[%s7043_s1 + $0x364] ss:$16 sps:$4 sm:$0xff]   ;;  %v4853_v51 = vld [vmem:[%s7043_s1 + $0x36c] ss:$16 sps:$4 sm:$0xff]  }
  0x33   :  { %1274 = vmatpush1.bf16.msra.mxu0 %v4762_v52  ;;  %1438 = vmatpush1.bf16.msra.mxu1 %v4763_v53  ;;  %v4848_v52 = vld [vmem:[%s7043_s1 + $0x360] ss:$16 sps:$4 sm:$0xff]   ;;  %v4851_v53 = vld [vmem:[%s7043_s1 + $0x368] ss:$16 sps:$4 sm:$0xff]  }
  0x34   :  { %1275 = vmatprep.subr.bf16.mxu0 %v4764_v54  ;;  %1439 = vmatprep.subr.bf16.mxu1 %v4766_v55  ;;  %v4856_v54 = vld [vmem:[%s7043_s1 + $0x384] ss:$16 sps:$4 sm:$0xff]   ;;  %v4859_v55 = vld [vmem:[%s7043_s1 + $0x38c] ss:$16 sps:$4 sm:$0xff]  }
  0x37   :  { %1276 = vmatpush1.bf16.msra.mxu0 %v4768_v56  ;;  %1440 = vmatpush1.bf16.msra.mxu1 %v4769_v57  ;;  %v4854_v56 = vld [vmem:[%s7043_s1 + $0x380] ss:$16 sps:$4 sm:$0xff]   ;;  %v4857_v57 = vld [vmem:[%s7043_s1 + $0x388] ss:$16 sps:$4 sm:$0xff]  }
  0x38   :  { %1277 = vmatprep.subr.bf16.mxu0 %v4770_v58  ;;  %1441 = vmatprep.subr.bf16.mxu1 %v4772_v59  ;;  %v4862_v58 = vld [vmem:[%s7043_s1 + $0x3a4] ss:$16 sps:$4 sm:$0xff]   ;;  %v4865_v59 = vld [vmem:[%s7043_s1 + $0x3ac] ss:$16 sps:$4 sm:$0xff]  }
  0x3b   :  { %1278 = vmatpush1.bf16.msra.mxu0 %v4774_v60  ;;  %1442 = vmatpush1.bf16.msra.mxu1 %v4775_v61  ;;  %v4860_v60 = vld [vmem:[%s7043_s1 + $0x3a0] ss:$16 sps:$4 sm:$0xff]   ;;  %v4863_v61 = vld [vmem:[%s7043_s1 + $0x3a8] ss:$16 sps:$4 sm:$0xff]  }
  0x3c   :  { %1279 = vmatprep.subr.bf16.mxu0 %v4776_v62  ;;  %1443 = vmatprep.subr.bf16.mxu1 %v4778_v63  ;;  %v4868_v62 = vld [vmem:[%s7043_s1 + $0x3c4] ss:$16 sps:$4 sm:$0xff]   ;;  %v4871_v63 = vld [vmem:[%s7043_s1 + $0x3cc] ss:$16 sps:$4 sm:$0xff]  }
  0x3f   :  { %1280 = vmatpush1.bf16.msra.mxu0 %v4780_v0  ;;  %1444 = vmatpush1.bf16.msra.mxu1 %v4781_v1  ;;  %v4866_v0 = vld [vmem:[%s7043_s1 + $0x3c0] ss:$16 sps:$4 sm:$0xff]   ;;  %v4869_v1 = vld [vmem:[%s7043_s1 + $0x3c8] ss:$16 sps:$4 sm:$0xff]  }
  0x40   :  { %1290 = vmatprep.subr.bf16.mxu0 %v4784_v3  ;;  %1454 = vmatprep.subr.bf16.mxu1 %v4787_v4  ;;  %v4877_v3 = vld [vmem:[%s7043_s1 + $0x3ec] ss:$16 sps:$4 sm:$0xff]   ;;  %v4872_v4 = vld [vmem:[%s7043_s1 + $0x3e0] ss:$16 sps:$4 sm:$0xff]  }
  0x42   :  { %1282 = vmatmul.mubr.bf16.vlgmr.msra.gmra.mrb[0].mxu0 %v40_v5  ;;  %1446 = vmatmul.mubr.bf16.vlgmr.msra.gmra.mrb[0].mxu1 %v40_v5  ;;  %v4875_v5 = vld [vmem:[%s7043_s1 + $0x3e8] ss:$16 sps:$4 sm:$0xff]  }
  0x43   :  { %1291 = vmatpush1.bf16.msra.mxu0 %v4782_v6  ;;  %1455 = vmatpush1.bf16.msra.mxu1 %v4785_v7  ;;  %v4880_v6 = vld [vmem:[%s7043_s1 + $0x404] ss:$16 sps:$4 sm:$0xff]  }
  0x44   :  { %1292 = vmatprep.subr.bf16.mxu0 %v4790_v8  ;;  %1456 = vmatprep.subr.bf16.mxu1 %v4793_v9  ;;  %v35_v7 = vld [vmem:[%s7044_s0 + $0x10] sm:$0xff]  ;;  %v4883_v8 = vld [vmem:[%s7043_s1 + $0x40c] ss:$16 sps:$4 sm:$0xff]  }
  0x45   :  { %1322 = vmatprep.mubr.bf16.mxu0 %v43_v32  ;;  %1486 = vmatprep.mubr.bf16.mxu1 %v43_v32  ;;  %v4878_v9 = vld [vmem:[%s7043_s1 + $0x400] ss:$16 sps:$4 sm:$0xff]  }
  0x46   :  { %v4908_v32 = vld [vmem:[%s7043_s1 + $0x4a0] ss:$16 sps:$4 sm:$0xff]  }
  0x47   :  { %1293 = vmatpush1.bf16.msra.mxu0 %v4788_v10  ;;  %1457 = vmatpush1.bf16.msra.mxu1 %v4791_v11  ;;  %v42_v10 = vpack.c.bf16 %v35_v7, %v35_v7  ;;  %v4881_v11 = vld [vmem:[%s7043_s1 + $0x408] ss:$16 sps:$4 sm:$0xff]   ;;  %v4973_v7 = vld [vmem:[%s7043_s1 + $0x5ec] ss:$16 sps:$4 sm:$0xff]  }
  0x48   :  { %1294 = vmatprep.subr.bf16.mxu0 %v4796_v12  ;;  %1458 = vmatprep.subr.bf16.mxu1 %v4799_v13  ;;  %v4886_v12 = vld [vmem:[%s7043_s1 + $0x424] ss:$16 sps:$4 sm:$0xff]   ;;  %v4889_v13 = vld [vmem:[%s7043_s1 + $0x42c] ss:$16 sps:$4 sm:$0xff]  }
  0x4b   :  { %1295 = vmatpush1.bf16.msra.mxu0 %v4794_v14  ;;  %1459 = vmatpush1.bf16.msra.mxu1 %v4797_v15  ;;  %v38_v14 = vld [vmem:[%s7044_s0 + $0x28] sm:$0xff] }
  0x4c   :  { %1296 = vmatprep.subr.bf16.mxu0 %v4802_v16  ;;  %1460 = vmatprep.subr.bf16.mxu1 %v4805_v17  ;;  %v45_v15 = vpack.c.bf16 %v38_v14, %v38_v14  ;;  %v4884_v16 = vld [vmem:[%s7043_s1 + $0x420] ss:$16 sps:$4 sm:$0xff]   ;;  %v4887_v17 = vld [vmem:[%s7043_s1 + $0x428] ss:$16 sps:$4 sm:$0xff]  }
  0x4d   :  { %v4974_v14 = vld [vmem:[%s7043_s1 + $0x600] ss:$16 sps:$4 sm:$0xff]  }
  0x4f   :  { %1297 = vmatpush1.bf16.msra.mxu0 %v4800_v18  ;;  %1461 = vmatpush1.bf16.msra.mxu1 %v4803_v19  ;;  %v4892_v18 = vld [vmem:[%s7043_s1 + $0x444] ss:$16 sps:$4 sm:$0xff]   ;;  %v4895_v19 = vld [vmem:[%s7043_s1 + $0x44c] ss:$16 sps:$4 sm:$0xff]  }
  0x50   :  { %1298 = vmatprep.subr.bf16.mxu0 %v4808_v20  ;;  %1462 = vmatprep.subr.bf16.mxu1 %v4811_v21  ;;  %v4890_v20 = vld [vmem:[%s7043_s1 + $0x440] ss:$16 sps:$4 sm:$0xff]   ;;  %v4893_v21 = vld [vmem:[%s7043_s1 + $0x448] ss:$16 sps:$4 sm:$0xff]  }
  0x53   :  { %1299 = vmatpush1.bf16.msra.mxu0 %v4806_v22  ;;  %1463 = vmatpush1.bf16.msra.mxu1 %v4809_v23  ;;  %v4898_v22 = vld [vmem:[%s7043_s1 + $0x464] ss:$16 sps:$4 sm:$0xff]   ;;  %v4901_v23 = vld [vmem:[%s7043_s1 + $0x46c] ss:$16 sps:$4 sm:$0xff]  }
  0x54   :  { %1300 = vmatprep.subr.bf16.mxu0 %v4814_v24  ;;  %1464 = vmatprep.subr.bf16.mxu1 %v4817_v25  ;;  %v4896_v24 = vld [vmem:[%s7043_s1 + $0x460] ss:$16 sps:$4 sm:$0xff]   ;;  %v4899_v25 = vld [vmem:[%s7043_s1 + $0x468] ss:$16 sps:$4 sm:$0xff]  }
  0x57   :  { %1301 = vmatpush1.bf16.msra.mxu0 %v4812_v26  ;;  %1465 = vmatpush1.bf16.msra.mxu1 %v4815_v27  ;;  %v4904_v26 = vld [vmem:[%s7043_s1 + $0x484] ss:$16 sps:$4 sm:$0xff]   ;;  %v4907_v27 = vld [vmem:[%s7043_s1 + $0x48c] ss:$16 sps:$4 sm:$0xff]  }
  0x58   :  { %1302 = vmatprep.subr.bf16.mxu0 %v4820_v28  ;;  %1466 = vmatprep.subr.bf16.mxu1 %v4823_v29  ;;  %v4902_v28 = vld [vmem:[%s7043_s1 + $0x480] ss:$16 sps:$4 sm:$0xff]   ;;  %v4905_v29 = vld [vmem:[%s7043_s1 + $0x488] ss:$16 sps:$4 sm:$0xff]  }
  0x5b   :  { %1303 = vmatpush1.bf16.msra.mxu0 %v4818_v31  ;;  %1467 = vmatpush1.bf16.msra.mxu1 %v4821_v33  ;;  %v4913_v31 = vld [vmem:[%s7043_s1 + $0x4ac] ss:$16 sps:$4 sm:$0xff]   ;;  %v4911_v33 = vld [vmem:[%s7043_s1 + $0x4a8] ss:$16 sps:$4 sm:$0xff]  }
  0x5c   :  { %1304 = vmatprep.subr.bf16.mxu0 %v4826_v34  ;;  %1468 = vmatprep.subr.bf16.mxu1 %v4829_v35  ;;  %v4916_v34 = vld [vmem:[%s7043_s1 + $0x4c4] ss:$16 sps:$4 sm:$0xff]   ;;  %v4919_v35 = vld [vmem:[%s7043_s1 + $0x4cc] ss:$16 sps:$4 sm:$0xff]  }
  0x5f   :  { %1305 = vmatpush1.bf16.msra.mxu0 %v4824_v36  ;;  %1469 = vmatpush1.bf16.msra.mxu1 %v4827_v37  ;;  %v4914_v36 = vld [vmem:[%s7043_s1 + $0x4c0] ss:$16 sps:$4 sm:$0xff]   ;;  %v4917_v37 = vld [vmem:[%s7043_s1 + $0x4c8] ss:$16 sps:$4 sm:$0xff]  }
  0x60   :  { %1306 = vmatprep.subr.bf16.mxu0 %v4832_v38  ;;  %1470 = vmatprep.subr.bf16.mxu1 %v4835_v39  ;;  %v4922_v38 = vld [vmem:[%s7043_s1 + $0x4e4] ss:$16 sps:$4 sm:$0xff]   ;;  %v4925_v39 = vld [vmem:[%s7043_s1 + $0x4ec] ss:$16 sps:$4 sm:$0xff]  }
  0x63   :  { %1307 = vmatpush1.bf16.msra.mxu0 %v4830_v40  ;;  %1471 = vmatpush1.bf16.msra.mxu1 %v4833_v41  ;;  %v4920_v40 = vld [vmem:[%s7043_s1 + $0x4e0] ss:$16 sps:$4 sm:$0xff]   ;;  %v4923_v41 = vld [vmem:[%s7043_s1 + $0x4e8] ss:$16 sps:$4 sm:$0xff]  }
  0x64   :  { %1308 = vmatprep.subr.bf16.mxu0 %v4838_v42  ;;  %1472 = vmatprep.subr.bf16.mxu1 %v4841_v43  ;;  %v4928_v42 = vld [vmem:[%s7043_s1 + $0x504] ss:$16 sps:$4 sm:$0xff]   ;;  %v4931_v43 = vld [vmem:[%s7043_s1 + $0x50c] ss:$16 sps:$4 sm:$0xff]  }
  0x67   :  { %1309 = vmatpush1.bf16.msra.mxu0 %v4836_v44  ;;  %1473 = vmatpush1.bf16.msra.mxu1 %v4839_v45  ;;  %v4926_v44 = vld [vmem:[%s7043_s1 + $0x500] ss:$16 sps:$4 sm:$0xff]   ;;  %v4929_v45 = vld [vmem:[%s7043_s1 + $0x508] ss:$16 sps:$4 sm:$0xff]  }
  0x68   :  { %1310 = vmatprep.subr.bf16.mxu0 %v4844_v46  ;;  %1474 = vmatprep.subr.bf16.mxu1 %v4847_v47  ;;  %v4934_v46 = vld [vmem:[%s7043_s1 + $0x524] ss:$16 sps:$4 sm:$0xff]   ;;  %v4937_v47 = vld [vmem:[%s7043_s1 + $0x52c] ss:$16 sps:$4 sm:$0xff]  }
  0x6b   :  { %1311 = vmatpush1.bf16.msra.mxu0 %v4842_v48  ;;  %1475 = vmatpush1.bf16.msra.mxu1 %v4845_v49  ;;  %v4932_v48 = vld [vmem:[%s7043_s1 + $0x520] ss:$16 sps:$4 sm:$0xff]   ;;  %v4935_v49 = vld [vmem:[%s7043_s1 + $0x528] ss:$16 sps:$4 sm:$0xff]  }
  0x6c   :  { %1312 = vmatprep.subr.bf16.mxu0 %v4850_v50  ;;  %1476 = vmatprep.subr.bf16.mxu1 %v4853_v51  ;;  %v4940_v50 = vld [vmem:[%s7043_s1 + $0x544] ss:$16 sps:$4 sm:$0xff]   ;;  %v4943_v51 = vld [vmem:[%s7043_s1 + $0x54c] ss:$16 sps:$4 sm:$0xff]  }
  0x6f   :  { %1313 = vmatpush1.bf16.msra.mxu0 %v4848_v52  ;;  %1477 = vmatpush1.bf16.msra.mxu1 %v4851_v53  ;;  %v4938_v52 = vld [vmem:[%s7043_s1 + $0x540] ss:$16 sps:$4 sm:$0xff]   ;;  %v4941_v53 = vld [vmem:[%s7043_s1 + $0x548] ss:$16 sps:$4 sm:$0xff]  }
  0x70   :  { %1314 = vmatprep.subr.bf16.mxu0 %v4856_v54  ;;  %1478 = vmatprep.subr.bf16.mxu1 %v4859_v55  ;;  %v4946_v54 = vld [vmem:[%s7043_s1 + $0x564] ss:$16 sps:$4 sm:$0xff]   ;;  %v4949_v55 = vld [vmem:[%s7043_s1 + $0x56c] ss:$16 sps:$4 sm:$0xff]  }
  0x73   :  { %1315 = vmatpush1.bf16.msra.mxu0 %v4854_v56  ;;  %1479 = vmatpush1.bf16.msra.mxu1 %v4857_v57  ;;  %v4944_v56 = vld [vmem:[%s7043_s1 + $0x560] ss:$16 sps:$4 sm:$0xff]   ;;  %v4947_v57 = vld [vmem:[%s7043_s1 + $0x568] ss:$16 sps:$4 sm:$0xff]  }
  0x74   :  { %1316 = vmatprep.subr.bf16.mxu0 %v4862_v58  ;;  %1480 = vmatprep.subr.bf16.mxu1 %v4865_v59  ;;  %v4952_v58 = vld [vmem:[%s7043_s1 + $0x584] ss:$16 sps:$4 sm:$0xff]   ;;  %v4955_v59 = vld [vmem:[%s7043_s1 + $0x58c] ss:$16 sps:$4 sm:$0xff]  }
  0x77   :  { %1317 = vmatpush1.bf16.msra.mxu0 %v4860_v60  ;;  %1481 = vmatpush1.bf16.msra.mxu1 %v4863_v61  ;;  %v4950_v60 = vld [vmem:[%s7043_s1 + $0x580] ss:$16 sps:$4 sm:$0xff]   ;;  %v4953_v61 = vld [vmem:[%s7043_s1 + $0x588] ss:$16 sps:$4 sm:$0xff]  }
  0x78   :  { %1318 = vmatprep.subr.bf16.mxu0 %v4868_v62  ;;  %1482 = vmatprep.subr.bf16.mxu1 %v4871_v63  ;;  %v4958_v62 = vld [vmem:[%s7043_s1 + $0x5a4] ss:$16 sps:$4 sm:$0xff]   ;;  %v4961_v63 = vld [vmem:[%s7043_s1 + $0x5ac] ss:$16 sps:$4 sm:$0xff]  }
  0x7b   :  { %1319 = vmatpush1.bf16.msra.mxu0 %v4866_v0  ;;  %1483 = vmatpush1.bf16.msra.mxu1 %v4869_v1  ;;  %v4956_v0 = vld [vmem:[%s7043_s1 + $0x5a0] ss:$16 sps:$4 sm:$0xff]   ;;  %v4959_v1 = vld [vmem:[%s7043_s1 + $0x5a8] ss:$16 sps:$4 sm:$0xff]  }
  0x7c   :  { %1320 = vmatprep.subr.bf16.mxu0 %v4874_v2  ;;  %1484 = vmatprep.subr.bf16.mxu1 %v4877_v3  ;;  %v4964_v2 = vld [vmem:[%s7043_s1 + $0x5c4] ss:$16 sps:$4 sm:$0xff]   ;;  %v4967_v3 = vld [vmem:[%s7043_s1 + $0x5cc] ss:$16 sps:$4 sm:$0xff]  }
  0x7f   :  { %1321 = vmatpush1.bf16.msra.mxu0 %v4872_v4  ;;  %1485 = vmatpush1.bf16.msra.mxu1 %v4875_v5  ;;  %v4962_v4 = vld [vmem:[%s7043_s1 + $0x5c0] ss:$16 sps:$4 sm:$0xff]   ;;  %v4965_v5 = vld [vmem:[%s7043_s1 + $0x5c8] ss:$16 sps:$4 sm:$0xff]  }
  0x80   :  { %1331 = vmatprep.subr.bf16.mxu0 %v4880_v6  ;;  %1495 = vmatprep.subr.bf16.mxu1 %v4883_v8  ;;  %v4970_v6 = vld [vmem:[%s7043_s1 + $0x5e4] ss:$16 sps:$4 sm:$0xff]   ;;  %v4968_v8 = vld [vmem:[%s7043_s1 + $0x5e0] ss:$16 sps:$4 sm:$0xff]  }
  0x82   :  { %1323 = vmatmul.mubr.bf16.vlgmr.msra.gmra.mrb[0].mxu0 %v42_v10  ;;  %1487 = vmatmul.mubr.bf16.vlgmr.msra.gmra.mrb[0].mxu1 %v42_v10  ;;  %v37_v10 = vld [vmem:[%s7044_s0 + $0x20] sm:$0xff] }
  0x83   :  { %1332 = vmatpush1.bf16.msra.mxu0 %v4878_v9  ;;  %1496 = vmatpush1.bf16.msra.mxu1 %v4881_v11  ;;  %v4971_v9 = vld [vmem:[%s7043_s1 + $0x5e8] ss:$16 sps:$4 sm:$0xff]   ;;  %v4976_v11 = vld [vmem:[%s7043_s1 + $0x604] ss:$16 sps:$4 sm:$0xff]  }
  0x84   :  { %1333 = vmatprep.subr.bf16.mxu0 %v4886_v12  ;;  %1497 = vmatprep.subr.bf16.mxu1 %v4889_v13  ;;  %v4979_v12 = vld [vmem:[%s7043_s1 + $0x60c] ss:$16 sps:$4 sm:$0xff]   ;;  %v44_v13 = vpack.c.bf16 %v37_v10, %v37_v10 }
  0x85   :  { %1363 = vmatprep.mubr.bf16.mxu0 %v45_v15  ;;  %1527 = vmatprep.mubr.bf16.mxu1 %v45_v15  ;;  %v4977_v15 = vld [vmem:[%s7043_s1 + $0x608] ss:$16 sps:$4 sm:$0xff]  }
  0x87   :  { %1334 = vmatpush1.bf16.msra.mxu0 %v4884_v16  ;;  %1498 = vmatpush1.bf16.msra.mxu1 %v4887_v17  ;;  %v4980_v16 = vld [vmem:[%s7045_s3 + $0x40] sm:$0xff]   ;;  %v5408_v17 = vmov 0  }
  0x88   :  { %1335 = vmatprep.subr.bf16.mxu0 %v4892_v18  ;;  %1499 = vmatprep.subr.bf16.mxu1 %v4895_v19  ;;  %v39_v18 = vld [vmem:[%s7044_s0 + $0x30] sm:$0xff] }
  0x89   :  { %v46_v19 = vpack.c.bf16 %v39_v18, %v39_v18 }
  0x8b   :  { %1336 = vmatpush1.bf16.msra.mxu0 %v4890_v20  ;;  %1500 = vmatpush1.bf16.msra.mxu1 %v4893_v21  ;;  %v4981_v20 = vld [vmem:[%s7045_s3] sm:$0xff]   ;;  %v4982_v21 = vld [vmem:[%s7045_s3 + $0x48] sm:$0xff]  }
  0x8c   :  { %1337 = vmatprep.subr.bf16.mxu0 %v4898_v22  ;;  %1501 = vmatprep.subr.bf16.mxu1 %v4901_v23  ;;  %v4983_v22 = vld [vmem:[%s7045_s3 + $0x8] sm:$0xff]   ;;  %v4984_v23 = vld [vmem:[%s7045_s3 + $0x50] sm:$0xff]  }
  0x8f   :  { %1338 = vmatpush1.bf16.msra.mxu0 %v4896_v24  ;;  %1502 = vmatpush1.bf16.msra.mxu1 %v4899_v25  ;;  %v4985_v24 = vld [vmem:[%s7045_s3 + $0x10] sm:$0xff]   ;;  %v4986_v25 = vld [vmem:[%s7045_s3 + $0x58] sm:$0xff]  }
  0x90   :  { %1339 = vmatprep.subr.bf16.mxu0 %v4904_v26  ;;  %1503 = vmatprep.subr.bf16.mxu1 %v4907_v27  ;;  %v4987_v26 = vld [vmem:[%s7045_s3 + $0x18] sm:$0xff]   ;;  %v4988_v27 = vld [vmem:[%s7045_s3 + $0x60] sm:$0xff]  }
  0x93   :  { %1340 = vmatpush1.bf16.msra.mxu0 %v4902_v28  ;;  %1504 = vmatpush1.bf16.msra.mxu1 %v4905_v29  ;;  %v4989_v28 = vld [vmem:[%s7045_s3 + $0x20] sm:$0xff]   ;;  %v4990_v29 = vld [vmem:[%s7045_s3 + $0x68] sm:$0xff]  }
  0x94   :  { %1341 = vmatprep.subr.bf16.mxu0 %v4910_v30  ;;  %1505 = vmatprep.subr.bf16.mxu1 %v4913_v31  ;;  %v4991_v30 = vld [vmem:[%s7045_s3 + $0x28] sm:$0xff]   ;;  %v4992_v31 = vld [vmem:[%s7045_s3 + $0x70] sm:$0xff]  }
  0x97   :  { %1342 = vmatpush1.bf16.msra.mxu0 %v4908_v32  ;;  %1506 = vmatpush1.bf16.msra.mxu1 %v4911_v33  ;;  %v4993_v32 = vld [vmem:[%s7045_s3 + $0x30] sm:$0xff]   ;;  %v4994_v33 = vld [vmem:[%s7045_s3 + $0x78] sm:$0xff]  }
  0x98   :  { %1343 = vmatprep.subr.bf16.mxu0 %v4916_v34  ;;  %1507 = vmatprep.subr.bf16.mxu1 %v4919_v35  ;;  %v4995_v34 = vld [vmem:[%s7045_s3 + $0x38] sm:$0xff]   ;;  %v4996_v35 = vld [vmem:[%s7045_s3 + $0xc0] sm:$0xff]  }
  0x9b   :  { %1344 = vmatpush1.bf16.msra.mxu0 %v4914_v36  ;;  %1508 = vmatpush1.bf16.msra.mxu1 %v4917_v37  ;;  %v245_v36 = vlaneseq }
  0x9c   :  { %1345 = vmatprep.subr.bf16.mxu0 %v4922_v38  ;;  %1509 = vmatprep.subr.bf16.mxu1 %v4925_v39  ;;  %v243_v39 = vld [vmem:[%s7046_s2] sm:$0xf] }
  0x9d   :  { %v6124_v37 = vshrl.u32 %v245_v36, 7  ;;  %v5041_v36 = vld [vmem:[%s7047_s5 + $0x8c] ss:$16 sps:$4 sm:$0xff]  }
  0x9f   :  { %1346 = vmatpush1.bf16.msra.mxu0 %v4920_v40  ;;  %1510 = vmatpush1.bf16.msra.mxu1 %v4923_v41  ;;  %v6127_v38 = vsub.s32 0, %v6124_v37  ;;  %v6133_v40 = vsub.s32 1, %v6124_v37  ;;  %v6136_v41 = vsub.s32 3, %v6124_v37 }
  0xa0   :  { %1347 = vmatprep.subr.bf16.mxu0 %v4928_v42  ;;  %1511 = vmatprep.subr.bf16.mxu1 %v4931_v43 }
  0xa1   :  { %v248_v42 = vrot.slane %v243_v39, %v6127_v38  ;;  %v252_v43 = vrot.slane %v243_v39, %v6133_v40 }
  0xa3   :  { %1348 = vmatpush1.bf16.msra.mxu0 %v4926_v44  ;;  %1512 = vmatpush1.bf16.msra.mxu1 %v4929_v45  ;;  %v260_v44 = vrot.slane %v243_v39, %v6136_v41 }
  0xa4   :  { %1349 = vmatprep.subr.bf16.mxu0 %v4934_v46  ;;  %1513 = vmatprep.subr.bf16.mxu1 %v4937_v47 }
  0xa7   :  { %1350 = vmatpush1.bf16.msra.mxu0 %v4932_v48  ;;  %1514 = vmatpush1.bf16.msra.mxu1 %v4935_v49 }
  0xa8   :  { %1351 = vmatprep.subr.bf16.mxu0 %v4940_v50  ;;  %1515 = vmatprep.subr.bf16.mxu1 %v4943_v51 }
  0xab   :  { %1352 = vmatpush1.bf16.msra.mxu0 %v4938_v52  ;;  %1516 = vmatpush1.bf16.msra.mxu1 %v4941_v53 }
  0xac   :  { %1353 = vmatprep.subr.bf16.mxu0 %v4946_v54  ;;  %1517 = vmatprep.subr.bf16.mxu1 %v4949_v55 }
  0xaf   :  { %1354 = vmatpush1.bf16.msra.mxu0 %v4944_v56  ;;  %1518 = vmatpush1.bf16.msra.mxu1 %v4947_v57 }
  0xb0   :  { %1355 = vmatprep.subr.bf16.mxu0 %v4952_v58  ;;  %1519 = vmatprep.subr.bf16.mxu1 %v4955_v59 }
  0xb3   :  { %1356 = vmatpush1.bf16.msra.mxu0 %v4950_v60  ;;  %1520 = vmatpush1.bf16.msra.mxu1 %v4953_v61  ;;  %v4997_v60 = vld [vmem:[%s7045_s3 + $0x80] sm:$0xff]  }
  0xb4   :  { %1357 = vmatprep.subr.bf16.mxu0 %v4958_v62  ;;  %1521 = vmatprep.subr.bf16.mxu1 %v4961_v63  ;;  %v4998_v62 = vld [vmem:[%s7045_s3 + $0xc8] sm:$0xff]  }
  0xb7   :  { %1358 = vmatpush1.bf16.msra.mxu0 %v4956_v0  ;;  %1522 = vmatpush1.bf16.msra.mxu1 %v4959_v1  ;;  %v4999_v0 = vld [vmem:[%s7045_s3 + $0x88] sm:$0xff]   ;;  %v5000_v1 = vld [vmem:[%s7045_s3 + $0xd0] sm:$0xff]  }
  0xb8   :  { %1359 = vmatprep.subr.bf16.mxu0 %v4964_v2  ;;  %1523 = vmatprep.subr.bf16.mxu1 %v4967_v3  ;;  %v5001_v2 = vld [vmem:[%s7045_s3 + $0x90] sm:$0xff]   ;;  %v5002_v3 = vld [vmem:[%s7045_s3 + $0xd8] sm:$0xff]  }
  0xbb   :  { %1360 = vmatpush1.bf16.msra.mxu0 %v4962_v4  ;;  %1524 = vmatpush1.bf16.msra.mxu1 %v4965_v5  ;;  %v5003_v4 = vld [vmem:[%s7045_s3 + $0x98] sm:$0xff]   ;;  %v5004_v5 = vld [vmem:[%s7045_s3 + $0xe0] sm:$0xff]  }
  0xbc   :  { %1361 = vmatprep.subr.bf16.mxu0 %v4970_v6  ;;  %1525 = vmatprep.subr.bf16.mxu1 %v4973_v7  ;;  %v5005_v6 = vld [vmem:[%s7045_s3 + $0xa0] sm:$0xff]   ;;  %v6169_v7 = vsub.s32 2, %v6124_v37 }
  0xbe   :  { %v256_v10 = vrot.slane %v243_v39, %v6169_v7  ;;  %v5039_v39 = vld [vmem:[%s7047_s5 + $0x88] ss:$16 sps:$4 sm:$0xff]  }
  0xbf   :  { %1362 = vmatpush1.bf16.msra.mxu0 %v4968_v8  ;;  %1526 = vmatpush1.bf16.msra.mxu1 %v4971_v9  ;;  %v5006_v8 = vld [vmem:[%s7045_s3 + $0xe8] sm:$0xff]  }
  0xc0   :  { %1372 = vmatprep.subr.bf16.mxu0 %v4976_v11  ;;  %1536 = vmatprep.subr.bf16.mxu1 %v4979_v12  ;;  %v5007_v9 = vld [vmem:[%s7045_s3 + $0xa8] sm:$0xff]   ;;  %v5008_v11 = vld [vmem:[%s7045_s3 + $0xf0] sm:$0xff]  }
  0xc1   :  { %v5009_v12 = vld [vmem:[%s7045_s3 + $0xb0] sm:$0xff]  }
  0xc2   :  { %1364 = vmatmul.mubr.bf16.vlgmr.msra.gmra.mrb[0].mxu0 %v44_v13  ;;  %1528 = vmatmul.mubr.bf16.vlgmr.msra.gmra.mrb[0].mxu1 %v44_v13 }
  0xc3   :  { %1373 = vmatpush1.bf16.msra.mxu0 %v4974_v14  ;;  %1537 = vmatpush1.bf16.msra.mxu1 %v4977_v15  ;;  %v5010_v14 = vld [vmem:[%s7045_s3 + $0xf8] sm:$0xff]  }
  0xc4   :  { %1404 = vmatprep.mubr.bf16.mxu0 %v5408_v17  ;;  %1568 = vmatprep.mubr.bf16.mxu1 %v5408_v17  ;;  %v5011_v15 = vld [vmem:[%s7045_s3 + $0xb8] sm:$0xff]  }
  0xc5   :  { %4551 = vmatprep.subr.bf16.mxu1 %v4980_v16 }
  0xce   :  { %4260 = vmatmul.mubr.msk.bf16.vlgmr.msra.gmra.mrb[0].mxu0 %vm1245_vm0, %v46_v19  ;;  %4261 = vmatmul.mubr.msk.bf16.vlgmr.msra.gmra.mrb[0].mxu1 %vm1245_vm0, %v46_v19  ;;  %v5012_v19 = vld [vmem:[%s7047_s5] ss:$16 sps:$4 sm:$0xff]  }
  0xcf   :  { %4552 = vmatpush3.bf16.msra.mxu1 %v4981_v20  ;;  %2175 = vmatprep.mubr.bf16.mxu0 %v5408_v17  ;;  %v5014_v20 = vld [vmem:[%s7047_s5 + $0x4] ss:$16 sps:$4 sm:$0xff]  }
  0xd0   :  { %4553 = vmatprep.subr.bf16.mxu1 %v4982_v21  ;;  %v5015_v21 = vld [vmem:[%s7047_s5 + $0x8] ss:$16 sps:$4 sm:$0xff]   ;;  %2143 = vmatprep.subr.bf16.mxu0 %v5014_v20 }
  0xd1   :  { %2144 = vmatpush1.bf16.msra.mxu0 %v5012_v19  ;;  %v5083_v19 = vld [vmem:[%s7048_s7 + $0xb4] ss:$28 sps:$4 sm:$0xff]   ;;  %v5078_v20 = vld [vmem:[%s7048_s7 + $0xa8] ss:$28 sps:$4 sm:$0xff]  }
  0xd3   :  { %4554 = vmatpush3.bf16.msra.mxu1 %v4983_v22  ;;  %v5017_v22 = vld [vmem:[%s7047_s5 + $0xc] ss:$16 sps:$4 sm:$0xff]  }
  0xd4   :  { %4555 = vmatprep.subr.bf16.mxu1 %v4984_v23  ;;  %v5020_v23 = vld [vmem:[%s7047_s5 + $0x24] ss:$16 sps:$4 sm:$0xff]  }
  0xd5   :  { %2145 = vmatprep.subr.bf16.mxu0 %v5020_v23  ;;  %v5084_v23 = vld [vmem:[%s7048_s7 + $0xe0] ss:$28 sps:$4 sm:$0xff]  }
  0xd7   :  { %4556 = vmatpush3.bf16.msra.mxu1 %v4985_v24  ;;  %v5021_v24 = vld [vmem:[%s7047_s5 + $0x28] ss:$16 sps:$4 sm:$0xff]  }
  0xd8   :  { %4557 = vmatprep.subr.bf16.mxu1 %v4986_v25  ;;  %v5023_v25 = vld [vmem:[%s7047_s5 + $0x2c] ss:$16 sps:$4 sm:$0xff]  }
  0xdb   :  { %4558 = vmatpush3.bf16.msra.mxu1 %v4987_v26  ;;  %v5026_v26 = vld [vmem:[%s7047_s5 + $0x44] ss:$16 sps:$4 sm:$0xff]  }
  0xdc   :  { %4559 = vmatprep.subr.bf16.mxu1 %v4988_v27  ;;  %v5024_v27 = vld [vmem:[%s7047_s5 + $0x40] ss:$16 sps:$4 sm:$0xff]  }
  0xdf   :  { %4560 = vmatpush3.bf16.msra.mxu1 %v4989_v28  ;;  %v5029_v28 = vld [vmem:[%s7047_s5 + $0x4c] ss:$16 sps:$4 sm:$0xff]  }
  0xe0   :  { %4561 = vmatprep.subr.bf16.mxu1 %v4990_v29  ;;  %v5027_v29 = vld [vmem:[%s7047_s5 + $0x48] ss:$16 sps:$4 sm:$0xff]  }
  0xe3   :  { %4562 = vmatpush3.bf16.msra.mxu1 %v4991_v30  ;;  %v5032_v30 = vld [vmem:[%s7047_s5 + $0x64] ss:$16 sps:$4 sm:$0xff]  }
  0xe4   :  { %4563 = vmatprep.subr.bf16.mxu1 %v4992_v31  ;;  %v5035_v31 = vld [vmem:[%s7047_s5 + $0x6c] ss:$16 sps:$4 sm:$0xff]  }
  0xe7   :  { %4564 = vmatpush3.bf16.msra.mxu1 %v4993_v32  ;;  %v5030_v32 = vld [vmem:[%s7047_s5 + $0x60] ss:$16 sps:$4 sm:$0xff]  }
  0xe8   :  { %4565 = vmatprep.subr.bf16.mxu1 %v4994_v33  ;;  %v5033_v33 = vld [vmem:[%s7047_s5 + $0x68] ss:$16 sps:$4 sm:$0xff]  }
  0xeb   :  { %4566 = vmatpush3.bf16.msra.mxu1 %v4995_v34  ;;  %v5038_v34 = vld [vmem:[%s7047_s5 + $0x84] ss:$16 sps:$4 sm:$0xff]  }
  0xec   :  { %4573 = vmatprep.subr.bf16.mxu1 %v4996_v35  ;;  %v5036_v35 = vld [vmem:[%s7047_s5 + $0x80] ss:$16 sps:$4 sm:$0xff]  }
 0x1a1   :  { %v1406_v45 = vpop.f32.mrb[0].mxu0  ;;  %v1570_v46 = vpop.f32.mrb[0].mxu1 }
 0x1a2   :  { %v4639_v47 = vadd.f32 %v1406_v45, %v248_v42  ;;  %v1408_v48 = vpop.f32.mrb[1].mxu0  ;;  %v1572_v49 = vpop.f32.mrb[1].mxu1  ;;  %v4641_v13 = vadd.f32 %v1570_v46, %v256_v10  ;;  %v5044_v42 = vld [vmem:[%s7047_s5 + $0xa4] ss:$16 sps:$4 sm:$0xff]   ;;  %v5045_v45 = vld [vmem:[%s7047_s5 + $0xa8] ss:$16 sps:$4 sm:$0xff]  }
 0x1a3   :  { %v4640_v50 = vadd.f32 %v1408_v48, %v252_v43  ;;  %v4642_v51 = vadd.f32 %v1572_v49, %v260_v44  ;;  %v1410_v52 = vpop.f32.mrb[2].mxu0  ;;  %v1574_v53 = vpop.f32.mrb[2].mxu1  ;;  %v5047_v43 = vld [vmem:[%s7047_s5 + $0xac] ss:$16 sps:$4 sm:$0xff]   ;;  %v5042_v44 = vld [vmem:[%s7047_s5 + $0xa0] ss:$16 sps:$4 sm:$0xff]  }
 0x1a4   :  { %v1577_v54 = vmax.f32 %v4639_v47, 0.0  ;;  %v1411_v55 = vpop.f32.mrb[3].mxu0  ;;  %v1575_v56 = vpop.f32.mrb[3].mxu1  ;;  %v1579_v16 = vmax.f32 %v4641_v13, 0.0  ;;  %v5050_v46 = vld [vmem:[%s7047_s5 + $0xc4] ss:$16 sps:$4 sm:$0xff]  }
 0x1a5   :  { %v1578_v57 = vmax.f32 %v4640_v50, 0.0  ;;  %v1580_v58 = vmax.f32 %v4642_v51, 0.0  ;;  %v5053_v47 = vld [vmem:[%s7047_s5 + $0xcc] ss:$16 sps:$4 sm:$0xff]   ;;  %v5048_v48 = vld [vmem:[%s7047_s5 + $0xc0] ss:$16 sps:$4 sm:$0xff]  }
 0x1a6   :  { %v1581_v61 = vpack.c.bf16 %v1577_v54, %v1577_v54  ;;  %v1583_v18 = vpack.c.bf16 %v1579_v16, %v1579_v16  ;;  %v5051_v49 = vld [vmem:[%s7047_s5 + $0xc8] ss:$16 sps:$4 sm:$0xff]   ;;  %v5056_v50 = vld [vmem:[%s7047_s5 + $0xe4] ss:$16 sps:$4 sm:$0xff]   ;;  %v5059_v51 = vld [vmem:[%s7047_s5 + $0xec] ss:$16 sps:$4 sm:$0xff]  }
 0x1a7   :  { %v1582_v59 = vpack.c.bf16 %v1578_v57, %v1578_v57  ;;  %v1584_v63 = vpack.c.bf16 %v1580_v58, %v1580_v58  ;;  %v5054_v52 = vld [vmem:[%s7047_s5 + $0xe0] ss:$16 sps:$4 sm:$0xff]   ;;  %v5057_v53 = vld [vmem:[%s7047_s5 + $0xe8] ss:$16 sps:$4 sm:$0xff]  }
 0x1a8   :  { %v5062_v54 = vld [vmem:[%s7048_s7 + $0x4] ss:$28 sps:$4 sm:$0xff]   ;;  %v5065_v55 = vld [vmem:[%s7048_s7 + $0xc] ss:$28 sps:$4 sm:$0xff]   ;;  %v5074_v13 = vld [vmem:[%s7048_s7 + $0x74] ss:$28 sps:$4 sm:$0xff]  }
 0x1a9   :  { %1880 = vmatprep.mubr.bf16.mxu1 %v1582_v59  ;;  %v5071_v10 = vld [vmem:[%s7048_s7 + $0x44] ss:$28 sps:$4 sm:$0xff]   ;;  %v5075_v16 = vld [vmem:[%s7048_s7 + $0x78] ss:$28 sps:$4 sm:$0xff]  }
 0x1aa   :  { %1881 = vmatmul.mubr.bf16.vlgmr.msra.gmra.mrb[4].mxu1 %v1581_v61  ;;  %v4262_v61 = vld [vmem:[%s7049_s4] ss:$0 sm:$0xff] }
 0x1ab   :  { %4574 = vmatpush3.bf16.msra.mxu1 %v4997_v60  ;;  %1920 = vmatprep.mubr.bf16.mxu1 %v1584_v63 }
 0x1ac   :  { %4575 = vmatprep.subr.bf16.mxu1 %v4998_v62 }
 0x1af   :  { %4576 = vmatpush3.bf16.msra.mxu1 %v4999_v0 }
 0x1b0   :  { %4577 = vmatprep.subr.bf16.mxu1 %v5000_v1 }
 0x1b3   :  { %4578 = vmatpush3.bf16.msra.mxu1 %v5001_v2 }
 0x1b4   :  { %4579 = vmatprep.subr.bf16.mxu1 %v5002_v3 }
 0x1b7   :  { %4580 = vmatpush3.bf16.msra.mxu1 %v5003_v4 }
 0x1b8   :  { %4581 = vmatprep.subr.bf16.mxu1 %v5004_v5  ;;  %v5060_v5 = vld [vmem:[%s7048_s7] ss:$28 sps:$4 sm:$0xff]  }
 0x1bb   :  { %4582 = vmatpush3.bf16.msra.mxu1 %v5005_v6  ;;  %v5063_v6 = vld [vmem:[%s7048_s7 + $0x8] ss:$28 sps:$4 sm:$0xff]  }
 0x1bc   :  { %4583 = vmatprep.subr.bf16.mxu1 %v5006_v8 }
 0x1bf   :  { %4584 = vmatpush3.bf16.msra.mxu1 %v5007_v9  ;;  %v5068_v9 = vld [vmem:[%s7048_s7 + $0x3c] ss:$28 sps:$4 sm:$0xff]  }
 0x1c0   :  { %4585 = vmatprep.subr.bf16.mxu1 %v5008_v11  ;;  %v5066_v11 = vld [vmem:[%s7048_s7 + $0x38] ss:$28 sps:$4 sm:$0xff]  }
 0x1c3   :  { %4586 = vmatpush3.bf16.msra.mxu1 %v5009_v12  ;;  %v5069_v12 = vld [vmem:[%s7048_s7 + $0x40] ss:$28 sps:$4 sm:$0xff]  }
 0x1c4   :  { %4587 = vmatprep.subr.bf16.mxu1 %v5010_v14  ;;  %v5077_v14 = vld [vmem:[%s7048_s7 + $0x7c] ss:$28 sps:$4 sm:$0xff]  }
 0x1c7   :  { %4588 = vmatpush3.bf16.msra.mxu1 %v5011_v15  ;;  %v5072_v15 = vld [vmem:[%s7048_s7 + $0x70] ss:$28 sps:$4 sm:$0xff]  }
 0x1c8   :  { %2184 = vmatprep.subr.bf16.mxu1 %v5017_v22  ;;  %v5086_v22 = vld [vmem:[%s7048_s7 + $0xe4] ss:$28 sps:$4 sm:$0xff]  }
 0x1ca   :  { %1921 = vmatmul.mubr.bf16.vlgmr.msra.gmra.mrb[8].mxu1 %v1583_v18  ;;  %v5080_v18 = vld [vmem:[%s7048_s7 + $0xac] ss:$28 sps:$4 sm:$0xff]  }
 0x1cb   :  { %2216 = vmatprep.mubr.bf16.mxu1 %v5408_v17  ;;  %v5018_v17 = vld [vmem:[%s7047_s5 + $0x20] ss:$16 sps:$4 sm:$0xff]   ;;  %2185 = vmatpush1.bf16.msra.mxu1 %v5015_v21 }
 0x1cc   :  { %2186 = vmatprep.subr.bf16.mxu1 %v5023_v25  ;;  %2146 = vmatpush1.bf16.msra.mxu0 %v5018_v17  ;;  %v5081_v21 = vld [vmem:[%s7048_s7 + $0xb0] ss:$28 sps:$4 sm:$0xff]   ;;  %v5092_v25 = vld [vmem:[%s7048_s7 + $0x11c] ss:$28 sps:$4 sm:$0xff]  }
 0x1cd   :  { %2147 = vmatprep.subr.bf16.mxu0 %v5026_v26  ;;  %v5089_v17 = vld [vmem:[%s7048_s7 + $0xec] ss:$28 sps:$4 sm:$0xff]   ;;  %v5095_v26 = vld [vmem:[%s7048_s7 + $0x124] ss:$28 sps:$4 sm:$0xff]  }
 0x1cf   :  { %2187 = vmatpush1.bf16.msra.mxu1 %v5021_v24  ;;  %v5087_v24 = vld [vmem:[%s7048_s7 + $0xe8] ss:$28 sps:$4 sm:$0xff]  }
 0x1d0   :  { %2188 = vmatprep.subr.bf16.mxu1 %v5029_v28  ;;  %2148 = vmatpush1.bf16.msra.mxu0 %v5024_v27  ;;  %v5090_v27 = vld [vmem:[%s7048_s7 + $0x118] ss:$28 sps:$4 sm:$0xff]   ;;  %v5093_v28 = vld [vmem:[%s7048_s7 + $0x120] ss:$28 sps:$4 sm:$0xff]  }
 0x1d1   :  { %2149 = vmatprep.subr.bf16.mxu0 %v5032_v30  ;;  %v5101_v30 = vld [vmem:[%s7048_s7 + $0x15c] ss:$28 sps:$4 sm:$0xff]  }
 0x1d3   :  { %2189 = vmatpush1.bf16.msra.mxu1 %v5027_v29  ;;  %v5098_v29 = vld [vmem:[%s7048_s7 + $0x154] ss:$28 sps:$4 sm:$0xff]  }
 0x1d4   :  { %2190 = vmatprep.subr.bf16.mxu1 %v5035_v31  ;;  %2150 = vmatpush1.bf16.msra.mxu0 %v5030_v32  ;;  %v5096_v31 = vld [vmem:[%s7048_s7 + $0x150] ss:$28 sps:$4 sm:$0xff]   ;;  %v5099_v32 = vld [vmem:[%s7048_s7 + $0x158] ss:$28 sps:$4 sm:$0xff]  }
 0x1d5   :  { %2151 = vmatprep.subr.bf16.mxu0 %v5038_v34  ;;  %v5107_v34 = vld [vmem:[%s7048_s7 + $0x194] ss:$28 sps:$4 sm:$0xff]  }
 0x1d7   :  { %2191 = vmatpush1.bf16.msra.mxu1 %v5033_v33  ;;  %v5104_v33 = vld [vmem:[%s7048_s7 + $0x18c] ss:$28 sps:$4 sm:$0xff]  }
 0x1d8   :  { %2192 = vmatprep.subr.bf16.mxu1 %v5041_v36  ;;  %2152 = vmatpush1.bf16.msra.mxu0 %v5036_v35  ;;  %v5102_v35 = vld [vmem:[%s7048_s7 + $0x188] ss:$28 sps:$4 sm:$0xff]   ;;  %v5105_v36 = vld [vmem:[%s7048_s7 + $0x190] ss:$28 sps:$4 sm:$0xff]  }
 0x1d9   :  { %2153 = vmatprep.subr.bf16.mxu0 %v5044_v42  ;;  %v5113_v42 = vld [vmem:[%s7048_s7 + $0x1cc] ss:$28 sps:$4 sm:$0xff]  }
 0x1db   :  { %2193 = vmatpush1.bf16.msra.mxu1 %v5039_v39  ;;  %v5110_v39 = vld [vmem:[%s7048_s7 + $0x1c4] ss:$28 sps:$4 sm:$0xff]  }
 0x1dc   :  { %2194 = vmatprep.subr.bf16.mxu1 %v5047_v43  ;;  %2154 = vmatpush1.bf16.msra.mxu0 %v5042_v44  ;;  %v5108_v43 = vld [vmem:[%s7048_s7 + $0x1c0] ss:$28 sps:$4 sm:$0xff]   ;;  %v5111_v44 = vld [vmem:[%s7048_s7 + $0x1c8] ss:$28 sps:$4 sm:$0xff]  }
 0x1dd   :  { %2155 = vmatprep.subr.bf16.mxu0 %v5050_v46  ;;  %v5119_v46 = vld [vmem:[%s7048_s7 + $0x204] ss:$28 sps:$4 sm:$0xff]  }
 0x1df   :  { %2195 = vmatpush1.bf16.msra.mxu1 %v5045_v45  ;;  %v5116_v45 = vld [vmem:[%s7048_s7 + $0x1fc] ss:$28 sps:$4 sm:$0xff]  }
 0x1e0   :  { %2196 = vmatprep.subr.bf16.mxu1 %v5053_v47  ;;  %2156 = vmatpush1.bf16.msra.mxu0 %v5048_v48  ;;  %v5114_v47 = vld [vmem:[%s7048_s7 + $0x1f8] ss:$28 sps:$4 sm:$0xff]   ;;  %v5117_v48 = vld [vmem:[%s7048_s7 + $0x200] ss:$28 sps:$4 sm:$0xff]  }
 0x1e1   :  { %2157 = vmatprep.subr.bf16.mxu0 %v5056_v50  ;;  %v5125_v50 = vld [vmem:[%s7048_s7 + $0x23c] ss:$28 sps:$4 sm:$0xff]  }
 0x1e3   :  { %2197 = vmatpush1.bf16.msra.mxu1 %v5051_v49  ;;  %v5122_v49 = vld [vmem:[%s7048_s7 + $0x234] ss:$28 sps:$4 sm:$0xff]  }
 0x1e4   :  { %2198 = vmatprep.subr.bf16.mxu1 %v5059_v51  ;;  %2158 = vmatpush1.bf16.msra.mxu0 %v5054_v52  ;;  %v5120_v51 = vld [vmem:[%s7048_s7 + $0x230] ss:$28 sps:$4 sm:$0xff]   ;;  %v5123_v52 = vld [vmem:[%s7048_s7 + $0x238] ss:$28 sps:$4 sm:$0xff]  }
 0x1e5   :  { %3678 = vmatprep.subr.bf16.mxu0 %v5062_v54  ;;  %v5131_v54 = vld [vmem:[%s7048_s7 + $0x274] ss:$28 sps:$4 sm:$0xff]  }
 0x1e7   :  { %2199 = vmatpush1.bf16.msra.mxu1 %v5057_v53  ;;  %v5128_v53 = vld [vmem:[%s7048_s7 + $0x26c] ss:$28 sps:$4 sm:$0xff]  }
 0x1e8   :  { %3760 = vmatprep.subr.bf16.mxu1 %v5065_v55  ;;  %v5126_v55 = vld [vmem:[%s7048_s7 + $0x268] ss:$28 sps:$4 sm:$0xff]  }
 0x27d   :  { %v4567_v56 = vpop.f32.mrb[4].mxu1 }
 0x27e   :  { %v4568_v57 = vpop.f32.mrb[5].mxu1 }
 0x27f   :  { %v4569_v58 = vadd.f32 %v4568_v57, %v4567_v56  ;;  %v4570_v59 = vpop.f32.mrb[6].mxu1  ;;  %v5129_v56 = vld [vmem:[%s7048_s7 + $0x270] ss:$28 sps:$4 sm:$0xff]   ;;  %v5134_v57 = vld [vmem:[%s7048_s7 + $0x2a4] ss:$28 sps:$4 sm:$0xff]  }
 0x280   :  { %v4571_v60 = vpop.f32.mrb[7].mxu1  ;;  %v5132_v59 = vld [vmem:[%s7048_s7 + $0x2a0] ss:$28 sps:$4 sm:$0xff]  }
 0x281   :  { %v1883_v0 = vadd.f32 %v4569_v58, %v4262_v61  ;;  %v5137_v58 = vld [vmem:[%s7048_s7 + $0x2ac] ss:$28 sps:$4 sm:$0xff]   ;;  %v5140_v61 = vld [vmem:[%s7048_s7 + $0x2dc] ss:$28 sps:$4 sm:$0xff]  }
 0x282   :  { %v5135_v60 = vld [vmem:[%s7048_s7 + $0x2a8] ss:$28 sps:$4 sm:$0xff]  }
 0x29d   :  { %v4589_v62 = vpop.f32.mrb[8].mxu1 }
 0x29e   :  { %v4590_v63 = vpop.f32.mrb[9].mxu1 }
 0x29f   :  { %v4591_v1 = vadd.f32 %v4590_v63, %v4589_v62  ;;  %v4592_v2 = vpop.f32.mrb[10].mxu1  ;;  %v5143_v62 = vld [vmem:[%s7048_s7 + $0x2e4] ss:$28 sps:$4 sm:$0xff]   ;;  %v5138_v63 = vld [vmem:[%s7048_s7 + $0x2d8] ss:$28 sps:$4 sm:$0xff]  }
 0x2a0   :  { %v4593_v3 = vpop.f32.mrb[11].mxu1  ;;  %v5149_v2 = vld [vmem:[%s7048_s7 + $0x31c] ss:$28 sps:$4 sm:$0xff]  }
 0x2a1   :  { %v1923_v4 = vadd.f32 %v4591_v1, %v1883_v0  ;;  %v5141_v0 = vld [vmem:[%s7048_s7 + $0x2e0] ss:$28 sps:$4 sm:$0xff]   ;;  %v5146_v1 = vld [vmem:[%s7048_s7 + $0x314] ss:$28 sps:$4 sm:$0xff]  }
 0x2a2   :  { %v5144_v3 = vld [vmem:[%s7048_s7 + $0x310] ss:$28 sps:$4 sm:$0xff]  }
 0x2a3   :  { %v1928_v8 = vpack.c.bf16 %v1923_v4, %v1923_v4  ;;  %v5147_v4 = vld [vmem:[%s7048_s7 + $0x318] ss:$28 sps:$4 sm:$0xff]  }
 0x2a5   :  { %2176 = vmatmul.mubr.bf16.vlgmr.msra.gmra.mrb[4].mxu0 %v1928_v8  ;;  %2217 = vmatmul.mubr.bf16.vlgmr.msra.gmra.mrb[12].mxu1 %v1928_v8  ;;  %v5150_v8 = vld [vmem:[%s7048_s7 + $0x348] ss:$28 sps:$4 sm:$0xff]  }
 0x2a6   :  { %3679 = vmatpush1.bf16.msra.mxu0 %v5060_v5  ;;  %3761 = vmatpush1.bf16.msra.mxu1 %v5063_v6  ;;  %v5152_v5 = vld [vmem:[%s7048_s7 + $0x34c] ss:$28 sps:$4 sm:$0xff]   ;;  %v5155_v6 = vld [vmem:[%s7048_s7 + $0x354] ss:$28 sps:$4 sm:$0xff]  }
 0x2a7   :  { %3680 = vmatprep.subr.bf16.mxu0 %v5068_v9  ;;  %3762 = vmatprep.subr.bf16.mxu1 %v5071_v10  ;;  %v5153_v9 = vld [vmem:[%s7048_s7 + $0x350] ss:$28 sps:$4 sm:$0xff]   ;;  %v5158_v10 = vld [vmem:[%s7048_s7 + $0x384] ss:$28 sps:$4 sm:$0xff]  }
 0x2aa   :  { %3681 = vmatpush1.bf16.msra.mxu0 %v5066_v11  ;;  %3763 = vmatpush1.bf16.msra.mxu1 %v5069_v12  ;;  %v5161_v11 = vld [vmem:[%s7048_s7 + $0x38c] ss:$28 sps:$4 sm:$0xff]   ;;  %v6491_v12 = vld [vmem:[%s7050_s6] sm:$0xf] }
 0x2ab   :  { %3682 = vmatprep.subr.bf16.mxu0 %v5074_v13  ;;  %3764 = vmatprep.subr.bf16.mxu1 %v5077_v14  ;;  %v1966_v13 = vrot.slane %v6491_v12, %v6127_v38  ;;  %v1970_v14 = vrot.slane %v6491_v12, %v6133_v40 }
 0x2ae   :  { %3683 = vmatpush1.bf16.msra.mxu0 %v5072_v15  ;;  %3765 = vmatpush1.bf16.msra.mxu1 %v5075_v16  ;;  %v1978_v15 = vrot.slane %v6491_v12, %v6136_v41 }
 0x2af   :  { %3684 = vmatprep.subr.bf16.mxu0 %v5080_v18  ;;  %3766 = vmatprep.subr.bf16.mxu1 %v5083_v19 }
 0x2b2   :  { %3685 = vmatpush1.bf16.msra.mxu0 %v5078_v20  ;;  %3767 = vmatpush1.bf16.msra.mxu1 %v5081_v21 }
 0x2b3   :  { %3686 = vmatprep.subr.bf16.mxu0 %v5086_v22  ;;  %3768 = vmatprep.subr.bf16.mxu1 %v5089_v17 }
 0x2b6   :  { %3687 = vmatpush1.bf16.msra.mxu0 %v5084_v23  ;;  %3769 = vmatpush1.bf16.msra.mxu1 %v5087_v24 }
 0x2b7   :  { %3688 = vmatprep.subr.bf16.mxu0 %v5092_v25  ;;  %3770 = vmatprep.subr.bf16.mxu1 %v5095_v26 }
 0x2ba   :  { %3689 = vmatpush1.bf16.msra.mxu0 %v5090_v27  ;;  %3771 = vmatpush1.bf16.msra.mxu1 %v5093_v28 }
 0x2bb   :  { %3690 = vmatprep.subr.bf16.mxu0 %v5098_v29  ;;  %3772 = vmatprep.subr.bf16.mxu1 %v5101_v30 }
 0x2be   :  { %3691 = vmatpush1.bf16.msra.mxu0 %v5096_v31  ;;  %3773 = vmatpush1.bf16.msra.mxu1 %v5099_v32  ;;  %v5156_v31 = vld [vmem:[%s7048_s7 + $0x380] ss:$28 sps:$4 sm:$0xff]   ;;  %v5159_v32 = vld [vmem:[%s7048_s7 + $0x388] ss:$28 sps:$4 sm:$0xff]  }
 0x2bf   :  { %3692 = vmatprep.subr.bf16.mxu0 %v5104_v33  ;;  %3774 = vmatprep.subr.bf16.mxu1 %v5107_v34  ;;  %v5164_v34 = vld [vmem:[%s7048_s7 + $0x3bc] ss:$28 sps:$4 sm:$0xff]  }
 0x2c2   :  { %3693 = vmatpush1.bf16.msra.mxu0 %v5102_v35  ;;  %3775 = vmatpush1.bf16.msra.mxu1 %v5105_v36  ;;  %v5167_v35 = vld [vmem:[%s7048_s7 + $0x3c4] ss:$28 sps:$4 sm:$0xff]  }
 0x2c3   :  { %3694 = vmatprep.subr.bf16.mxu0 %v5110_v39  ;;  %3776 = vmatprep.subr.bf16.mxu1 %v5113_v42  ;;  %v5162_v39 = vld [vmem:[%s7048_s7 + $0x3b8] ss:$28 sps:$4 sm:$0xff]   ;;  %v5165_v42 = vld [vmem:[%s7048_s7 + $0x3c0] ss:$28 sps:$4 sm:$0xff]  }
 0x2c6   :  { %3695 = vmatpush1.bf16.msra.mxu0 %v5108_v43  ;;  %3777 = vmatpush1.bf16.msra.mxu1 %v5111_v44  ;;  %v5170_v43 = vld [vmem:[%s7048_s7 + $0x3f4] ss:$28 sps:$4 sm:$0xff]   ;;  %v5173_v44 = vld [vmem:[%s7048_s7 + $0x3fc] ss:$28 sps:$4 sm:$0xff]  }
 0x2c7   :  { %3696 = vmatprep.subr.bf16.mxu0 %v5116_v45  ;;  %3778 = vmatprep.subr.bf16.mxu1 %v5119_v46  ;;  %v5168_v45 = vld [vmem:[%s7048_s7 + $0x3f0] ss:$28 sps:$4 sm:$0xff]   ;;  %v5171_v46 = vld [vmem:[%s7048_s7 + $0x3f8] ss:$28 sps:$4 sm:$0xff]  }
 0x2ca   :  { %3697 = vmatpush1.bf16.msra.mxu0 %v5114_v47  ;;  %3779 = vmatpush1.bf16.msra.mxu1 %v5117_v48  ;;  %v5176_v47 = vld [vmem:[%s7048_s7 + $0x42c] ss:$28 sps:$4 sm:$0xff]   ;;  %v5179_v48 = vld [vmem:[%s7048_s7 + $0x434] ss:$28 sps:$4 sm:$0xff]  }
 0x2cb   :  { %3698 = vmatprep.subr.bf16.mxu0 %v5122_v49  ;;  %3780 = vmatprep.subr.bf16.mxu1 %v5125_v50  ;;  %v5174_v49 = vld [vmem:[%s7048_s7 + $0x428] ss:$28 sps:$4 sm:$0xff]   ;;  %v5177_v50 = vld [vmem:[%s7048_s7 + $0x430] ss:$28 sps:$4 sm:$0xff]  }
 0x2ce   :  { %3699 = vmatpush1.bf16.msra.mxu0 %v5120_v51  ;;  %3781 = vmatpush1.bf16.msra.mxu1 %v5123_v52  ;;  %v5182_v51 = vld [vmem:[%s7048_s7 + $0x464] ss:$28 sps:$4 sm:$0xff]   ;;  %v5185_v52 = vld [vmem:[%s7048_s7 + $0x46c] ss:$28 sps:$4 sm:$0xff]  }
 0x2cf   :  { %3700 = vmatprep.subr.bf16.mxu0 %v5128_v53  ;;  %3782 = vmatprep.subr.bf16.mxu1 %v5131_v54  ;;  %v5180_v53 = vld [vmem:[%s7048_s7 + $0x460] ss:$28 sps:$4 sm:$0xff]   ;;  %v5183_v54 = vld [vmem:[%s7048_s7 + $0x468] ss:$28 sps:$4 sm:$0xff]  }
 0x2d2   :  { %3701 = vmatpush1.bf16.msra.mxu0 %v5126_v55  ;;  %3783 = vmatpush1.bf16.msra.mxu1 %v5129_v56  ;;  %v5188_v55 = vld [vmem:[%s7048_s7 + $0x49c] ss:$28 sps:$4 sm:$0xff]   ;;  %v5191_v56 = vld [vmem:[%s7048_s7 + $0x4a4] ss:$28 sps:$4 sm:$0xff]  }
 0x2d3   :  { %3702 = vmatprep.subr.bf16.mxu0 %v5134_v57  ;;  %3784 = vmatprep.subr.bf16.mxu1 %v5137_v58  ;;  %v5186_v57 = vld [vmem:[%s7048_s7 + $0x498] ss:$28 sps:$4 sm:$0xff]   ;;  %v5189_v58 = vld [vmem:[%s7048_s7 + $0x4a0] ss:$28 sps:$4 sm:$0xff]  }
 0x2d6   :  { %3703 = vmatpush1.bf16.msra.mxu0 %v5132_v59  ;;  %3785 = vmatpush1.bf16.msra.mxu1 %v5135_v60  ;;  %v5194_v59 = vld [vmem:[%s7048_s7 + $0x4d4] ss:$28 sps:$4 sm:$0xff]   ;;  %v5197_v60 = vld [vmem:[%s7048_s7 + $0x4dc] ss:$28 sps:$4 sm:$0xff]  }
 0x2d7   :  { %3704 = vmatprep.subr.bf16.mxu0 %v5140_v61  ;;  %3786 = vmatprep.subr.bf16.mxu1 %v5143_v62  ;;  %v5192_v61 = vld [vmem:[%s7048_s7 + $0x4d0] ss:$28 sps:$4 sm:$0xff]   ;;  %v5195_v62 = vld [vmem:[%s7048_s7 + $0x4d8] ss:$28 sps:$4 sm:$0xff]  }
 0x2da   :  { %3705 = vmatpush1.bf16.msra.mxu0 %v5138_v63  ;;  %3787 = vmatpush1.bf16.msra.mxu1 %v5141_v0  ;;  %v5200_v63 = vld [vmem:[%s7048_s7 + $0x50c] ss:$28 sps:$4 sm:$0xff]   ;;  %v5203_v0 = vld [vmem:[%s7048_s7 + $0x514] ss:$28 sps:$4 sm:$0xff]  }
 0x2db   :  { %3706 = vmatprep.subr.bf16.mxu0 %v5146_v1  ;;  %3788 = vmatprep.subr.bf16.mxu1 %v5149_v2  ;;  %v5198_v1 = vld [vmem:[%s7048_s7 + $0x508] ss:$28 sps:$4 sm:$0xff]   ;;  %v5201_v2 = vld [vmem:[%s7048_s7 + $0x510] ss:$28 sps:$4 sm:$0xff]  }
 0x2de   :  { %3707 = vmatpush1.bf16.msra.mxu0 %v5144_v3  ;;  %3789 = vmatpush1.bf16.msra.mxu1 %v5147_v4  ;;  %v5206_v3 = vld [vmem:[%s7048_s7 + $0x544] ss:$28 sps:$4 sm:$0xff]   ;;  %v5209_v4 = vld [vmem:[%s7048_s7 + $0x54c] ss:$28 sps:$4 sm:$0xff]  }
 0x2df   :  { %3708 = vmatprep.subr.bf16.mxu0 %v5152_v5  ;;  %3790 = vmatprep.subr.bf16.mxu1 %v5155_v6  ;;  %v5204_v5 = vld [vmem:[%s7048_s7 + $0x540] ss:$28 sps:$4 sm:$0xff]   ;;  %v5207_v6 = vld [vmem:[%s7048_s7 + $0x548] ss:$28 sps:$4 sm:$0xff]  }
 0x2e2   :  { %3709 = vmatpush1.bf16.msra.mxu0 %v5150_v8  ;;  %3791 = vmatpush1.bf16.msra.mxu1 %v5153_v9  ;;  %v5212_v8 = vld [vmem:[%s7048_s7 + $0x57c] ss:$28 sps:$4 sm:$0xff]   ;;  %v5215_v9 = vld [vmem:[%s7048_s7 + $0x584] ss:$28 sps:$4 sm:$0xff]  }
 0x2e3   :  { %3719 = vmatprep.subr.bf16.mxu0 %v5158_v10  ;;  %3801 = vmatprep.subr.bf16.mxu1 %v5161_v11  ;;  %v5210_v10 = vld [vmem:[%s7048_s7 + $0x578] ss:$28 sps:$4 sm:$0xff]   ;;  %v5213_v11 = vld [vmem:[%s7048_s7 + $0x580] ss:$28 sps:$4 sm:$0xff]  }
 0x378   :  { %v2177_v16 = vpop.f32.mrb[4].mxu0  ;;  %v6499_v18 = vpop.f32.mrb[12].mxu1 }
 0x379   :  { %v2178_v19 = vadd.f32 %v2177_v16, %v1966_v13  ;;  %v2179_v20 = vpop.f32.mrb[5].mxu0  ;;  %v2220_v21 = vpop.f32.mrb[13].mxu1  ;;  %v5218_v13 = vld [vmem:[%s7048_s7 + $0x5b4] ss:$28 sps:$4 sm:$0xff]  }
 0x37a   :  { %v2180_v22 = vadd.f32 %v2179_v20, %v1970_v14  ;;  %v2221_v17 = vadd.f32 %v2220_v21, %v1978_v15  ;;  %v2181_v23 = vpop.f32.mrb[6].mxu0  ;;  %v2222_v24 = vpop.f32.mrb[14].mxu1  ;;  %v5221_v14 = vld [vmem:[%s7048_s7 + $0x5bc] ss:$28 sps:$4 sm:$0xff]   ;;  %v5216_v15 = vld [vmem:[%s7048_s7 + $0x5b0] ss:$28 sps:$4 sm:$0xff]  }
 0x37b   :  { %v2225_v25 = vmax.f32 %v2178_v19, 0.0  ;;  %v2182_v26 = vpop.f32.mrb[7].mxu0  ;;  %v2223_v27 = vpop.f32.mrb[15].mxu1  ;;  %v5219_v16 = vld [vmem:[%s7048_s7 + $0x5b8] ss:$28 sps:$4 sm:$0xff]  }
 0x37c   :  { %v2226_v28 = vmax.f32 %v2180_v22, 0.0  ;;  %v2228_v29 = vmax.f32 %v2221_v17, 0.0  ;;  %v5224_v19 = vld [vmem:[%s7048_s7 + $0x5ec] ss:$28 sps:$4 sm:$0xff]   ;;  %v5227_v20 = vld [vmem:[%s7048_s7 + $0x5f4] ss:$28 sps:$4 sm:$0xff]  }
 0x37d   :  { %v6509_v33 = vpack.c.bf16 %v2225_v25, %v2225_v25  ;;  %v5222_v21 = vld [vmem:[%s7048_s7 + $0x5e8] ss:$28 sps:$4 sm:$0xff]   ;;  %v5225_v22 = vld [vmem:[%s7048_s7 + $0x5f0] ss:$28 sps:$4 sm:$0xff]   ;;  %v5228_v24 = vld [vmem:[%s7048_s7 + $0x620] ss:$28 sps:$4 sm:$0xff]  }
 0x37e   :  { %v6501_v30 = vpack.c.bf16 %v2226_v28, %v2226_v28  ;;  %v6519_v36 = vpack.c.bf16 %v2228_v29, %v2228_v29  ;;  %v5230_v17 = vld [vmem:[%s7048_s7 + $0x624] ss:$28 sps:$4 sm:$0xff]   ;;  %v5233_v23 = vld [vmem:[%s7048_s7 + $0x62c] ss:$28 sps:$4 sm:$0xff]   ;;  %v5236_v26 = vld [vmem:[%s7048_s7 + $0x65c] ss:$28 sps:$4 sm:$0xff]  }
 0x37f   :  { %v5231_v25 = vld [vmem:[%s7048_s7 + $0x628] ss:$28 sps:$4 sm:$0xff]   ;;  %v5234_v28 = vld [vmem:[%s7048_s7 + $0x658] ss:$28 sps:$4 sm:$0xff]   ;;  %v5237_v29 = vld [vmem:[%s7048_s7 + $0x660] ss:$28 sps:$4 sm:$0xff]  }
 0x380   :  { %3710 = vmatprep.mubr.bf16.mxu0 %v6501_v30  ;;  %3792 = vmatprep.mubr.bf16.mxu1 %v6501_v30  ;;  %v5239_v27 = vld [vmem:[%s7048_s7 + $0x664] ss:$28 sps:$4 sm:$0xff]  }
 0x381   :  { %3711 = vmatmul.mubr.bf16.vlgmr.msra.gmra.mrb[8].mxu0 %v6509_v33  ;;  %3793 = vmatmul.mubr.bf16.vlgmr.msra.gmra.mrb[16].mxu1 %v6509_v33 }
 0x382   :  { %3720 = vmatpush1.bf16.msra.mxu0 %v5156_v31  ;;  %3802 = vmatpush1.bf16.msra.mxu1 %v5159_v32  ;;  %v1974_v31 = vrot.slane %v6491_v12, %v6169_v7  ;;  %v5242_v32 = vld [vmem:[%s7048_s7 + $0x694] ss:$28 sps:$4 sm:$0xff]  }
 0x383   :  { %3751 = vmatprep.mubr.bf16.mxu0 %v6519_v36  ;;  %3833 = vmatprep.mubr.bf16.mxu1 %v6519_v36  ;;  %v5243_v12 = vld [vmem:[%s7048_s7 + $0x698] ss:$28 sps:$4 sm:$0xff]  }
 0x384   :  { %3721 = vmatprep.subr.bf16.mxu0 %v5164_v34  ;;  %3803 = vmatprep.subr.bf16.mxu1 %v5167_v35  ;;  %v5245_v34 = vld [vmem:[%s7048_s7 + $0x69c] ss:$28 sps:$4 sm:$0xff]   ;;  %v5240_v35 = vld [vmem:[%s7048_s7 + $0x690] ss:$28 sps:$4 sm:$0xff]  }
 0x386   :  { %3722 = vmatpush1.bf16.msra.mxu0 %v5162_v39  ;;  %3804 = vmatpush1.bf16.msra.mxu1 %v5165_v42  ;;  %v2219_v39 = vadd.f32 %v6499_v18, %v1974_v31  ;;  %v5248_v42 = vld [vmem:[%s7048_s7 + $0x6cc] ss:$28 sps:$4 sm:$0xff]   ;;  %v5310_v31 = vld [vmem:[%s7048_s7 + $0x600] ss:$28 sps:$4 sm:$0xff]  }
 0x387   :  { %3723 = vmatprep.subr.bf16.mxu0 %v5170_v43  ;;  %3805 = vmatprep.subr.bf16.mxu1 %v5173_v44  ;;  %v5251_v43 = vld [vmem:[%s7048_s7 + $0x6d4] ss:$28 sps:$4 sm:$0xff]   ;;  %v5246_v44 = vld [vmem:[%s7048_s7 + $0x6c8] ss:$28 sps:$4 sm:$0xff]  }
 0x388   :  { %v5249_v18 = vld [vmem:[%s7048_s7 + $0x6d0] ss:$28 sps:$4 sm:$0xff]  }
 0x38a   :  { %3724 = vmatpush1.bf16.msra.mxu0 %v5168_v45  ;;  %3806 = vmatpush1.bf16.msra.mxu1 %v5171_v46  ;;  %v2227_v45 = vmax.f32 %v2219_v39, 0.0  ;;  %v5254_v46 = vld [vmem:[%s7048_s7 + $0x14] ss:$28 sps:$4 sm:$0xff]  }
 0x38b   :  { %3725 = vmatprep.subr.bf16.mxu0 %v5176_v47  ;;  %3807 = vmatprep.subr.bf16.mxu1 %v5179_v48  ;;  %v5255_v47 = vld [vmem:[%s7048_s7 + $0x1d8] ss:$28 sps:$4 sm:$0xff]   ;;  %v5252_v48 = vld [vmem:[%s7048_s7 + $0x10] ss:$28 sps:$4 sm:$0xff]  }
 0x38c   :  { %v5312_v39 = vld [vmem:[%s7048_s7 + $0x2b0] ss:$28 sps:$4 sm:$0xff]  }
 0x38e   :  { %3726 = vmatpush1.bf16.msra.mxu0 %v5174_v49  ;;  %3808 = vmatpush1.bf16.msra.mxu1 %v5177_v50  ;;  %v6711_v49 = vpack.c.bf16 %v2227_v45, %v2227_v45  ;;  %v5256_v50 = vld [vmem:[%s7048_s7 + $0x18] ss:$28 sps:$4 sm:$0xff]   ;;  %v5321_v45 = vld [vmem:[%s7048_s7 + $0x4b0] ss:$28 sps:$4 sm:$0xff]  }
 0x38f   :  { %3727 = vmatprep.subr.bf16.mxu0 %v5182_v51  ;;  %3809 = vmatprep.subr.bf16.mxu1 %v5185_v52  ;;  %v5259_v51 = vld [vmem:[%s7048_s7 + $0x4c] ss:$28 sps:$4 sm:$0xff]  }
 0x390   :  { %v5260_v52 = vld [vmem:[%s7048_s7 + $0x210] ss:$28 sps:$4 sm:$0xff]  }
 0x392   :  { %3728 = vmatpush1.bf16.msra.mxu0 %v5180_v53  ;;  %3810 = vmatpush1.bf16.msra.mxu1 %v5183_v54  ;;  %v5257_v53 = vld [vmem:[%s7048_s7 + $0x48] ss:$28 sps:$4 sm:$0xff]   ;;  %v5261_v54 = vld [vmem:[%s7048_s7 + $0x50] ss:$28 sps:$4 sm:$0xff]  }
 0x393   :  { %3729 = vmatprep.subr.bf16.mxu0 %v5188_v55  ;;  %3811 = vmatprep.subr.bf16.mxu1 %v5191_v56  ;;  %v5264_v55 = vld [vmem:[%s7048_s7 + $0x84] ss:$28 sps:$4 sm:$0xff]  }
 0x394   :  { %v5265_v56 = vld [vmem:[%s7048_s7 + $0x248] ss:$28 sps:$4 sm:$0xff]  }
 0x396   :  { %3730 = vmatpush1.bf16.msra.mxu0 %v5186_v57  ;;  %3812 = vmatpush1.bf16.msra.mxu1 %v5189_v58  ;;  %v5262_v57 = vld [vmem:[%s7048_s7 + $0x80] ss:$28 sps:$4 sm:$0xff]  }
 0x397   :  { %3731 = vmatprep.subr.bf16.mxu0 %v5194_v59  ;;  %3813 = vmatprep.subr.bf16.mxu1 %v5197_v60  ;;  %v5269_v58 = vld [vmem:[%s7048_s7 + $0xbc] ss:$28 sps:$4 sm:$0xff]  }
 0x398   :  { %v5270_v59 = vld [vmem:[%s7048_s7 + $0x280] ss:$28 sps:$4 sm:$0xff]   ;;  %v5267_v60 = vld [vmem:[%s7048_s7 + $0xb8] ss:$28 sps:$4 sm:$0xff]  }
 0x39a   :  { %3732 = vmatpush1.bf16.msra.mxu0 %v5192_v61  ;;  %3814 = vmatpush1.bf16.msra.mxu1 %v5195_v62  ;;  %v5271_v61 = vld [vmem:[%s7048_s7 + $0xc0] ss:$28 sps:$4 sm:$0xff]   ;;  %v5274_v62 = vld [vmem:[%s7048_s7 + $0xf4] ss:$28 sps:$4 sm:$0xff]  }
 0x39b   :  { %3733 = vmatprep.subr.bf16.mxu0 %v5200_v63  ;;  %3815 = vmatprep.subr.bf16.mxu1 %v5203_v0  ;;  %v5275_v63 = vld [vmem:[%s7048_s7 + $0x2b8] ss:$28 sps:$4 sm:$0xff]   ;;  %v5272_v0 = vld [vmem:[%s7048_s7 + $0xf0] ss:$28 sps:$4 sm:$0xff]  }
 0x39e   :  { %3734 = vmatpush1.bf16.msra.mxu0 %v5198_v1  ;;  %3816 = vmatpush1.bf16.msra.mxu1 %v5201_v2  ;;  %v5276_v1 = vld [vmem:[%s7048_s7 + $0xf8] ss:$28 sps:$4 sm:$0xff]   ;;  %v5279_v2 = vld [vmem:[%s7048_s7 + $0x12c] ss:$28 sps:$4 sm:$0xff]  }
 0x39f   :  { %3735 = vmatprep.subr.bf16.mxu0 %v5206_v3  ;;  %3817 = vmatprep.subr.bf16.mxu1 %v5209_v4  ;;  %v5280_v3 = vld [vmem:[%s7048_s7 + $0x2f0] ss:$28 sps:$4 sm:$0xff]   ;;  %v5277_v4 = vld [vmem:[%s7048_s7 + $0x128] ss:$28 sps:$4 sm:$0xff]  }
 0x3a2   :  { %3736 = vmatpush1.bf16.msra.mxu0 %v5204_v5  ;;  %3818 = vmatpush1.bf16.msra.mxu1 %v5207_v6  ;;  %v5281_v5 = vld [vmem:[%s7048_s7 + $0x130] ss:$28 sps:$4 sm:$0xff]   ;;  %v5284_v6 = vld [vmem:[%s7048_s7 + $0x164] ss:$28 sps:$4 sm:$0xff]  }
 0x3a3   :  { %3737 = vmatprep.subr.bf16.mxu0 %v5212_v8  ;;  %3819 = vmatprep.subr.bf16.mxu1 %v5215_v9  ;;  %v5285_v8 = vld [vmem:[%s7048_s7 + $0x328] ss:$28 sps:$4 sm:$0xff]   ;;  %v5282_v9 = vld [vmem:[%s7048_s7 + $0x160] ss:$28 sps:$4 sm:$0xff]  }
 0x3a6   :  { %3738 = vmatpush1.bf16.msra.mxu0 %v5210_v10  ;;  %3820 = vmatpush1.bf16.msra.mxu1 %v5213_v11  ;;  %v5286_v10 = vld [vmem:[%s7048_s7 + $0x168] ss:$28 sps:$4 sm:$0xff]   ;;  %v5289_v11 = vld [vmem:[%s7048_s7 + $0x19c] ss:$28 sps:$4 sm:$0xff]  }
 0x3a7   :  { %3739 = vmatprep.subr.bf16.mxu0 %v5218_v13  ;;  %3821 = vmatprep.subr.bf16.mxu1 %v5221_v14  ;;  %v5290_v13 = vld [vmem:[%s7048_s7 + $0x360] ss:$28 sps:$4 sm:$0xff]   ;;  %v5287_v14 = vld [vmem:[%s7048_s7 + $0x198] ss:$28 sps:$4 sm:$0xff]  }
 0x3aa   :  { %3740 = vmatpush1.bf16.msra.mxu0 %v5216_v15  ;;  %3822 = vmatpush1.bf16.msra.mxu1 %v5219_v16  ;;  %v5291_v15 = vld [vmem:[%s7048_s7 + $0x1a0] ss:$28 sps:$4 sm:$0xff]   ;;  %v5294_v16 = vld [vmem:[%s7048_s7 + $0x1d4] ss:$28 sps:$4 sm:$0xff]  }
 0x3ab   :  { %3741 = vmatprep.subr.bf16.mxu0 %v5224_v19  ;;  %3823 = vmatprep.subr.bf16.mxu1 %v5227_v20  ;;  %v5295_v19 = vld [vmem:[%s7048_s7 + $0x558] ss:$28 sps:$4 sm:$0xff]   ;;  %v5292_v20 = vld [vmem:[%s7048_s7 + $0x1d0] ss:$28 sps:$4 sm:$0xff]  }
 0x3ae   :  { %3742 = vmatpush1.bf16.msra.mxu0 %v5222_v21  ;;  %3824 = vmatpush1.bf16.msra.mxu1 %v5225_v22  ;;  %v5296_v21 = vld [vmem:[%s7048_s7 + $0x398] ss:$28 sps:$4 sm:$0xff]   ;;  %v5299_v22 = vld [vmem:[%s7048_s7 + $0x20c] ss:$28 sps:$4 sm:$0xff]  }
 0x3af   :  { %3743 = vmatprep.subr.bf16.mxu0 %v5230_v17  ;;  %3825 = vmatprep.subr.bf16.mxu1 %v5233_v23  ;;  %v5300_v17 = vld [vmem:[%s7048_s7 + $0x590] ss:$28 sps:$4 sm:$0xff]   ;;  %v5297_v23 = vld [vmem:[%s7048_s7 + $0x208] ss:$28 sps:$4 sm:$0xff]  }
 0x3b2   :  { %3744 = vmatpush1.bf16.msra.mxu0 %v5228_v24  ;;  %3826 = vmatpush1.bf16.msra.mxu1 %v5231_v25  ;;  %v5301_v24 = vld [vmem:[%s7048_s7 + $0x3d0] ss:$28 sps:$4 sm:$0xff]   ;;  %v5304_v25 = vld [vmem:[%s7048_s7 + $0x244] ss:$28 sps:$4 sm:$0xff]  }
 0x3b3   :  { %3745 = vmatprep.subr.bf16.mxu0 %v5236_v26  ;;  %3827 = vmatprep.subr.bf16.mxu1 %v5239_v27  ;;  %v5305_v26 = vld [vmem:[%s7048_s7 + $0x5c8] ss:$28 sps:$4 sm:$0xff]   ;;  %v5302_v27 = vld [vmem:[%s7048_s7 + $0x240] ss:$28 sps:$4 sm:$0xff]  }
 0x3b6   :  { %3746 = vmatpush1.bf16.msra.mxu0 %v5234_v28  ;;  %3828 = vmatpush1.bf16.msra.mxu1 %v5237_v29  ;;  %v5306_v28 = vld [vmem:[%s7048_s7 + $0x408] ss:$28 sps:$4 sm:$0xff]   ;;  %v5309_v29 = vld [vmem:[%s7048_s7 + $0x27c] ss:$28 sps:$4 sm:$0xff]  }
 0x3b7   :  { %3747 = vmatprep.subr.bf16.mxu0 %v5242_v32  ;;  %3829 = vmatprep.subr.bf16.mxu1 %v5245_v34  ;;  %v5307_v32 = vld [vmem:[%s7048_s7 + $0x278] ss:$28 sps:$4 sm:$0xff]   ;;  %v5311_v34 = vld [vmem:[%s7048_s7 + $0x440] ss:$28 sps:$4 sm:$0xff]  }
 0x3ba   :  { %3748 = vmatpush1.bf16.msra.mxu0 %v5240_v35  ;;  %3830 = vmatpush1.bf16.msra.mxu1 %v5243_v12  ;;  %v5314_v35 = vld [vmem:[%s7048_s7 + $0x2b4] ss:$28 sps:$4 sm:$0xff]  }
 0x3bb   :  { %3749 = vmatprep.subr.bf16.mxu0 %v5248_v42  ;;  %3831 = vmatprep.subr.bf16.mxu1 %v5251_v43  ;;  %v5315_v12 = vld [vmem:[%s7048_s7 + $0x638] ss:$28 sps:$4 sm:$0xff]   ;;  %v5319_v43 = vld [vmem:[%s7048_s7 + $0x2ec] ss:$28 sps:$4 sm:$0xff]  }
 0x3bc   :  { %v5316_v42 = vld [vmem:[%s7048_s7 + $0x478] ss:$28 sps:$4 sm:$0xff]  }
 0x3be   :  { %3750 = vmatpush1.bf16.msra.mxu0 %v5246_v44  ;;  %3832 = vmatpush1.bf16.msra.mxu1 %v5249_v18  ;;  %v5320_v44 = vld [vmem:[%s7048_s7 + $0x670] ss:$28 sps:$4 sm:$0xff]   ;;  %v5317_v18 = vld [vmem:[%s7048_s7 + $0x2e8] ss:$28 sps:$4 sm:$0xff]  }
 0x3bf   :  { %3842 = vmatprep.subr.bf16.mxu0 %v5254_v46  ;;  %4595 = vmatprep.subr.bf16.mxu1 %v5255_v47  ;;  %v5324_v46 = vld [vmem:[%s7048_s7 + $0x324] ss:$28 sps:$4 sm:$0xff]  }
 0x3c0   :  { %v5325_v47 = vld [vmem:[%s7048_s7 + $0x6a8] ss:$28 sps:$4 sm:$0xff]  }
 0x3c1   :  { %3752 = vmatmul.mubr.bf16.vlgmr.msra.gmra.mrb[8].mxu0 %v6711_v49  ;;  %3834 = vmatmul.mubr.bf16.vlgmr.msra.gmra.mrb[16].mxu1 %v6711_v49 }
 0x3c2   :  { %3843 = vmatpush1.bf16.msra.mxu0 %v5252_v48  ;;  %3874 = vmatprep.mubr.bf16.mxu0 %v6501_v30  ;;  %v5322_v48 = vld [vmem:[%s7048_s7 + $0x320] ss:$28 sps:$4 sm:$0xff]  }
 0x3c3   :  { %4596 = vmatpush3.bf16.msra.mxu1 %v5256_v50  ;;  %3956 = vmatprep.mubr.bf16.mxu1 %v6501_v30  ;;  %v5266_v30 = vld [vmem:[%s7048_s7 + $0x88] ss:$28 sps:$4 sm:$0xff]  }
 0x3c4   :  { %3844 = vmatprep.subr.bf16.mxu0 %v5259_v51  ;;  %4597 = vmatprep.subr.bf16.mxu1 %v5260_v52  ;;  %v5326_v50 = vld [vmem:[%s7048_s7 + $0x4e8] ss:$28 sps:$4 sm:$0xff]   ;;  %v5329_v51 = vld [vmem:[%s7048_s7 + $0x35c] ss:$28 sps:$4 sm:$0xff]  }
 0x3c5   :  { %v5330_v52 = vld [vmem:[%s7048_s7 + $0x6e0] ss:$28 sps:$4 sm:$0xff]  }
 0x3c6   :  { %3845 = vmatpush1.bf16.msra.mxu0 %v5257_v53  ;;  %v5327_v53 = vld [vmem:[%s7048_s7 + $0x358] ss:$28 sps:$4 sm:$0xff]  }
 0x3c7   :  { %4598 = vmatpush3.bf16.msra.mxu1 %v5261_v54  ;;  %3846 = vmatprep.subr.bf16.mxu0 %v5264_v55  ;;  %v5331_v54 = vld [vmem:[%s7048_s7 + $0x520] ss:$28 sps:$4 sm:$0xff]   ;;  %v5334_v55 = vld [vmem:[%s7048_s7 + $0x394] ss:$28 sps:$4 sm:$0xff]  }
 0x3c8   :  { %4599 = vmatprep.subr.bf16.mxu1 %v5265_v56  ;;  %v5332_v56 = vld [vmem:[%s7048_s7 + $0x390] ss:$28 sps:$4 sm:$0xff]  }
 0x3ca   :  { %3847 = vmatpush1.bf16.msra.mxu0 %v5262_v57  ;;  %v5337_v57 = vld [vmem:[%s7048_s7 + $0x3cc] ss:$28 sps:$4 sm:$0xff]  }
 0x3cb   :  { %4600 = vmatpush3.bf16.msra.mxu1 %v5266_v30  ;;  %3848 = vmatprep.subr.bf16.mxu0 %v5269_v58  ;;  %v5335_v30 = vld [vmem:[%s7048_s7 + $0x3c8] ss:$28 sps:$4 sm:$0xff]  }
 0x3cc   :  { %4601 = vmatprep.subr.bf16.mxu1 %v5270_v59  ;;  %v5340_v58 = vld [vmem:[%s7048_s7 + $0x404] ss:$28 sps:$4 sm:$0xff]  }
 0x3cd   :  { %v5338_v59 = vld [vmem:[%s7048_s7 + $0x400] ss:$28 sps:$4 sm:$0xff]  }
 0x3ce   :  { %3849 = vmatpush1.bf16.msra.mxu0 %v5267_v60  ;;  %v5346_v60 = vld [vmem:[%s7048_s7 + $0x474] ss:$28 sps:$4 sm:$0xff]  }
 0x3cf   :  { %4602 = vmatpush3.bf16.msra.mxu1 %v5271_v61  ;;  %3850 = vmatprep.subr.bf16.mxu0 %v5274_v62  ;;  %v5344_v61 = vld [vmem:[%s7048_s7 + $0x470] ss:$28 sps:$4 sm:$0xff]  }
 0x3d0   :  { %4603 = vmatprep.subr.bf16.mxu1 %v5275_v63  ;;  %v5349_v62 = vld [vmem:[%s7048_s7 + $0x4ac] ss:$28 sps:$4 sm:$0xff]  }
 0x3d1   :  { %v5347_v63 = vld [vmem:[%s7048_s7 + $0x4a8] ss:$28 sps:$4 sm:$0xff]  }
 0x3d2   :  { %3851 = vmatpush1.bf16.msra.mxu0 %v5272_v0  ;;  %v5352_v0 = vld [vmem:[%s7048_s7 + $0x4e4] ss:$28 sps:$4 sm:$0xff]  }
 0x3d3   :  { %4604 = vmatpush3.bf16.msra.mxu1 %v5276_v1  ;;  %3852 = vmatprep.subr.bf16.mxu0 %v5279_v2  ;;  %v5350_v1 = vld [vmem:[%s7048_s7 + $0x4e0] ss:$28 sps:$4 sm:$0xff]  }
 0x3d4   :  { %4605 = vmatprep.subr.bf16.mxu1 %v5280_v3  ;;  %v5355_v2 = vld [vmem:[%s7048_s7 + $0x51c] ss:$28 sps:$4 sm:$0xff]  }
 0x3d5   :  { %v5353_v3 = vld [vmem:[%s7048_s7 + $0x518] ss:$28 sps:$4 sm:$0xff]  }
 0x3d6   :  { %3853 = vmatpush1.bf16.msra.mxu0 %v5277_v4  ;;  %v5358_v4 = vld [vmem:[%s7048_s7 + $0x554] ss:$28 sps:$4 sm:$0xff]  }
 0x3d7   :  { %4606 = vmatpush3.bf16.msra.mxu1 %v5281_v5  ;;  %3854 = vmatprep.subr.bf16.mxu0 %v5284_v6  ;;  %v5356_v5 = vld [vmem:[%s7048_s7 + $0x550] ss:$28 sps:$4 sm:$0xff]  }
 0x3d8   :  { %4607 = vmatprep.subr.bf16.mxu1 %v5285_v8  ;;  %v5361_v6 = vld [vmem:[%s7048_s7 + $0x58c] ss:$28 sps:$4 sm:$0xff]  }
 0x3d9   :  { %v5359_v8 = vld [vmem:[%s7048_s7 + $0x588] ss:$28 sps:$4 sm:$0xff]  }
 0x3da   :  { %3855 = vmatpush1.bf16.msra.mxu0 %v5282_v9  ;;  %v5364_v9 = vld [vmem:[%s7048_s7 + $0x5c4] ss:$28 sps:$4 sm:$0xff]  }
 0x3db   :  { %4608 = vmatpush3.bf16.msra.mxu1 %v5286_v10  ;;  %3856 = vmatprep.subr.bf16.mxu0 %v5289_v11  ;;  %v5362_v10 = vld [vmem:[%s7048_s7 + $0x5c0] ss:$28 sps:$4 sm:$0xff]  }
 0x3dc   :  { %4609 = vmatprep.subr.bf16.mxu1 %v5290_v13  ;;  %v5367_v11 = vld [vmem:[%s7048_s7 + $0x5fc] ss:$28 sps:$4 sm:$0xff]  }
 0x3dd   :  { %v5365_v13 = vld [vmem:[%s7048_s7 + $0x5f8] ss:$28 sps:$4 sm:$0xff]  }
 0x3de   :  { %3857 = vmatpush1.bf16.msra.mxu0 %v5287_v14  ;;  %v5370_v14 = vld [vmem:[%s7048_s7 + $0x634] ss:$28 sps:$4 sm:$0xff]  }
 0x3df   :  { %4610 = vmatpush3.bf16.msra.mxu1 %v5291_v15  ;;  %3858 = vmatprep.subr.bf16.mxu0 %v5294_v16  ;;  %v5368_v15 = vld [vmem:[%s7048_s7 + $0x630] ss:$28 sps:$4 sm:$0xff]  }
 0x3e0   :  { %4617 = vmatprep.subr.bf16.mxu1 %v5295_v19  ;;  %v5373_v16 = vld [vmem:[%s7048_s7 + $0x66c] ss:$28 sps:$4 sm:$0xff]  }
 0x3e1   :  { %v5371_v19 = vld [vmem:[%s7048_s7 + $0x668] ss:$28 sps:$4 sm:$0xff]  }
 0x3e2   :  { %3957 = vmatmul.mubr.bf16.vlgmr.msra.gmra.mrb[20].mxu1 %v6509_v33  ;;  %3859 = vmatpush1.bf16.msra.mxu0 %v5292_v20  ;;  %v5376_v20 = vld [vmem:[%s7048_s7 + $0x6a4] ss:$28 sps:$4 sm:$0xff]  }
 0x3e3   :  { %4618 = vmatpush3.bf16.msra.mxu1 %v5296_v21  ;;  %3996 = vmatprep.mubr.bf16.mxu1 %v6519_v36  ;;  %v5374_v21 = vld [vmem:[%s7048_s7 + $0x6a0] ss:$28 sps:$4 sm:$0xff]  }
 0x3e4   :  { %3860 = vmatprep.subr.bf16.mxu0 %v5299_v22  ;;  %4619 = vmatprep.subr.bf16.mxu1 %v5300_v17  ;;  %v5379_v22 = vld [vmem:[%s7048_s7 + $0x6dc] ss:$28 sps:$4 sm:$0xff]  }
 0x3e5   :  { %v5377_v17 = vld [vmem:[%s7048_s7 + $0x6d8] ss:$28 sps:$4 sm:$0xff]  }
 0x3e6   :  { %3861 = vmatpush1.bf16.msra.mxu0 %v5297_v23  ;;  %v7005_v23 = vld [vmem:[%s7051_s8] sm:$0x7f] }
 0x3e7   :  { %4620 = vmatpush3.bf16.msra.mxu1 %v5301_v24  ;;  %3862 = vmatprep.subr.bf16.mxu0 %v5304_v25  ;;  %v2494_v24 = vrot.slane %v7005_v23, %v6127_v38  ;;  %v2502_v25 = vrot.slane %v7005_v23, %v6169_v7 }
 0x3e8   :  { %4621 = vmatprep.subr.bf16.mxu1 %v5305_v26  ;;  %v2498_v26 = vrot.slane %v7005_v23, %v6133_v40 }
 0x3ea   :  { %3863 = vmatpush1.bf16.msra.mxu0 %v5302_v27  ;;  %v2506_v27 = vrot.slane %v7005_v23, %v6136_v41 }
 0x3eb   :  { %4622 = vmatpush3.bf16.msra.mxu1 %v5306_v28  ;;  %3864 = vmatprep.subr.bf16.mxu0 %v5309_v29 }
 0x3ec   :  { %4623 = vmatprep.subr.bf16.mxu1 %v5310_v31 }
 0x3ee   :  { %3865 = vmatpush1.bf16.msra.mxu0 %v5307_v32 }
 0x3ef   :  { %4624 = vmatpush3.bf16.msra.mxu1 %v5311_v34  ;;  %3866 = vmatprep.subr.bf16.mxu0 %v5314_v35 }
 0x3f0   :  { %4625 = vmatprep.subr.bf16.mxu1 %v5315_v12 }
 0x3f2   :  { %3867 = vmatpush1.bf16.msra.mxu0 %v5312_v39 }
 0x3f3   :  { %4626 = vmatpush3.bf16.msra.mxu1 %v5316_v42  ;;  %3868 = vmatprep.subr.bf16.mxu0 %v5319_v43 }
 0x3f4   :  { %4627 = vmatprep.subr.bf16.mxu1 %v5320_v44 }
 0x3f6   :  { %3869 = vmatpush1.bf16.msra.mxu0 %v5317_v18 }
 0x3f7   :  { %4628 = vmatpush3.bf16.msra.mxu1 %v5321_v45  ;;  %3870 = vmatprep.subr.bf16.mxu0 %v5324_v46 }
 0x3f8   :  { %4629 = vmatprep.subr.bf16.mxu1 %v5325_v47 }
 0x3fa   :  { %3871 = vmatpush1.bf16.msra.mxu0 %v5322_v48 }
 0x3fb   :  { %4630 = vmatpush3.bf16.msra.mxu1 %v5326_v50  ;;  %3872 = vmatprep.subr.bf16.mxu0 %v5329_v51 }
 0x3fc   :  { %4631 = vmatprep.subr.bf16.mxu1 %v5330_v52 }
 0x3fe   :  { %3873 = vmatpush1.bf16.msra.mxu0 %v5327_v53 }
 0x3ff   :  { %4632 = vmatpush3.bf16.msra.mxu1 %v5331_v54  ;;  %3883 = vmatprep.subr.bf16.mxu0 %v5334_v55 }
 0x401   :  { %3875 = vmatmul.mubr.bf16.vlgmr.msra.gmra.mrb[12].mxu0 %v6509_v33  ;;  %v5343_v33 = vld [vmem:[%s7048_s7 + $0x43c] ss:$28 sps:$4 sm:$0xff]  }
 0x402   :  { %3997 = vmatmul.mubr.bf16.vlgmr.msra.gmra.mrb[24].mxu1 %v6711_v49  ;;  %3884 = vmatpush1.bf16.msra.mxu0 %v5332_v56 }
 0x403   :  { %3915 = vmatprep.mubr.bf16.mxu0 %v6519_v36  ;;  %3885 = vmatprep.subr.bf16.mxu0 %v5337_v57  ;;  %v5341_v36 = vld [vmem:[%s7048_s7 + $0x438] ss:$28 sps:$4 sm:$0xff]  }
 0x406   :  { %3886 = vmatpush1.bf16.msra.mxu0 %v5335_v30 }
 0x407   :  { %3887 = vmatprep.subr.bf16.mxu0 %v5340_v58 }
 0x40a   :  { %3888 = vmatpush1.bf16.msra.mxu0 %v5338_v59 }
 0x40b   :  { %3889 = vmatprep.subr.bf16.mxu0 %v5343_v33 }
 0x40e   :  { %3890 = vmatpush1.bf16.msra.mxu0 %v5341_v36 }
 0x40f   :  { %3891 = vmatprep.subr.bf16.mxu0 %v5346_v60 }
 0x412   :  { %3892 = vmatpush1.bf16.msra.mxu0 %v5344_v61 }
 0x413   :  { %3893 = vmatprep.subr.bf16.mxu0 %v5349_v62 }
 0x416   :  { %3894 = vmatpush1.bf16.msra.mxu0 %v5347_v63 }
 0x417   :  { %3895 = vmatprep.subr.bf16.mxu0 %v5352_v0 }
 0x41a   :  { %3896 = vmatpush1.bf16.msra.mxu0 %v5350_v1 }
 0x41b   :  { %3897 = vmatprep.subr.bf16.mxu0 %v5355_v2 }
 0x41e   :  { %3898 = vmatpush1.bf16.msra.mxu0 %v5353_v3  ;;  %v2517_v3 = vsub.s32 6, %v6124_v37 }
 0x41f   :  { %3899 = vmatprep.subr.bf16.mxu0 %v5358_v4 }
 0x420   :  { %v2518_v4 = vrot.slane %v7005_v23, %v2517_v3 }
 0x422   :  { %3900 = vmatpush1.bf16.msra.mxu0 %v5356_v5 }
 0x423   :  { %3901 = vmatprep.subr.bf16.mxu0 %v5361_v6 }
 0x426   :  { %3902 = vmatpush1.bf16.msra.mxu0 %v5359_v8 }
 0x427   :  { %3903 = vmatprep.subr.bf16.mxu0 %v5364_v9 }
 0x42a   :  { %3904 = vmatpush1.bf16.msra.mxu0 %v5362_v10 }
 0x42b   :  { %3905 = vmatprep.subr.bf16.mxu0 %v5367_v11 }
 0x42e   :  { %3906 = vmatpush1.bf16.msra.mxu0 %v5365_v13 }
 0x42f   :  { %3907 = vmatprep.subr.bf16.mxu0 %v5370_v14 }
 0x432   :  { %3908 = vmatpush1.bf16.msra.mxu0 %v5368_v15 }
 0x433   :  { %3909 = vmatprep.subr.bf16.mxu0 %v5373_v16 }
 0x436   :  { %3910 = vmatpush1.bf16.msra.mxu0 %v5371_v19 }
 0x437   :  { %3911 = vmatprep.subr.bf16.mxu0 %v5376_v20 }
 0x43a   :  { %3912 = vmatpush1.bf16.msra.mxu0 %v5374_v21 }
 0x43b   :  { %3913 = vmatprep.subr.bf16.mxu0 %v5379_v22  ;;  %v2509_v22 = vsub.s32 4, %v6124_v37 }
 0x43e   :  { %3914 = vmatpush1.bf16.msra.mxu0 %v5377_v17  ;;  %v2513_v17 = vsub.s32 5, %v6124_v37 }
 0x441   :  { %3916 = vmatmul.mubr.bf16.vlgmr.msra.gmra.mrb[12].mxu0 %v6711_v49 }
 0x494   :  { %v3753_v28 = vpop.f32.mrb[8].mxu0  ;;  %v3835_v29 = vpop.f32.mrb[16].mxu1 }
 0x495   :  { %v4643_v49 = vadd.f32 %v3753_v28, %v2494_v24  ;;  %v4645_v31 = vadd.f32 %v3835_v29, %v2502_v25  ;;  %v3755_v32 = vpop.f32.mrb[9].mxu0  ;;  %v3837_v34 = vpop.f32.mrb[17].mxu1  ;;  %v2510_v24 = vrot.slane %v7005_v23, %v2509_v22  ;;  %v2514_v25 = vrot.slane %v7005_v23, %v2513_v17 }
 0x496   :  { %v4644_v35 = vadd.f32 %v3755_v32, %v2498_v26  ;;  %v4646_v12 = vadd.f32 %v3837_v34, %v2506_v27  ;;  %v3757_v39 = vpop.f32.mrb[10].mxu0  ;;  %v3839_v42 = vpop.f32.mrb[18].mxu1 }
 0x497   :  { %v4004_v38 = vsub.f32 0.0, %v4643_v49  ;;  %v4006_v43 = vsub.f32 0.0, %v4645_v31  ;;  %v3758_v44 = vpop.f32.mrb[11].mxu0  ;;  %v3840_v7 = vpop.f32.mrb[19].mxu1 }
 0x498   :  { %v4005_v18 = vsub.f32 0.0, %v4644_v35  ;;  %v4007_v45 = vsub.f32 0.0, %v4646_v12 }
 0x499   :  { %v4011_v40 = vmin.f32 %v4004_v38, 30.0  ;;  %v4013_v46 = vmin.f32 %v4006_v43, 30.0 }
 0x49a   :  { %v4012_v47 = vmin.f32 %v4005_v18, 30.0  ;;  %v4014_v41 = vmin.f32 %v4007_v45, 30.0 }
 0x49b   :  { %v4018_v48 = vmul.f32 1.442695, %v4011_v40  ;;  %v4022_v50 = vmul.f32 1.442695, %v4013_v46 }
 0x49c   :  { %v4020_v51 = vmul.f32 1.442695, %v4012_v47  ;;  %v4024_v52 = vmul.f32 1.442695, %v4014_v41 }
 0x49d   :  { %5380 = vpow2.f32 %v4018_v48 }
 0x49e   :  { %5382 = vpow2.f32 %v4022_v50 }
 0x49f   :  { %5384 = vpow2.f32 %v4020_v51 }
 0x4a0   :  { %5386 = vpow2.f32 %v4024_v52 }
 0x4a7   :  { %v5381_v53 = vpop.eup %5380 }
 0x4a8   :  { %v5383_v54 = vpop.eup %5382  ;;  %v4032_v55 = vadd.f32 1.0, %v5381_v53 }
 0x4a9   :  { %v5385_v56 = vpop.eup %5384  ;;  %v4034_v57 = vadd.f32 1.0, %v5383_v54 }
 0x4aa   :  { %v5387_v30 = vpop.eup %5386  ;;  %5388 = vrcp.f32 %v4032_v55  ;;  %v4033_v58 = vadd.f32 1.0, %v5385_v56 }
 0x4ab   :  { %5390 = vrcp.f32 %v4034_v57  ;;  %v4035_v59 = vadd.f32 1.0, %v5387_v30 }
 0x4ac   :  { %5392 = vrcp.f32 %v4033_v58 }
 0x4ad   :  { %5394 = vrcp.f32 %v4035_v59 }
 0x4b4   :  { %v5389_v33 = vpop.eup %5388 }
 0x4b5   :  { %v5391_v36 = vpop.eup %5390  ;;  %4053 = vst [vmem:[%s7052_s9] sm:$0xff] %v5389_v33  ;;  %v4611_v60 = vpop.f32.mrb[20].mxu1 }
 0x4b6   :  { %v5393_v61 = vpop.eup %5392  ;;  %4055 = vst [vmem:[%s7052_s9 + $0x10] sm:$0xff] %v5391_v36  ;;  %v4612_v62 = vpop.f32.mrb[21].mxu1 }
 0x4b7   :  { %v5395_v63 = vpop.eup %5394  ;;  %4054 = vst [vmem:[%s7052_s9 + $0x8] sm:$0xff] %v5393_v61  ;;  %v4613_v0 = vadd.f32 %v4612_v62, %v4611_v60  ;;  %v4614_v1 = vpop.f32.mrb[22].mxu1 }
 0x4b8   :  { %4056 = vst [vmem:[%s7052_s9 + $0x18] sm:$0xff] %v5395_v63  ;;  %v4615_v2 = vpop.f32.mrb[23].mxu1 }
 0x4b9   :  { %v3959_v8 = vadd.f32 %v4613_v0, %v2518_v4 }
 0x4d5   :  { %v4633_v5 = vpop.f32.mrb[24].mxu1 }
 0x4d6   :  { %v4634_v6 = vpop.f32.mrb[25].mxu1 }
 0x4d7   :  { %v4635_v9 = vadd.f32 %v4634_v6, %v4633_v5  ;;  %v4636_v10 = vpop.f32.mrb[26].mxu1 }
 0x4d8   :  { %v4637_v11 = vpop.f32.mrb[27].mxu1 }
 0x4d9   :  { %v3999_v13 = vadd.f32 %v4635_v9, %v3959_v8 }
 0x4db   :  { %v4010_v14 = vsub.f32 0.0, %v3999_v13 }
 0x4dd   :  { %v4017_v15 = vmin.f32 %v4010_v14, 30.0 }
 0x4df   :  { %v4030_v16 = vmul.f32 1.442695, %v4017_v15 }
 0x4e1   :  { %5396 = vpow2.f32 %v4030_v16 }
 0x4eb   :  { %v5397_v19 = vpop.eup %5396 }
 0x4ec   :  { %v4038_v20 = vadd.f32 1.0, %v5397_v19 }
 0x4ee   :  { %5398 = vrcp.f32 %v4038_v20 }
 0x4f8   :  { %v5399_v21 = vpop.eup %5398 }
 0x4f9   :  { %4059 = vst.msk [vmem:[%s7052_s9 + $0x30] sm:$0xff] %vm1245_vm0, %v5399_v21 }
 0x514   :  { %v3917_v26 = vpop.f32.mrb[12].mxu0 }
 0x515   :  { %v4647_v27 = vadd.f32 %v3917_v26, %v2510_v24  ;;  %v3919_v28 = vpop.f32.mrb[13].mxu0 }
 0x516   :  { %v4648_v29 = vadd.f32 %v3919_v28, %v2514_v25  ;;  %v3921_v49 = vpop.f32.mrb[14].mxu0 }
 0x517   :  { %v4008_v31 = vsub.f32 0.0, %v4647_v27  ;;  %v3922_v32 = vpop.f32.mrb[15].mxu0 }
 0x518   :  { %v4009_v34 = vsub.f32 0.0, %v4648_v29 }
 0x519   :  { %v4015_v35 = vmin.f32 %v4008_v31, 30.0 }
 0x51a   :  { %v4016_v12 = vmin.f32 %v4009_v34, 30.0 }
 0x51b   :  { %v4026_v39 = vmul.f32 1.442695, %v4015_v35 }
 0x51c   :  { %v4028_v42 = vmul.f32 1.442695, %v4016_v12 }
 0x51d   :  { %5400 = vpow2.f32 %v4026_v39 }
 0x51e   :  { %5402 = vpow2.f32 %v4028_v42 }
 0x527   :  { %v5401_v38 = vpop.eup %5400 }
 0x528   :  { %v5403_v37 = vpop.eup %5402  ;;  %v4036_v43 = vadd.f32 1.0, %v5401_v38 }
 0x529   :  { %v4037_v44 = vadd.f32 1.0, %v5403_v37 }
 0x52a   :  { %5404 = vrcp.f32 %v4036_v43 }
 0x52b   :  { %5406 = vrcp.f32 %v4037_v44 }
 0x534   :  { %v5405_v23 = vpop.eup %5404 }
 0x535   :  { %v5407_v7 = vpop.eup %5406  ;;  %4057 = vst [vmem:[%s7052_s9 + $0x20] sm:$0xff] %v5405_v23 }
 0x536   :  { %4058 = vst [vmem:[%s7052_s9 + $0x28] sm:$0xff] %v5407_v7 }

</bundles_post_ra>
